<compile_context>
chip_gen: v6e
topology: v6e:2x2x1
jax: 0.10.0
libtpu: 0.0.40
codegen_flags: <defaults>
</compile_context>

<pallas_src>
import functools

import jax
import jax.numpy as jnp
import numpy as np
from jax.experimental import pallas as pl
from jax.experimental.pallas import tpu as pltpu

LOG_2PI = float(np.log(2.0 * np.pi))
# SigmoidShiftScaler(b=0.001, m=2)
SS_B = 0.001
SS_M = 2.0
SIG_SHIFT = float(np.log((1.0 - SS_B) / (SS_M - 1.0)))
LEAKY_SLOPE = 0.01  # nn.LeakyReLU default negative_slope


def _ceil_div(a, b):
    return -(-a // b)


def _padded_bytes(shape, dtype):
    """Rough VMEM footprint of one tile incl. (sublane, lane) padding."""
    item = jnp.dtype(dtype).itemsize
    s = list(shape) if len(shape) >= 2 else [1] + list(shape)
    sub = 8 * max(1, 4 // item)
    lanes = _ceil_div(int(s[-1]), 128) * 128
    subl = _ceil_div(int(s[-2]), sub) * sub
    lead = 1
    for d in s[:-2]:
        lead *= int(d)
    return lead * subl * lanes * item


# ---------------------------------------------------------------------------
# Pallas kernel: one full block (num_layers fused coupling steps)
# ---------------------------------------------------------------------------
def _flow_block_kernel(z_ref, w1_ref, b1_ref, w2_ref, b2_ref, w3_ref, b3_ref,
                       zo_ref, ld_ref,
                       za_s, zb_s, zpad_s, hpad_s, y_s, ld_acc,
                       *, H, W, C1, hidden, num_layers):
    """grid = (batch, layer).  Activations stay resident in VMEM across layers.

    Carried layout ("W-padded flattened NHWC"): image position (r, c) of a C1-channel
    half lives at flat row r*(W+2) + c + 1; flat columns {0, W+1} of each row-block are
    zero and double as the conv left/right zero padding.
    """
    k = pl.program_id(1)
    Wp = W + 2
    N = H * Wp
    NP = (H + 3) * Wp            # padded slab rows (top pad + image + bottom pad/tail)
    NY = N + 2 * Wp + 2          # rows consumed by the output-stacked conv3 matmul
    C = 2 * C1

    # In-kernel masks (VPU iota; avoids lane-padded (N,1) operand DMAs).
    col = jax.lax.broadcasted_iota(jnp.int32, (N, 1), 0) % Wp
    macc = (col < W).astype(jnp.float32)                              # conv-output layout
    mpad = jnp.logical_and(col >= 1, col <= W).astype(jnp.float32)    # carried layout

    @pl.when(k == 0)
    def _init():
        z0 = z_ref[0]
        za_s[...] = z0[:, :C1]
        zb_s[...] = z0[:, C1:]
        ld_acc[...] = jnp.zeros_like(ld_acc)
        # Zero only the pad borders / tails of the conv slabs; the interiors are
        # rewritten every layer and the borders are never touched afterwards.
        zpad_s[pl.ds(0, Wp), :] = jnp.zeros((Wp, C1), zpad_s.dtype)
        zpad_s[pl.ds(Wp + N, NP - Wp - N), :] = jnp.zeros((NP - Wp - N, C1), zpad_s.dtype)
        hpad_s[pl.ds(0, Wp + 2), :] = jnp.zeros((Wp + 2, hidden), hpad_s.dtype)
        hpad_s[pl.ds(Wp + 2 + N, NP - (Wp + 2) - N), :] = jnp.zeros(
            (NP - (Wp + 2) - N, hidden), hpad_s.dtype)

    # ---- network input: second half, stored once as a bf16 zero-padded slab ----
    zpad_s[pl.ds(Wp, N), :] = zb_s[...].astype(zpad_s.dtype)

    # ---- conv3x3 (C1 -> hidden): K-stacked im2col -> ONE MXU matmul (K = 9*C1) ----
    patch = jnp.concatenate(
        [zpad_s[pl.ds(di * Wp + dj, N), :] for di in range(3) for dj in range(3)],
        axis=1)                                                        # (N, 9*C1) bf16
    h1 = jnp.dot(patch, w1_ref[0], preferred_element_type=jnp.float32) + b1_ref[0]
    h1 = jnp.where(h1 >= 0, h1, LEAKY_SLOPE * h1)

    # ---- conv1x1 (hidden -> hidden) ----
    h2 = jnp.dot(h1.astype(jnp.bfloat16), w2_ref[0],
                 preferred_element_type=jnp.float32) + b2_ref[0]
    h2 = jnp.where(h2 >= 0, h2, LEAKY_SLOPE * h2)

    # ---- padded hidden slab (bf16), shifted by +(W+4) flat rows so the final conv's
    #      output lands directly in the carried W-padded layout ----
    hpad_s[pl.ds(Wp + 2, N), :] = (h2 * macc).astype(hpad_s.dtype)

    # ---- conv3x3 (hidden -> 2*C1): output-stacked -> ONE matmul (Nout = 9*2*C1),
    #      then 9 row-shifted column-group adds on the VPU ----
    y_s[...] = jnp.dot(hpad_s[pl.ds(0, NY), :], w3_ref[0],
                       preferred_element_type=jnp.float32)
    acc3 = jnp.zeros((N, C), jnp.float32)
    for t in range(9):
        di, dj = t // 3, t % 3
        acc3 = acc3 + y_s[pl.ds(di * Wp + dj, N), pl.ds(t * C, C)]
    h3 = acc3 + b3_ref[0]
    shift = h3[:, :C1]
    scale = h3[:, C1:]

    # ---- SigmoidShiftScaler, logdet, affine coupling, folded ReversePermutation ----
    safescale = jax.nn.sigmoid(scale + SIG_SHIFT) * (SS_M - SS_B) + SS_B
    ld_acc[...] = ld_acc[...] + jnp.sum(jnp.log(safescale) * mpad)

    new_zb = (za_s[...] + shift) * safescale * mpad
    za_s[...] = zb_s[...]          # ReversePermutation: new first half = old second half
    zb_s[...] = new_zb

    @pl.when(k == num_layers - 1)
    def _finalize():
        zo_ref[0] = jnp.concatenate([za_s[...], zb_s[...]], axis=1)
        ld_ref[0] = ld_acc[...]


# ---------------------------------------------------------------------------
# Pallas wrapper
# ---------------------------------------------------------------------------
def fused_flow_block(z_packed, prepped_block, H, W):
    """All num_layers (ReversePermutation o AffineFlowStep) of one block, one call."""
    w1s, b1s, w2s, b2s, w3s, b3s = prepped_block
    B, N, C = z_packed.shape
    C1 = C // 2
    K = w1s.shape[0]
    hidden = w2s.shape[1]
    Wp = W + 2
    NP = (H + 3) * Wp
    NY = N + 2 * Wp + 2

    io_tiles = [
        ((1, N, C), jnp.float32), ((1, 9 * C1, hidden), jnp.bfloat16),
        ((1, 1, hidden), jnp.float32), ((1, hidden, hidden), jnp.bfloat16),
        ((1, 1, hidden), jnp.float32), ((1, hidden, 9 * C), jnp.bfloat16),
        ((1, 1, C), jnp.float32), ((1, N, C), jnp.float32), ((1, 1, 128), jnp.float32),
    ]
    scratch_tiles = [
        ((N, C1), jnp.float32), ((N, C1), jnp.float32),
        ((NP, C1), jnp.bfloat16), ((NP, hidden), jnp.bfloat16),
        ((NY, 9 * C), jnp.float32), ((1, 128), jnp.float32),
    ]
    est = (2 * sum(_padded_bytes(s, d) for s, d in io_tiles)        # double-buffered I/O
           + sum(_padded_bytes(s, d) for s, d in scratch_tiles)
           + 4 * _padded_bytes((N, max(hidden, 9 * C, 9 * C1)), jnp.float32))  # live temps
    vmem_limit = int(min(max(4 * est, 32 * 1024 * 1024), 60 * 1024 * 1024))

    kernel = functools.partial(_flow_block_kernel, H=H, W=W, C1=C1,
                               hidden=hidden, num_layers=K)
    zo, ld = pl.pallas_call(
        kernel,
        grid=(B, K),
        in_specs=[
            pl.BlockSpec((1, N, C), lambda b, k: (b, 0, 0)),            # packed (za|zb)
            pl.BlockSpec((1, 9 * C1, hidden), lambda b, k: (k, 0, 0)),  # conv1 K-stacked
            pl.BlockSpec((1, 1, hidden), lambda b, k: (k, 0, 0)),
            pl.BlockSpec((1, hidden, hidden), lambda b, k: (k, 0, 0)),  # conv2
            pl.BlockSpec((1, 1, hidden), lambda b, k: (k, 0, 0)),
            pl.BlockSpec((1, hidden, 9 * C), lambda b, k: (k, 0, 0)),   # conv3 out-stacked
            pl.BlockSpec((1, 1, C), lambda b, k: (k, 0, 0)),
        ],
        out_specs=(
            pl.BlockSpec((1, N, C), lambda b, k: (b, 0, 0)),
            pl.BlockSpec((1, 1, 128), lambda b, k: (b, 0, 0)),
        ),
        out_shape=(
            jax.ShapeDtypeStruct((B, N, C), jnp.float32),
            jax.ShapeDtypeStruct((B, 1, 128), jnp.float32),
        ),
        scratch_shapes=[
            pltpu.VMEM((N, C1), jnp.float32),        # za (first half, carried layout)
            pltpu.VMEM((N, C1), jnp.float32),        # zb (second half)
            pltpu.VMEM((NP, C1), jnp.bfloat16),      # zero-padded conv1 input slab
            pltpu.VMEM((NP, hidden), jnp.bfloat16),  # zero-padded conv3 input slab
            pltpu.VMEM((NY, 9 * C), jnp.float32),    # output-stacked conv3 matmul result
            pltpu.VMEM((1, 128), jnp.float32),       # per-batch logdet accumulator
        ],
        compiler_params=pltpu.CompilerParams(
            dimension_semantics=("parallel", "arbitrary"),
            vmem_limit_bytes=vmem_limit),
    )(z_packed, w1s, b1s, w2s, b2s, w3s, b3s)
    return zo, ld[:, 0, 0]


def log_white_gaussian(zcat):
    """LogWhiteGaussian: mem-bound & trivial -> plain XLA (per perf review)."""
    M = zcat.shape[1]
    return -0.5 * (jnp.sum(zcat * zcat, axis=1) + M * LOG_2PI)


# ---------------------------------------------------------------------------
# Host-side (init-time) weight prep — hoisted out of the traced forward
# ---------------------------------------------------------------------------
def prep_block_params(raw_layers):
    """Tap-flatten conv1 (K-stack), output-stack conv3, [shift|scale] reorder,
    bf16 cast, stack over layers.  Called once at init."""
    w1s, b1s, w2s, b2s, w3s, b3s = [], [], [], [], [], []
    for (w1, b1, w2, b2, w3, b3) in raw_layers:
        w1 = np.asarray(w1); b1 = np.asarray(b1); w2 = np.asarray(w2)
        b2 = np.asarray(b2); w3 = np.asarray(w3); b3 = np.asarray(b3)
        C1, hidden = w1.shape[2], w1.shape[3]
        # PyTorch Network: shift = h[:, 0::2], scale = h[:, 1::2]  ->  [shift | scale]
        perm = np.concatenate([np.arange(0, 2 * C1, 2), np.arange(1, 2 * C1, 2)])
        w1s.append(w1.reshape(9 * C1, hidden))          # row index = (3*di+dj)*C1 + cin
        b1s.append(b1.reshape(1, hidden))
        w2s.append(w2)
        b2s.append(b2.reshape(1, hidden))
        w3p = w3[..., perm].reshape(9, hidden, 2 * C1)   # tap-major
        w3s.append(np.transpose(w3p, (1, 0, 2)).reshape(hidden, 18 * C1))
        b3s.append(b3[perm].reshape(1, 2 * C1))

    def stk(xs, dt):
        return jnp.asarray(np.stack(xs, axis=0), dtype=dt)

    return (stk(w1s, jnp.bfloat16), stk(b1s, jnp.float32),
            stk(w2s, jnp.bfloat16), stk(b2s, jnp.float32),
            stk(w3s, jnp.bfloat16), stk(b3s, jnp.float32))


# ---------------------------------------------------------------------------
# NHWC glue (data movement only at block boundaries, matching the PyTorch module)
# ---------------------------------------------------------------------------
def squeeze_nhwc(x, factor):
    """F.unfold(kernel=stride=factor) channel order c*f*f + i*f + j, NHWC layout."""
    B, H, W, C = x.shape
    x = x.reshape(B, H // factor, factor, W // factor, factor, C)
    x = jnp.transpose(x, (0, 1, 3, 5, 2, 4))
    return x.reshape(B, H // factor, W // factor, C * factor * factor)


def _wpad_flat(img):
    B, H, W, C = img.shape
    return jnp.pad(img, ((0, 0), (0, 0), (1, 1), (0, 0))).reshape(B, H * (W + 2), C)


def _flat_to_img(zflat, H, W, C):
    return zflat.reshape(-1, H, W + 2, C)[:, :, 1:W + 1, :]


def _img_to_nchw_flat(img):
    return jnp.transpose(img, (0, 3, 1, 2)).reshape(img.shape[0], -1)


def encode_pallas(x_nchw, prepped_params, num_blocks, num_layers, factor):
    B = x_nchw.shape[0]
    accum = jnp.zeros((B,), jnp.float32)
    zout_flat = []
    z_img = jnp.transpose(x_nchw, (0, 2, 3, 1))              # NHWC
    for L in range(num_blocks):
        z_img = squeeze_nhwc(z_img, factor)
        _, H, W, C = z_img.shape
        C1 = C // 2
        z_packed = _wpad_flat(z_img)                          # (B, H*(W+2), C)
        zo, ld = fused_flow_block(z_packed, prepped_params[L], H, W)
        accum = accum + ld
        # split: first half goes to zout, second half is carried to the next block.
        zout_flat.append(_img_to_nchw_flat(_flat_to_img(zo[..., :C1], H, W, C1)))
        z_img = _flat_to_img(zo[..., C1:], H, W, C1)
    zout_flat.append(_img_to_nchw_flat(z_img))
    return zout_flat, accum


def reversible_flow_forward(x, prepped_params, num_blocks, num_layers, factor):
    """ReversibleFlow.forward(step, x, loss=True) -> (loss, (zcat, z, accum))."""
    zout, accum = encode_pallas(x, prepped_params, num_blocks, num_layers, factor)
    zcat = jnp.concatenate(zout, axis=1)
    M = float(np.prod(x.shape[1:]))
    # (discretization_correction is computed but unused in the PyTorch module)
    log_likelihood = log_white_gaussian(zcat) + accum
    loss = -jnp.mean(log_likelihood) / float(np.log(2.0) * M)
    return loss, (zcat, zout, accum)


# ---------------------------------------------------------------------------
# Deterministic parameter init (shapes from Network.lazy_init)
# ---------------------------------------------------------------------------
def init_flow_params(key, c1, hidden):
    ks = jax.random.split(key, 6)
    fan1 = 9 * c1
    w1 = jax.random.uniform(ks[0], (3, 3, c1, hidden), jnp.float32, -1., 1.) / np.sqrt(fan1)
    b1 = jax.random.uniform(ks[1], (hidden,), jnp.float32, -1., 1.) / np.sqrt(fan1)
    w2 = jax.random.uniform(ks[2], (hidden, hidden), jnp.float32, -1., 1.) / np.sqrt(hidden)
    b2 = jax.random.uniform(ks[3], (hidden,), jnp.float32, -1., 1.) / np.sqrt(hidden)
    fan3 = 9 * hidden
    # NOTE: the PyTorch module zero-inits the last conv (identity coupling at init).
    # Small non-zero weights are used here so the full affine path is exercised.
    w3 = 0.05 * jax.random.uniform(ks[4], (3, 3, hidden, 2 * c1), jnp.float32, -1., 1.) / np.sqrt(fan3)
    b3 = 0.05 * jax.random.uniform(ks[5], (2 * c1,), jnp.float32, -1., 1.) / np.sqrt(fan3)
    return (w1, b1, w2, b2, w3, b3)


def build_params(key, c, num_blocks, num_layers, hidden, factor):
    params = []
    for _L in range(num_blocks):
        c = c * factor * factor
        block = []
        for _K in range(num_layers):
            key, sub = jax.random.split(key)
            block.append(init_flow_params(sub, c // 2, hidden))
        params.append(block)
        c = c // 2   # split keeps the second channel half
    return params


# ---------------------------------------------------------------------------
# Pure-JAX reference (validates the Pallas path, f32 HIGHEST precision)
# ---------------------------------------------------------------------------
def squeeze_nchw(x, factor):
    b, c, h, w = x.shape
    x = x.reshape(b, c, h // factor, factor, w // factor, factor)
    x = jnp.transpose(x, (0, 1, 3, 5, 2, 4))
    return x.reshape(b, c * factor * factor, h // factor, w // factor)


def reverse_permutation(x):
    c1 = x.shape[1] // 2
    return jnp.concatenate([x[:, c1:], x[:, :c1]], axis=1)


def _conv_ref(x, w_hwio, b, pad):
    w_oihw = jnp.transpose(w_hwio, (3, 2, 0, 1))
    y = jax.lax.conv_general_dilated(
        x, w_oihw, (1, 1), [(pad, pad), (pad, pad)],
        dimension_numbers=("NCHW", "OIHW", "NCHW"),
        precision=jax.lax.Precision.HIGHEST)
    return y + b.reshape(1, -1, 1, 1)


def affine_flow_step_ref(z, params):
    w1, b1, w2, b2, w3, b3 = params
    B, C = z.shape[:2]
    c1 = C // 2
    z1, z2 = z[:, :c1], z[:, c1:]
    h = _conv_ref(z1, w1, b1, 1)
    h = jnp.where(h >= 0, h, LEAKY_SLOPE * h)
    h = _conv_ref(h, w2.reshape(1, 1, *w2.shape), b2, 0)
    h = jnp.where(h >= 0, h, LEAKY_SLOPE * h)
    h = _conv_ref(h, w3, b3, 1)
    shift = h[:, 0::2]
    scale = h[:, 1::2]
    safescale = jax.nn.sigmoid(scale + SIG_SHIFT) * (SS_M - SS_B) + SS_B
    logdet = jnp.sum(jnp.log(safescale).reshape(B, -1), axis=1)
    z2n = (z2 + shift) * safescale
    return jnp.concatenate([z1, z2n], axis=1), logdet


def reversible_flow_forward_ref(x, params, num_blocks, num_layers, factor):
    B = x.shape[0]
    accum = jnp.zeros((B,), jnp.float32)
    zout = []
    z = x
    for L in range(num_blocks):
        z = squeeze_nchw(z, factor)
        for K in range(num_layers):
            z = reverse_permutation(z)               # plogdet = 0
            z, logdet = affine_flow_step_ref(z, params[L][K])
            accum = accum + logdet
        c1 = z.shape[1] // 2
        zout.append(z[:, :c1])
        z = z[:, c1:]
    zout.append(z)
    zcat = jnp.concatenate([m.reshape(m.shape[0], -1) for m in zout], axis=1)
    M = float(np.prod(x.shape[1:]))
    ll = jnp.sum(-0.5 * (LOG_2PI + zcat ** 2), axis=1) + accum
    loss = -jnp.mean(ll) / float(np.log(2.0) * M)
    return loss, (zcat, zout, accum)


# ---------------------------------------------------------------------------
if __name__ == "__main__":
    B, C, H, W = 2, 4, 16, 16
    # module defaults are (num_blocks=4, num_layers_per_block=10, hidden=512);
    # reduced here for a small, fast synthetic test.
    num_blocks, num_layers, factor, hidden = 2, 2, 2, 32
    assert H % (factor ** num_blocks) == 0 and W % (factor ** num_blocks) == 0

    key = jax.random.PRNGKey(0)
    kx, kp = jax.random.split(key)
    x = jax.random.normal(kx, (B, C, H, W), jnp.float32)
    params = build_params(kp, C, num_blocks, num_layers, hidden, factor)

    # Weight prep hoisted out of the traced forward: done once at init.
    prepped = [prep_block_params(block) for block in params]

    fwd = jax.jit(functools.partial(
        reversible_flow_forward, num_blocks=num_blocks,
        num_layers=num_layers, factor=factor))
    loss, (zcat, zout, accum) = fwd(x, prepped)
    jax.block_until_ready((loss, zcat, accum))

    # validate against a pure-JAX f32 reference (bf16 MXU operands -> relaxed tolerance)
    loss_r, (zcat_r, _, accum_r) = reversible_flow_forward_ref(
        x, params, num_blocks, num_layers, factor)
    np.testing.assert_allclose(np.asarray(zcat), np.asarray(zcat_r), rtol=1e-2, atol=1e-2)
    np.testing.assert_allclose(np.asarray(accum), np.asarray(accum_r), rtol=1e-2, atol=2e-2)
    np.testing.assert_allclose(float(loss), float(loss_r), rtol=1e-2, atol=1e-2)

    print("KERNEL_OK")
</pallas_src>

<mosaic_0001>
module attributes {stable_mosaic.version = 11 : i64} {
  func.func @_flow_block_kernel(%arg0: i32, %arg1: i32, %arg2: memref<1x80x16xf32, #tpu.memory_space<vmem>>, %arg3: memref<1x72x32xbf16, #tpu.memory_space<vmem>>, %arg4: memref<1x1x32xf32, #tpu.memory_space<vmem>>, %arg5: memref<1x32x32xbf16, #tpu.memory_space<vmem>>, %arg6: memref<1x1x32xf32, #tpu.memory_space<vmem>>, %arg7: memref<1x32x144xbf16, #tpu.memory_space<vmem>>, %arg8: memref<1x1x16xf32, #tpu.memory_space<vmem>>, %arg9: memref<1x80x16xf32, #tpu.memory_space<vmem>>, %arg10: memref<1x1x128xf32, #tpu.memory_space<vmem>>, %arg11: memref<80x8xf32, #tpu.memory_space<vmem>>, %arg12: memref<80x8xf32, #tpu.memory_space<vmem>>, %arg13: memref<110x8xbf16, #tpu.memory_space<vmem>>, %arg14: memref<110x32xbf16, #tpu.memory_space<vmem>>, %arg15: memref<102x144xf32, #tpu.memory_space<vmem>>, %arg16: memref<1x128xf32, #tpu.memory_space<vmem>>) attributes {dimension_semantics = [#tpu.dimension_semantics<parallel>, #tpu.dimension_semantics<arbitrary>], iteration_bounds = array<i64: 2, 2>, scalar_prefetch = 0 : i64, scratch_operands = 6 : i64, tpu.core_type = #tpu.core_type<tc>, window_params = [{transform_indices = @transform_0, window_bounds = array<i64: 1, 80, 16>}, {transform_indices = @transform_1, window_bounds = array<i64: 1, 72, 32>}, {transform_indices = @transform_2, window_bounds = array<i64: 1, 1, 32>}, {transform_indices = @transform_3, window_bounds = array<i64: 1, 32, 32>}, {transform_indices = @transform_4, window_bounds = array<i64: 1, 1, 32>}, {transform_indices = @transform_5, window_bounds = array<i64: 1, 32, 144>}, {transform_indices = @transform_6, window_bounds = array<i64: 1, 1, 16>}, {transform_indices = @transform_7, window_bounds = array<i64: 1, 80, 16>}, {transform_indices = @transform_8, window_bounds = array<i64: 1, 1, 128>}]} {
    %0 = tpu.iota {dimensions = array<i32: 0>} : vector<80x1xi32>
    %c10_i32 = arith.constant 10 : i32
    %c0_i32 = arith.constant 0 : i32
    %1 = arith.cmpi eq, %c10_i32, %c0_i32 : i32
    %c1_i32 = arith.constant 1 : i32
    %2 = arith.select %1, %c1_i32, %c10_i32 : i32
    %3 = vector.broadcast %2 : i32 to vector<80x1xi32>
    %4 = arith.remsi %0, %3 : vector<80x1xi32>
    %c0_i32_0 = arith.constant 0 : i32
    %5 = vector.broadcast %c0_i32_0 : i32 to vector<80x1xi32>
    %6 = arith.cmpi ne, %4, %5 : vector<80x1xi32>
    %c0_i32_1 = arith.constant 0 : i32
    %7 = vector.broadcast %c0_i32_1 : i32 to vector<80x1xi32>
    %8 = arith.cmpi slt, %4, %7 : vector<80x1xi32>
    %c0_i32_2 = arith.constant 0 : i32
    %9 = arith.cmpi slt, %2, %c0_i32_2 : i32
    %10 = vector.broadcast %9 : i1 to vector<80x1xi1>
    %11 = vector.broadcast %10 : vector<80x1xi1> to vector<80x1xi1>
    %12 = arith.xori %8, %11 : vector<80x1xi1>
    %13 = arith.andi %12, %6 : vector<80x1xi1>
    %14 = vector.broadcast %2 : i32 to vector<80x1xi32>
    %15 = arith.addi %4, %14 : vector<80x1xi32>
    %16 = arith.select %13, %15, %4 : vector<80x1xi1>, vector<80x1xi32>
    %c8_i32 = arith.constant 8 : i32
    %17 = vector.broadcast %c8_i32 : i32 to vector<80x1xi32>
    %18 = arith.cmpi slt, %16, %17 : vector<80x1xi32>
    %19 = arith.extui %18 : vector<80x1xi1> to vector<80x1xi32>
    %20 = arith.sitofp %19 : vector<80x1xi32> to vector<80x1xf32>
    %c1_i32_3 = arith.constant 1 : i32
    %21 = vector.broadcast %c1_i32_3 : i32 to vector<80x1xi32>
    %22 = arith.cmpi sge, %16, %21 : vector<80x1xi32>
    %c8_i32_4 = arith.constant 8 : i32
    %23 = vector.broadcast %c8_i32_4 : i32 to vector<80x1xi32>
    %24 = arith.cmpi sle, %16, %23 : vector<80x1xi32>
    %25 = arith.andi %22, %24 : vector<80x1xi1>
    %26 = arith.extui %25 : vector<80x1xi1> to vector<80x1xi32>
    %27 = arith.sitofp %26 : vector<80x1xi32> to vector<80x1xf32>
    %c0_i32_5 = arith.constant 0 : i32
    %28 = arith.cmpi eq, %arg1, %c0_i32_5 : i32
    %29 = arith.extui %28 : i1 to i32
    %c0_i32_6 = arith.constant 0 : i32
    %30 = arith.cmpi ne, %29, %c0_i32_6 : i32
    scf.if %30 {
      %c0_80 = arith.constant 0 : index
      %c0_81 = arith.constant 0 : index
      %c0_82 = arith.constant 0 : index
      %136 = vector.load %arg2[%c0_80, %c0_81, %c0_82] : memref<1x80x16xf32, #tpu.memory_space<vmem>>, vector<1x80x16xf32>
      %137 = vector.shape_cast %136 : vector<1x80x16xf32> to vector<80x16xf32>
      %138 = vector.extract_strided_slice %137 {offsets = [0, 0], sizes = [80, 8], strides = [1, 1]} : vector<80x16xf32> to vector<80x8xf32>
      %c0_83 = arith.constant 0 : index
      %c0_84 = arith.constant 0 : index
      %139 = vector.load %arg11[%c0_83, %c0_84] : memref<80x8xf32, #tpu.memory_space<vmem>>, vector<80x8xf32>
      tpu.vector_store %arg11[%c0_83, %c0_84], %138 {strides = array<i32>} : memref<80x8xf32, #tpu.memory_space<vmem>>, vector<80x8xf32>,
      %140 = vector.extract_strided_slice %137 {offsets = [0, 8], sizes = [80, 8], strides = [1, 1]} : vector<80x16xf32> to vector<80x8xf32>
      %c0_85 = arith.constant 0 : index
      %c0_86 = arith.constant 0 : index
      %141 = vector.load %arg12[%c0_85, %c0_86] : memref<80x8xf32, #tpu.memory_space<vmem>>, vector<80x8xf32>
      tpu.vector_store %arg12[%c0_85, %c0_86], %140 {strides = array<i32>} : memref<80x8xf32, #tpu.memory_space<vmem>>, vector<80x8xf32>,
      %cst_87 = arith.constant 0.000000e+00 : f32
      %142 = vector.broadcast %cst_87 : f32 to vector<1x128xf32>
      %c0_88 = arith.constant 0 : index
      %c0_89 = arith.constant 0 : index
      %143 = vector.load %arg16[%c0_88, %c0_89] : memref<1x128xf32, #tpu.memory_space<vmem>>, vector<1x128xf32>
      tpu.vector_store %arg16[%c0_88, %c0_89], %142 {strides = array<i32>} : memref<1x128xf32, #tpu.memory_space<vmem>>, vector<1x128xf32>,
      %cst_90 = arith.constant 0.000000e+00 : bf16
      %144 = vector.broadcast %cst_90 : bf16 to vector<10x8xbf16>
      %c0_91 = arith.constant 0 : index
      %c0_92 = arith.constant 0 : index
      %145 = vector.load %arg13[%c0_91, %c0_92] : memref<110x8xbf16, #tpu.memory_space<vmem>>, vector<10x8xbf16>
      tpu.vector_store %arg13[%c0_91, %c0_92], %144 {strides = array<i32>} : memref<110x8xbf16, #tpu.memory_space<vmem>>, vector<10x8xbf16>,
      %cst_93 = arith.constant 0.000000e+00 : bf16
      %146 = vector.broadcast %cst_93 : bf16 to vector<20x8xbf16>
      %c90 = arith.constant 90 : index
      %c0_94 = arith.constant 0 : index
      %147 = vector.load %arg13[%c90, %c0_94] : memref<110x8xbf16, #tpu.memory_space<vmem>>, vector<20x8xbf16>
      tpu.vector_store %arg13[%c90, %c0_94], %146 {strides = array<i32>} : memref<110x8xbf16, #tpu.memory_space<vmem>>, vector<20x8xbf16>,
      %cst_95 = arith.constant 0.000000e+00 : bf16
      %148 = vector.broadcast %cst_95 : bf16 to vector<12x32xbf16>
      %c0_96 = arith.constant 0 : index
      %c0_97 = arith.constant 0 : index
      %149 = vector.load %arg14[%c0_96, %c0_97] : memref<110x32xbf16, #tpu.memory_space<vmem>>, vector<12x32xbf16>
      tpu.vector_store %arg14[%c0_96, %c0_97], %148 {strides = array<i32>} : memref<110x32xbf16, #tpu.memory_space<vmem>>, vector<12x32xbf16>,
      %cst_98 = arith.constant 0.000000e+00 : bf16
      %150 = vector.broadcast %cst_98 : bf16 to vector<18x32xbf16>
      %c92 = arith.constant 92 : index
      %c0_99 = arith.constant 0 : index
      %151 = vector.load %arg14[%c92, %c0_99] : memref<110x32xbf16, #tpu.memory_space<vmem>>, vector<18x32xbf16>
      tpu.vector_store %arg14[%c92, %c0_99], %150 {strides = array<i32>} : memref<110x32xbf16, #tpu.memory_space<vmem>>, vector<18x32xbf16>,
    } else {
    }
    %c0 = arith.constant 0 : index
    %c0_7 = arith.constant 0 : index
    %31 = vector.load %arg12[%c0, %c0_7] : memref<80x8xf32, #tpu.memory_space<vmem>>, vector<80x8xf32>
    %32 = arith.truncf %31 : vector<80x8xf32> to vector<80x8xbf16>
    %c10 = arith.constant 10 : index
    %c0_8 = arith.constant 0 : index
    %33 = vector.load %arg13[%c10, %c0_8] : memref<110x8xbf16, #tpu.memory_space<vmem>>, vector<80x8xbf16>
    tpu.vector_store %arg13[%c10, %c0_8], %32 {strides = array<i32>} : memref<110x8xbf16, #tpu.memory_space<vmem>>, vector<80x8xbf16>,
    %c0_9 = arith.constant 0 : index
    %c0_10 = arith.constant 0 : index
    %34 = vector.load %arg13[%c0_9, %c0_10] : memref<110x8xbf16, #tpu.memory_space<vmem>>, vector<80x8xbf16>
    %c1 = arith.constant 1 : index
    %c0_11 = arith.constant 0 : index
    %35 = vector.load %arg13[%c1, %c0_11] : memref<110x8xbf16, #tpu.memory_space<vmem>>, vector<80x8xbf16>
    %c2 = arith.constant 2 : index
    %c0_12 = arith.constant 0 : index
    %36 = vector.load %arg13[%c2, %c0_12] : memref<110x8xbf16, #tpu.memory_space<vmem>>, vector<80x8xbf16>
    %c10_13 = arith.constant 10 : index
    %c0_14 = arith.constant 0 : index
    %37 = vector.load %arg13[%c10_13, %c0_14] : memref<110x8xbf16, #tpu.memory_space<vmem>>, vector<80x8xbf16>
    %c11 = arith.constant 11 : index
    %c0_15 = arith.constant 0 : index
    %38 = vector.load %arg13[%c11, %c0_15] : memref<110x8xbf16, #tpu.memory_space<vmem>>, vector<80x8xbf16>
    %c12 = arith.constant 12 : index
    %c0_16 = arith.constant 0 : index
    %39 = vector.load %arg13[%c12, %c0_16] : memref<110x8xbf16, #tpu.memory_space<vmem>>, vector<80x8xbf16>
    %c20 = arith.constant 20 : index
    %c0_17 = arith.constant 0 : index
    %40 = vector.load %arg13[%c20, %c0_17] : memref<110x8xbf16, #tpu.memory_space<vmem>>, vector<80x8xbf16>
    %c21 = arith.constant 21 : index
    %c0_18 = arith.constant 0 : index
    %41 = vector.load %arg13[%c21, %c0_18] : memref<110x8xbf16, #tpu.memory_space<vmem>>, vector<80x8xbf16>
    %c22 = arith.constant 22 : index
    %c0_19 = arith.constant 0 : index
    %42 = vector.load %arg13[%c22, %c0_19] : memref<110x8xbf16, #tpu.memory_space<vmem>>, vector<80x8xbf16>
    %43 = tpu.concatenate %34, %35, %36, %37, %38, %39, %40, %41, %42 in 1 : vector<80x8xbf16>, vector<80x8xbf16>, vector<80x8xbf16>, vector<80x8xbf16>, vector<80x8xbf16>, vector<80x8xbf16>, vector<80x8xbf16>, vector<80x8xbf16>, vector<80x8xbf16> -> vector<80x72xbf16>
    %c0_20 = arith.constant 0 : index
    %c0_21 = arith.constant 0 : index
    %c0_22 = arith.constant 0 : index
    %44 = vector.load %arg3[%c0_20, %c0_21, %c0_22] : memref<1x72x32xbf16, #tpu.memory_space<vmem>>, vector<1x72x32xbf16>
    %45 = vector.shape_cast %44 : vector<1x72x32xbf16> to vector<72x32xbf16>
    %cst = arith.constant dense<0.000000e+00> : vector<80x32xf32>
    %46 = tpu.matmul %43, %45, %cst {dimension_numbers = #tpu.dot_dimension_numbers<[1], [0], [0], [1], [0, 0, 1, 1], [], []>} : vector<80x72xbf16>, vector<72x32xbf16>, vector<80x32xf32> -> vector<80x32xf32>
    %c0_23 = arith.constant 0 : index
    %c0_24 = arith.constant 0 : index
    %c0_25 = arith.constant 0 : index
    %47 = vector.load %arg4[%c0_23, %c0_24, %c0_25] : memref<1x1x32xf32, #tpu.memory_space<vmem>>, vector<1x1x32xf32>
    %48 = vector.shape_cast %47 : vector<1x1x32xf32> to vector<1x32xf32>
    %49 = vector.broadcast %48 : vector<1x32xf32> to vector<80x32xf32>
    %50 = arith.addf %46, %49 : vector<80x32xf32>
    %cst_26 = arith.constant 0.000000e+00 : f32
    %51 = vector.broadcast %cst_26 : f32 to vector<80x32xf32>
    %52 = arith.cmpf oge, %50, %51 : vector<80x32xf32>
    %cst_27 = arith.constant 0.00999999977 : f32
    %53 = vector.broadcast %cst_27 : f32 to vector<80x32xf32>
    %54 = arith.mulf %53, %50 : vector<80x32xf32>
    %55 = arith.select %52, %50, %54 : vector<80x32xi1>, vector<80x32xf32>
    %56 = arith.truncf %55 : vector<80x32xf32> to vector<80x32xbf16>
    %c0_28 = arith.constant 0 : index
    %c0_29 = arith.constant 0 : index
    %c0_30 = arith.constant 0 : index
    %57 = vector.load %arg5[%c0_28, %c0_29, %c0_30] : memref<1x32x32xbf16, #tpu.memory_space<vmem>>, vector<1x32x32xbf16>
    %58 = vector.shape_cast %57 : vector<1x32x32xbf16> to vector<32x32xbf16>
    %cst_31 = arith.constant dense<0.000000e+00> : vector<80x32xf32>
    %59 = tpu.matmul %56, %58, %cst_31 {dimension_numbers = #tpu.dot_dimension_numbers<[1], [0], [0], [1], [0, 0, 1, 1], [], []>} : vector<80x32xbf16>, vector<32x32xbf16>, vector<80x32xf32> -> vector<80x32xf32>
    %c0_32 = arith.constant 0 : index
    %c0_33 = arith.constant 0 : index
    %c0_34 = arith.constant 0 : index
    %60 = vector.load %arg6[%c0_32, %c0_33, %c0_34] : memref<1x1x32xf32, #tpu.memory_space<vmem>>, vector<1x1x32xf32>
    %61 = vector.shape_cast %60 : vector<1x1x32xf32> to vector<1x32xf32>
    %62 = vector.broadcast %61 : vector<1x32xf32> to vector<80x32xf32>
    %63 = arith.addf %59, %62 : vector<80x32xf32>
    %cst_35 = arith.constant 0.000000e+00 : f32
    %64 = vector.broadcast %cst_35 : f32 to vector<80x32xf32>
    %65 = arith.cmpf oge, %63, %64 : vector<80x32xf32>
    %cst_36 = arith.constant 0.00999999977 : f32
    %66 = vector.broadcast %cst_36 : f32 to vector<80x32xf32>
    %67 = arith.mulf %66, %63 : vector<80x32xf32>
    %68 = arith.select %65, %63, %67 : vector<80x32xi1>, vector<80x32xf32>
    %69 = vector.broadcast %20 : vector<80x1xf32> to vector<80x32xf32>
    %70 = arith.mulf %68, %69 : vector<80x32xf32>
    %71 = arith.truncf %70 : vector<80x32xf32> to vector<80x32xbf16>
    %c12_37 = arith.constant 12 : index
    %c0_38 = arith.constant 0 : index
    %72 = vector.load %arg14[%c12_37, %c0_38] : memref<110x32xbf16, #tpu.memory_space<vmem>>, vector<80x32xbf16>
    tpu.vector_store %arg14[%c12_37, %c0_38], %71 {strides = array<i32>} : memref<110x32xbf16, #tpu.memory_space<vmem>>, vector<80x32xbf16>,
    %c0_39 = arith.constant 0 : index
    %c0_40 = arith.constant 0 : index
    %73 = vector.load %arg14[%c0_39, %c0_40] : memref<110x32xbf16, #tpu.memory_space<vmem>>, vector<102x32xbf16>
    %c0_41 = arith.constant 0 : index
    %c0_42 = arith.constant 0 : index
    %c0_43 = arith.constant 0 : index
    %74 = vector.load %arg7[%c0_41, %c0_42, %c0_43] : memref<1x32x144xbf16, #tpu.memory_space<vmem>>, vector<1x32x144xbf16>
    %75 = vector.shape_cast %74 : vector<1x32x144xbf16> to vector<32x144xbf16>
    %cst_44 = arith.constant dense<0.000000e+00> : vector<102x144xf32>
    %76 = tpu.matmul %73, %75, %cst_44 {dimension_numbers = #tpu.dot_dimension_numbers<[1], [0], [0], [1], [0, 0, 1, 1], [], []>} : vector<102x32xbf16>, vector<32x144xbf16>, vector<102x144xf32> -> vector<102x144xf32>
    %c0_45 = arith.constant 0 : index
    %c0_46 = arith.constant 0 : index
    %77 = vector.load %arg15[%c0_45, %c0_46] : memref<102x144xf32, #tpu.memory_space<vmem>>, vector<102x144xf32>
    tpu.vector_store %arg15[%c0_45, %c0_46], %76 {strides = array<i32>} : memref<102x144xf32, #tpu.memory_space<vmem>>, vector<102x144xf32>,
    %cst_47 = arith.constant 0.000000e+00 : f32
    %78 = vector.broadcast %cst_47 : f32 to vector<80x16xf32>
    %c0_48 = arith.constant 0 : index
    %c0_49 = arith.constant 0 : index
    %79 = vector.load %arg15[%c0_48, %c0_49] : memref<102x144xf32, #tpu.memory_space<vmem>>, vector<80x16xf32>
    %80 = arith.addf %78, %79 : vector<80x16xf32>
    %c1_50 = arith.constant 1 : index
    %c16 = arith.constant 16 : index
    %81 = vector.load %arg15[%c1_50, %c16] : memref<102x144xf32, #tpu.memory_space<vmem>>, vector<80x16xf32>
    %82 = arith.addf %80, %81 : vector<80x16xf32>
    %c2_51 = arith.constant 2 : index
    %c32 = arith.constant 32 : index
    %83 = vector.load %arg15[%c2_51, %c32] : memref<102x144xf32, #tpu.memory_space<vmem>>, vector<80x16xf32>
    %84 = arith.addf %82, %83 : vector<80x16xf32>
    %c10_52 = arith.constant 10 : index
    %c48 = arith.constant 48 : index
    %85 = vector.load %arg15[%c10_52, %c48] : memref<102x144xf32, #tpu.memory_space<vmem>>, vector<80x16xf32>
    %86 = arith.addf %84, %85 : vector<80x16xf32>
    %c11_53 = arith.constant 11 : index
    %c64 = arith.constant 64 : index
    %87 = vector.load %arg15[%c11_53, %c64] : memref<102x144xf32, #tpu.memory_space<vmem>>, vector<80x16xf32>
    %88 = arith.addf %86, %87 : vector<80x16xf32>
    %c12_54 = arith.constant 12 : index
    %c80 = arith.constant 80 : index
    %89 = vector.load %arg15[%c12_54, %c80] : memref<102x144xf32, #tpu.memory_space<vmem>>, vector<80x16xf32>
    %90 = arith.addf %88, %89 : vector<80x16xf32>
    %c20_55 = arith.constant 20 : index
    %c96 = arith.constant 96 : index
    %91 = vector.load %arg15[%c20_55, %c96] : memref<102x144xf32, #tpu.memory_space<vmem>>, vector<80x16xf32>
    %92 = arith.addf %90, %91 : vector<80x16xf32>
    %c21_56 = arith.constant 21 : index
    %c112 = arith.constant 112 : index
    %93 = vector.load %arg15[%c21_56, %c112] : memref<102x144xf32, #tpu.memory_space<vmem>>, vector<80x16xf32>
    %94 = arith.addf %92, %93 : vector<80x16xf32>
    %c22_57 = arith.constant 22 : index
    %c128 = arith.constant 128 : index
    %95 = vector.load %arg15[%c22_57, %c128] : memref<102x144xf32, #tpu.memory_space<vmem>>, vector<80x16xf32>
    %96 = arith.addf %94, %95 : vector<80x16xf32>
    %c0_58 = arith.constant 0 : index
    %c0_59 = arith.constant 0 : index
    %c0_60 = arith.constant 0 : index
    %97 = vector.load %arg8[%c0_58, %c0_59, %c0_60] : memref<1x1x16xf32, #tpu.memory_space<vmem>>, vector<1x1x16xf32>
    %98 = vector.shape_cast %97 : vector<1x1x16xf32> to vector<1x16xf32>
    %99 = vector.broadcast %98 : vector<1x16xf32> to vector<80x16xf32>
    %100 = arith.addf %96, %99 : vector<80x16xf32>
    %101 = vector.extract_strided_slice %100 {offsets = [0, 0], sizes = [80, 8], strides = [1, 1]} : vector<80x16xf32> to vector<80x8xf32>
    %102 = vector.extract_strided_slice %100 {offsets = [0, 8], sizes = [80, 8], strides = [1, 1]} : vector<80x16xf32> to vector<80x8xf32>
    %cst_61 = arith.constant -0.00100050028 : f32
    %103 = vector.broadcast %cst_61 : f32 to vector<80x8xf32>
    %104 = arith.addf %102, %103 : vector<80x8xf32>
    %105 = arith.negf %104 : vector<80x8xf32>
    %106 = math.exp %105 : vector<80x8xf32>
    %cst_62 = arith.constant 1.000000e+00 : f32
    %107 = vector.broadcast %cst_62 : f32 to vector<80x8xf32>
    %108 = arith.addf %107, %106 : vector<80x8xf32>
    %109 = arith.divf %107, %108 : vector<80x8xf32>
    %cst_63 = arith.constant 1.999000e+00 : f32
    %110 = vector.broadcast %cst_63 : f32 to vector<80x8xf32>
    %111 = arith.mulf %109, %110 : vector<80x8xf32>
    %cst_64 = arith.constant 1.000000e-03 : f32
    %112 = vector.broadcast %cst_64 : f32 to vector<80x8xf32>
    %113 = arith.addf %111, %112 : vector<80x8xf32>
    %c0_65 = arith.constant 0 : index
    %c0_66 = arith.constant 0 : index
    %114 = vector.load %arg16[%c0_65, %c0_66] : memref<1x128xf32, #tpu.memory_space<vmem>>, vector<1x128xf32>
    %115 = math.log %113 : vector<80x8xf32>
    %116 = vector.broadcast %27 : vector<80x1xf32> to vector<80x8xf32>
    %117 = arith.mulf %115, %116 : vector<80x8xf32>
    %118 = vector.shape_cast %117 : vector<80x8xf32> to vector<1x80x8xf32>
    %cst_67 = arith.constant dense<0.000000e+00> : vector<1xf32>
    %119 = vector.multi_reduction <add>, %118, %cst_67 [1, 2] : vector<1x80x8xf32> to vector<1xf32>
    %120 = vector.shape_cast %119 : vector<1xf32> to vector<1x1x1xf32>
    %121 = vector.extract %120[0, 0, 0] : f32 from vector<1x1x1xf32>
    %122 = vector.broadcast %121 : f32 to vector<1x128xf32>
    %123 = arith.addf %114, %122 : vector<1x128xf32>
    %c0_68 = arith.constant 0 : index
    %c0_69 = arith.constant 0 : index
    %124 = vector.load %arg16[%c0_68, %c0_69] : memref<1x128xf32, #tpu.memory_space<vmem>>, vector<1x128xf32>
    tpu.vector_store %arg16[%c0_68, %c0_69], %123 {strides = array<i32>} : memref<1x128xf32, #tpu.memory_space<vmem>>, vector<1x128xf32>,
    %c0_70 = arith.constant 0 : index
    %c0_71 = arith.constant 0 : index
    %125 = vector.load %arg11[%c0_70, %c0_71] : memref<80x8xf32, #tpu.memory_space<vmem>>, vector<80x8xf32>
    %126 = arith.addf %125, %101 : vector<80x8xf32>
    %127 = arith.mulf %126, %113 : vector<80x8xf32>
    %128 = vector.broadcast %27 : vector<80x1xf32> to vector<80x8xf32>
    %129 = arith.mulf %127, %128 : vector<80x8xf32>
    %c0_72 = arith.constant 0 : index
    %c0_73 = arith.constant 0 : index
    %130 = vector.load %arg12[%c0_72, %c0_73] : memref<80x8xf32, #tpu.memory_space<vmem>>, vector<80x8xf32>
    %c0_74 = arith.constant 0 : index
    %c0_75 = arith.constant 0 : index
    %131 = vector.load %arg11[%c0_74, %c0_75] : memref<80x8xf32, #tpu.memory_space<vmem>>, vector<80x8xf32>
    tpu.vector_store %arg11[%c0_74, %c0_75], %130 {strides = array<i32>} : memref<80x8xf32, #tpu.memory_space<vmem>>, vector<80x8xf32>,
    %c0_76 = arith.constant 0 : index
    %c0_77 = arith.constant 0 : index
    %132 = vector.load %arg12[%c0_76, %c0_77] : memref<80x8xf32, #tpu.memory_space<vmem>>, vector<80x8xf32>
    tpu.vector_store %arg12[%c0_76, %c0_77], %129 {strides = array<i32>} : memref<80x8xf32, #tpu.memory_space<vmem>>, vector<80x8xf32>,
    %c1_i32_78 = arith.constant 1 : i32
    %133 = arith.cmpi eq, %arg1, %c1_i32_78 : i32
    %134 = arith.extui %133 : i1 to i32
    %c0_i32_79 = arith.constant 0 : i32
    %135 = arith.cmpi ne, %134, %c0_i32_79 : i32
    scf.if %135 {
      %c0_80 = arith.constant 0 : index
      %c0_81 = arith.constant 0 : index
      %136 = vector.load %arg11[%c0_80, %c0_81] : memref<80x8xf32, #tpu.memory_space<vmem>>, vector<80x8xf32>
      %c0_82 = arith.constant 0 : index
      %c0_83 = arith.constant 0 : index
      %137 = vector.load %arg12[%c0_82, %c0_83] : memref<80x8xf32, #tpu.memory_space<vmem>>, vector<80x8xf32>
      %138 = tpu.concatenate %136, %137 in 1 : vector<80x8xf32>, vector<80x8xf32> -> vector<80x16xf32>
      %c0_84 = arith.constant 0 : index
      %c0_85 = arith.constant 0 : index
      %c0_86 = arith.constant 0 : index
      %139 = vector.load %arg9[%c0_84, %c0_85, %c0_86] : memref<1x80x16xf32, #tpu.memory_space<vmem>>, vector<1x80x16xf32>
      %140 = vector.shape_cast %139 : vector<1x80x16xf32> to vector<80x16xf32>
      %141 = vector.shape_cast %138 : vector<80x16xf32> to vector<1x80x16xf32>
      tpu.vector_store %arg9[%c0_84, %c0_85, %c0_86], %141 {strides = array<i32>} : memref<1x80x16xf32, #tpu.memory_space<vmem>>, vector<1x80x16xf32>,
      %c0_87 = arith.constant 0 : index
      %c0_88 = arith.constant 0 : index
      %142 = vector.load %arg16[%c0_87, %c0_88] : memref<1x128xf32, #tpu.memory_space<vmem>>, vector<1x128xf32>
      %c0_89 = arith.constant 0 : index
      %c0_90 = arith.constant 0 : index
      %c0_91 = arith.constant 0 : index
      %143 = vector.load %arg10[%c0_89, %c0_90, %c0_91] : memref<1x1x128xf32, #tpu.memory_space<vmem>>, vector<1x1x128xf32>
      %144 = vector.shape_cast %143 : vector<1x1x128xf32> to vector<1x128xf32>
      %145 = vector.shape_cast %142 : vector<1x128xf32> to vector<1x1x128xf32>
      tpu.vector_store %arg10[%c0_89, %c0_90, %c0_91], %145 {strides = array<i32>} : memref<1x1x128xf32, #tpu.memory_space<vmem>>, vector<1x1x128xf32>,
    } else {
    }
    return
  }
  func.func @transform_0(%arg0: i32, %arg1: i32) -> (i32, i32, i32) {
    %c0_i32 = arith.constant 0 : i32
    %c0_i32_0 = arith.constant 0 : i32
    %c0_i32_1 = arith.constant 0 : i32
    return %arg0, %c0_i32, %c0_i32_0 : i32, i32, i32
  }
  func.func @transform_1(%arg0: i32, %arg1: i32) -> (i32, i32, i32) {
    %c0_i32 = arith.constant 0 : i32
    %c0_i32_0 = arith.constant 0 : i32
    %c0_i32_1 = arith.constant 0 : i32
    return %arg1, %c0_i32, %c0_i32_0 : i32, i32, i32
  }
  func.func @transform_2(%arg0: i32, %arg1: i32) -> (i32, i32, i32) {
    %c0_i32 = arith.constant 0 : i32
    %c0_i32_0 = arith.constant 0 : i32
    %c0_i32_1 = arith.constant 0 : i32
    return %arg1, %c0_i32, %c0_i32_0 : i32, i32, i32
  }
  func.func @transform_3(%arg0: i32, %arg1: i32) -> (i32, i32, i32) {
    %c0_i32 = arith.constant 0 : i32
    %c0_i32_0 = arith.constant 0 : i32
    %c0_i32_1 = arith.constant 0 : i32
    return %arg1, %c0_i32, %c0_i32_0 : i32, i32, i32
  }
  func.func @transform_4(%arg0: i32, %arg1: i32) -> (i32, i32, i32) {
    %c0_i32 = arith.constant 0 : i32
    %c0_i32_0 = arith.constant 0 : i32
    %c0_i32_1 = arith.constant 0 : i32
    return %arg1, %c0_i32, %c0_i32_0 : i32, i32, i32
  }
  func.func @transform_5(%arg0: i32, %arg1: i32) -> (i32, i32, i32) {
    %c0_i32 = arith.constant 0 : i32
    %c0_i32_0 = arith.constant 0 : i32
    %c0_i32_1 = arith.constant 0 : i32
    return %arg1, %c0_i32, %c0_i32_0 : i32, i32, i32
  }
  func.func @transform_6(%arg0: i32, %arg1: i32) -> (i32, i32, i32) {
    %c0_i32 = arith.constant 0 : i32
    %c0_i32_0 = arith.constant 0 : i32
    %c0_i32_1 = arith.constant 0 : i32
    return %arg1, %c0_i32, %c0_i32_0 : i32, i32, i32
  }
  func.func @transform_7(%arg0: i32, %arg1: i32) -> (i32, i32, i32) {
    %c0_i32 = arith.constant 0 : i32
    %c0_i32_0 = arith.constant 0 : i32
    %c0_i32_1 = arith.constant 0 : i32
    return %arg0, %c0_i32, %c0_i32_0 : i32, i32, i32
  }
  func.func @transform_8(%arg0: i32, %arg1: i32) -> (i32, i32, i32) {
    %c0_i32 = arith.constant 0 : i32
    %c0_i32_0 = arith.constant 0 : i32
    %c0_i32_1 = arith.constant 0 : i32
    return %arg0, %c0_i32, %c0_i32_0 : i32, i32, i32
  }
}

module attributes {stable_mosaic.version = 11 : i64} {
  func.func @_flow_block_kernel(%arg0: i32, %arg1: i32, %arg2: memref<1x24x32xf32, #tpu.memory_space<vmem>>, %arg3: memref<1x144x32xbf16, #tpu.memory_space<vmem>>, %arg4: memref<1x1x32xf32, #tpu.memory_space<vmem>>, %arg5: memref<1x32x32xbf16, #tpu.memory_space<vmem>>, %arg6: memref<1x1x32xf32, #tpu.memory_space<vmem>>, %arg7: memref<1x32x288xbf16, #tpu.memory_space<vmem>>, %arg8: memref<1x1x32xf32, #tpu.memory_space<vmem>>, %arg9: memref<1x24x32xf32, #tpu.memory_space<vmem>>, %arg10: memref<1x1x128xf32, #tpu.memory_space<vmem>>, %arg11: memref<24x16xf32, #tpu.memory_space<vmem>>, %arg12: memref<24x16xf32, #tpu.memory_space<vmem>>, %arg13: memref<42x16xbf16, #tpu.memory_space<vmem>>, %arg14: memref<42x32xbf16, #tpu.memory_space<vmem>>, %arg15: memref<38x288xf32, #tpu.memory_space<vmem>>, %arg16: memref<1x128xf32, #tpu.memory_space<vmem>>) attributes {dimension_semantics = [#tpu.dimension_semantics<parallel>, #tpu.dimension_semantics<arbitrary>], iteration_bounds = array<i64: 2, 2>, scalar_prefetch = 0 : i64, scratch_operands = 6 : i64, tpu.core_type = #tpu.core_type<tc>, window_params = [{transform_indices = @transform_0, window_bounds = array<i64: 1, 24, 32>}, {transform_indices = @transform_1, window_bounds = array<i64: 1, 144, 32>}, {transform_indices = @transform_2, window_bounds = array<i64: 1, 1, 32>}, {transform_indices = @transform_3, window_bounds = array<i64: 1, 32, 32>}, {transform_indices = @transform_4, window_bounds = array<i64: 1, 1, 32>}, {transform_indices = @transform_5, window_bounds = array<i64: 1, 32, 288>}, {transform_indices = @transform_6, window_bounds = array<i64: 1, 1, 32>}, {transform_indices = @transform_7, window_bounds = array<i64: 1, 24, 32>}, {transform_indices = @transform_8, window_bounds = array<i64: 1, 1, 128>}]} {
    %0 = tpu.iota {dimensions = array<i32: 0>} : vector<24x1xi32>
    %c6_i32 = arith.constant 6 : i32
    %c0_i32 = arith.constant 0 : i32
    %1 = arith.cmpi eq, %c6_i32, %c0_i32 : i32
    %c1_i32 = arith.constant 1 : i32
    %2 = arith.select %1, %c1_i32, %c6_i32 : i32
    %3 = vector.broadcast %2 : i32 to vector<24x1xi32>
    %4 = arith.remsi %0, %3 : vector<24x1xi32>
    %c0_i32_0 = arith.constant 0 : i32
    %5 = vector.broadcast %c0_i32_0 : i32 to vector<24x1xi32>
    %6 = arith.cmpi ne, %4, %5 : vector<24x1xi32>
    %c0_i32_1 = arith.constant 0 : i32
    %7 = vector.broadcast %c0_i32_1 : i32 to vector<24x1xi32>
    %8 = arith.cmpi slt, %4, %7 : vector<24x1xi32>
    %c0_i32_2 = arith.constant 0 : i32
    %9 = arith.cmpi slt, %2, %c0_i32_2 : i32
    %10 = vector.broadcast %9 : i1 to vector<24x1xi1>
    %11 = vector.broadcast %10 : vector<24x1xi1> to vector<24x1xi1>
    %12 = arith.xori %8, %11 : vector<24x1xi1>
    %13 = arith.andi %12, %6 : vector<24x1xi1>
    %14 = vector.broadcast %2 : i32 to vector<24x1xi32>
    %15 = arith.addi %4, %14 : vector<24x1xi32>
    %16 = arith.select %13, %15, %4 : vector<24x1xi1>, vector<24x1xi32>
    %c4_i32 = arith.constant 4 : i32
    %17 = vector.broadcast %c4_i32 : i32 to vector<24x1xi32>
    %18 = arith.cmpi slt, %16, %17 : vector<24x1xi32>
    %19 = arith.extui %18 : vector<24x1xi1> to vector<24x1xi32>
    %20 = arith.sitofp %19 : vector<24x1xi32> to vector<24x1xf32>
    %c1_i32_3 = arith.constant 1 : i32
    %21 = vector.broadcast %c1_i32_3 : i32 to vector<24x1xi32>
    %22 = arith.cmpi sge, %16, %21 : vector<24x1xi32>
    %c4_i32_4 = arith.constant 4 : i32
    %23 = vector.broadcast %c4_i32_4 : i32 to vector<24x1xi32>
    %24 = arith.cmpi sle, %16, %23 : vector<24x1xi32>
    %25 = arith.andi %22, %24 : vector<24x1xi1>
    %26 = arith.extui %25 : vector<24x1xi1> to vector<24x1xi32>
    %27 = arith.sitofp %26 : vector<24x1xi32> to vector<24x1xf32>
    %c0_i32_5 = arith.constant 0 : i32
    %28 = arith.cmpi eq, %arg1, %c0_i32_5 : i32
    %29 = arith.extui %28 : i1 to i32
    %c0_i32_6 = arith.constant 0 : i32
    %30 = arith.cmpi ne, %29, %c0_i32_6 : i32
    scf.if %30 {
      %c0_80 = arith.constant 0 : index
      %c0_81 = arith.constant 0 : index
      %c0_82 = arith.constant 0 : index
      %136 = vector.load %arg2[%c0_80, %c0_81, %c0_82] : memref<1x24x32xf32, #tpu.memory_space<vmem>>, vector<1x24x32xf32>
      %137 = vector.shape_cast %136 : vector<1x24x32xf32> to vector<24x32xf32>
      %138 = vector.extract_strided_slice %137 {offsets = [0, 0], sizes = [24, 16], strides = [1, 1]} : vector<24x32xf32> to vector<24x16xf32>
      %c0_83 = arith.constant 0 : index
      %c0_84 = arith.constant 0 : index
      %139 = vector.load %arg11[%c0_83, %c0_84] : memref<24x16xf32, #tpu.memory_space<vmem>>, vector<24x16xf32>
      tpu.vector_store %arg11[%c0_83, %c0_84], %138 {strides = array<i32>} : memref<24x16xf32, #tpu.memory_space<vmem>>, vector<24x16xf32>,
      %140 = vector.extract_strided_slice %137 {offsets = [0, 16], sizes = [24, 16], strides = [1, 1]} : vector<24x32xf32> to vector<24x16xf32>
      %c0_85 = arith.constant 0 : index
      %c0_86 = arith.constant 0 : index
      %141 = vector.load %arg12[%c0_85, %c0_86] : memref<24x16xf32, #tpu.memory_space<vmem>>, vector<24x16xf32>
      tpu.vector_store %arg12[%c0_85, %c0_86], %140 {strides = array<i32>} : memref<24x16xf32, #tpu.memory_space<vmem>>, vector<24x16xf32>,
      %cst_87 = arith.constant 0.000000e+00 : f32
      %142 = vector.broadcast %cst_87 : f32 to vector<1x128xf32>
      %c0_88 = arith.constant 0 : index
      %c0_89 = arith.constant 0 : index
      %143 = vector.load %arg16[%c0_88, %c0_89] : memref<1x128xf32, #tpu.memory_space<vmem>>, vector<1x128xf32>
      tpu.vector_store %arg16[%c0_88, %c0_89], %142 {strides = array<i32>} : memref<1x128xf32, #tpu.memory_space<vmem>>, vector<1x128xf32>,
      %cst_90 = arith.constant 0.000000e+00 : bf16
      %144 = vector.broadcast %cst_90 : bf16 to vector<6x16xbf16>
      %c0_91 = arith.constant 0 : index
      %c0_92 = arith.constant 0 : index
      %145 = vector.load %arg13[%c0_91, %c0_92] : memref<42x16xbf16, #tpu.memory_space<vmem>>, vector<6x16xbf16>
      tpu.vector_store %arg13[%c0_91, %c0_92], %144 {strides = array<i32>} : memref<42x16xbf16, #tpu.memory_space<vmem>>, vector<6x16xbf16>,
      %cst_93 = arith.constant 0.000000e+00 : bf16
      %146 = vector.broadcast %cst_93 : bf16 to vector<12x16xbf16>
      %c30 = arith.constant 30 : index
      %c0_94 = arith.constant 0 : index
      %147 = vector.load %arg13[%c30, %c0_94] : memref<42x16xbf16, #tpu.memory_space<vmem>>, vector<12x16xbf16>
      tpu.vector_store %arg13[%c30, %c0_94], %146 {strides = array<i32>} : memref<42x16xbf16, #tpu.memory_space<vmem>>, vector<12x16xbf16>,
      %cst_95 = arith.constant 0.000000e+00 : bf16
      %148 = vector.broadcast %cst_95 : bf16 to vector<8x32xbf16>
      %c0_96 = arith.constant 0 : index
      %c0_97 = arith.constant 0 : index
      %149 = vector.load %arg14[%c0_96, %c0_97] : memref<42x32xbf16, #tpu.memory_space<vmem>>, vector<8x32xbf16>
      tpu.vector_store %arg14[%c0_96, %c0_97], %148 {strides = array<i32>} : memref<42x32xbf16, #tpu.memory_space<vmem>>, vector<8x32xbf16>,
      %cst_98 = arith.constant 0.000000e+00 : bf16
      %150 = vector.broadcast %cst_98 : bf16 to vector<10x32xbf16>
      %c32_99 = arith.constant 32 : index
      %c0_100 = arith.constant 0 : index
      %151 = vector.load %arg14[%c32_99, %c0_100] : memref<42x32xbf16, #tpu.memory_space<vmem>>, vector<10x32xbf16>
      tpu.vector_store %arg14[%c32_99, %c0_100], %150 {strides = array<i32>} : memref<42x32xbf16, #tpu.memory_space<vmem>>, vector<10x32xbf16>,
    } else {
    }
    %c0 = arith.constant 0 : index
    %c0_7 = arith.constant 0 : index
    %31 = vector.load %arg12[%c0, %c0_7] : memref<24x16xf32, #tpu.memory_space<vmem>>, vector<24x16xf32>
    %32 = arith.truncf %31 : vector<24x16xf32> to vector<24x16xbf16>
    %c6 = arith.constant 6 : index
    %c0_8 = arith.constant 0 : index
    %33 = vector.load %arg13[%c6, %c0_8] : memref<42x16xbf16, #tpu.memory_space<vmem>>, vector<24x16xbf16>
    tpu.vector_store %arg13[%c6, %c0_8], %32 {strides = array<i32>} : memref<42x16xbf16, #tpu.memory_space<vmem>>, vector<24x16xbf16>,
    %c0_9 = arith.constant 0 : index
    %c0_10 = arith.constant 0 : index
    %34 = vector.load %arg13[%c0_9, %c0_10] : memref<42x16xbf16, #tpu.memory_space<vmem>>, vector<24x16xbf16>
    %c1 = arith.constant 1 : index
    %c0_11 = arith.constant 0 : index
    %35 = vector.load %arg13[%c1, %c0_11] : memref<42x16xbf16, #tpu.memory_space<vmem>>, vector<24x16xbf16>
    %c2 = arith.constant 2 : index
    %c0_12 = arith.constant 0 : index
    %36 = vector.load %arg13[%c2, %c0_12] : memref<42x16xbf16, #tpu.memory_space<vmem>>, vector<24x16xbf16>
    %c6_13 = arith.constant 6 : index
    %c0_14 = arith.constant 0 : index
    %37 = vector.load %arg13[%c6_13, %c0_14] : memref<42x16xbf16, #tpu.memory_space<vmem>>, vector<24x16xbf16>
    %c7 = arith.constant 7 : index
    %c0_15 = arith.constant 0 : index
    %38 = vector.load %arg13[%c7, %c0_15] : memref<42x16xbf16, #tpu.memory_space<vmem>>, vector<24x16xbf16>
    %c8 = arith.constant 8 : index
    %c0_16 = arith.constant 0 : index
    %39 = vector.load %arg13[%c8, %c0_16] : memref<42x16xbf16, #tpu.memory_space<vmem>>, vector<24x16xbf16>
    %c12 = arith.constant 12 : index
    %c0_17 = arith.constant 0 : index
    %40 = vector.load %arg13[%c12, %c0_17] : memref<42x16xbf16, #tpu.memory_space<vmem>>, vector<24x16xbf16>
    %c13 = arith.constant 13 : index
    %c0_18 = arith.constant 0 : index
    %41 = vector.load %arg13[%c13, %c0_18] : memref<42x16xbf16, #tpu.memory_space<vmem>>, vector<24x16xbf16>
    %c14 = arith.constant 14 : index
    %c0_19 = arith.constant 0 : index
    %42 = vector.load %arg13[%c14, %c0_19] : memref<42x16xbf16, #tpu.memory_space<vmem>>, vector<24x16xbf16>
    %43 = tpu.concatenate %34, %35, %36, %37, %38, %39, %40, %41, %42 in 1 : vector<24x16xbf16>, vector<24x16xbf16>, vector<24x16xbf16>, vector<24x16xbf16>, vector<24x16xbf16>, vector<24x16xbf16>, vector<24x16xbf16>, vector<24x16xbf16>, vector<24x16xbf16> -> vector<24x144xbf16>
    %c0_20 = arith.constant 0 : index
    %c0_21 = arith.constant 0 : index
    %c0_22 = arith.constant 0 : index
    %44 = vector.load %arg3[%c0_20, %c0_21, %c0_22] : memref<1x144x32xbf16, #tpu.memory_space<vmem>>, vector<1x144x32xbf16>
    %45 = vector.shape_cast %44 : vector<1x144x32xbf16> to vector<144x32xbf16>
    %cst = arith.constant dense<0.000000e+00> : vector<24x32xf32>
    %46 = tpu.matmul %43, %45, %cst {dimension_numbers = #tpu.dot_dimension_numbers<[1], [0], [0], [1], [0, 0, 1, 1], [], []>} : vector<24x144xbf16>, vector<144x32xbf16>, vector<24x32xf32> -> vector<24x32xf32>
    %c0_23 = arith.constant 0 : index
    %c0_24 = arith.constant 0 : index
    %c0_25 = arith.constant 0 : index
    %47 = vector.load %arg4[%c0_23, %c0_24, %c0_25] : memref<1x1x32xf32, #tpu.memory_space<vmem>>, vector<1x1x32xf32>
    %48 = vector.shape_cast %47 : vector<1x1x32xf32> to vector<1x32xf32>
    %49 = vector.broadcast %48 : vector<1x32xf32> to vector<24x32xf32>
    %50 = arith.addf %46, %49 : vector<24x32xf32>
    %cst_26 = arith.constant 0.000000e+00 : f32
    %51 = vector.broadcast %cst_26 : f32 to vector<24x32xf32>
    %52 = arith.cmpf oge, %50, %51 : vector<24x32xf32>
    %cst_27 = arith.constant 0.00999999977 : f32
    %53 = vector.broadcast %cst_27 : f32 to vector<24x32xf32>
    %54 = arith.mulf %53, %50 : vector<24x32xf32>
    %55 = arith.select %52, %50, %54 : vector<24x32xi1>, vector<24x32xf32>
    %56 = arith.truncf %55 : vector<24x32xf32> to vector<24x32xbf16>
    %c0_28 = arith.constant 0 : index
    %c0_29 = arith.constant 0 : index
    %c0_30 = arith.constant 0 : index
    %57 = vector.load %arg5[%c0_28, %c0_29, %c0_30] : memref<1x32x32xbf16, #tpu.memory_space<vmem>>, vector<1x32x32xbf16>
    %58 = vector.shape_cast %57 : vector<1x32x32xbf16> to vector<32x32xbf16>
    %cst_31 = arith.constant dense<0.000000e+00> : vector<24x32xf32>
    %59 = tpu.matmul %56, %58, %cst_31 {dimension_numbers = #tpu.dot_dimension_numbers<[1], [0], [0], [1], [0, 0, 1, 1], [], []>} : vector<24x32xbf16>, vector<32x32xbf16>, vector<24x32xf32> -> vector<24x32xf32>
    %c0_32 = arith.constant 0 : index
    %c0_33 = arith.constant 0 : index
    %c0_34 = arith.constant 0 : index
    %60 = vector.load %arg6[%c0_32, %c0_33, %c0_34] : memref<1x1x32xf32, #tpu.memory_space<vmem>>, vector<1x1x32xf32>
    %61 = vector.shape_cast %60 : vector<1x1x32xf32> to vector<1x32xf32>
    %62 = vector.broadcast %61 : vector<1x32xf32> to vector<24x32xf32>
    %63 = arith.addf %59, %62 : vector<24x32xf32>
    %cst_35 = arith.constant 0.000000e+00 : f32
    %64 = vector.broadcast %cst_35 : f32 to vector<24x32xf32>
    %65 = arith.cmpf oge, %63, %64 : vector<24x32xf32>
    %cst_36 = arith.constant 0.00999999977 : f32
    %66 = vector.broadcast %cst_36 : f32 to vector<24x32xf32>
    %67 = arith.mulf %66, %63 : vector<24x32xf32>
    %68 = arith.select %65, %63, %67 : vector<24x32xi1>, vector<24x32xf32>
    %69 = vector.broadcast %20 : vector<24x1xf32> to vector<24x32xf32>
    %70 = arith.mulf %68, %69 : vector<24x32xf32>
    %71 = arith.truncf %70 : vector<24x32xf32> to vector<24x32xbf16>
    %c8_37 = arith.constant 8 : index
    %c0_38 = arith.constant 0 : index
    %72 = vector.load %arg14[%c8_37, %c0_38] : memref<42x32xbf16, #tpu.memory_space<vmem>>, vector<24x32xbf16>
    tpu.vector_store %arg14[%c8_37, %c0_38], %71 {strides = array<i32>} : memref<42x32xbf16, #tpu.memory_space<vmem>>, vector<24x32xbf16>,
    %c0_39 = arith.constant 0 : index
    %c0_40 = arith.constant 0 : index
    %73 = vector.load %arg14[%c0_39, %c0_40] : memref<42x32xbf16, #tpu.memory_space<vmem>>, vector<38x32xbf16>
    %c0_41 = arith.constant 0 : index
    %c0_42 = arith.constant 0 : index
    %c0_43 = arith.constant 0 : index
    %74 = vector.load %arg7[%c0_41, %c0_42, %c0_43] : memref<1x32x288xbf16, #tpu.memory_space<vmem>>, vector<1x32x288xbf16>
    %75 = vector.shape_cast %74 : vector<1x32x288xbf16> to vector<32x288xbf16>
    %cst_44 = arith.constant dense<0.000000e+00> : vector<38x288xf32>
    %76 = tpu.matmul %73, %75, %cst_44 {dimension_numbers = #tpu.dot_dimension_numbers<[1], [0], [0], [1], [0, 0, 1, 1], [], []>} : vector<38x32xbf16>, vector<32x288xbf16>, vector<38x288xf32> -> vector<38x288xf32>
    %c0_45 = arith.constant 0 : index
    %c0_46 = arith.constant 0 : index
    %77 = vector.load %arg15[%c0_45, %c0_46] : memref<38x288xf32, #tpu.memory_space<vmem>>, vector<38x288xf32>
    tpu.vector_store %arg15[%c0_45, %c0_46], %76 {strides = array<i32>} : memref<38x288xf32, #tpu.memory_space<vmem>>, vector<38x288xf32>,
    %cst_47 = arith.constant 0.000000e+00 : f32
    %78 = vector.broadcast %cst_47 : f32 to vector<24x32xf32>
    %c0_48 = arith.constant 0 : index
    %c0_49 = arith.constant 0 : index
    %79 = vector.load %arg15[%c0_48, %c0_49] : memref<38x288xf32, #tpu.memory_space<vmem>>, vector<24x32xf32>
    %80 = arith.addf %78, %79 : vector<24x32xf32>
    %c1_50 = arith.constant 1 : index
    %c32 = arith.constant 32 : index
    %81 = vector.load %arg15[%c1_50, %c32] : memref<38x288xf32, #tpu.memory_space<vmem>>, vector<24x32xf32>
    %82 = arith.addf %80, %81 : vector<24x32xf32>
    %c2_51 = arith.constant 2 : index
    %c64 = arith.constant 64 : index
    %83 = vector.load %arg15[%c2_51, %c64] : memref<38x288xf32, #tpu.memory_space<vmem>>, vector<24x32xf32>
    %84 = arith.addf %82, %83 : vector<24x32xf32>
    %c6_52 = arith.constant 6 : index
    %c96 = arith.constant 96 : index
    %85 = vector.load %arg15[%c6_52, %c96] : memref<38x288xf32, #tpu.memory_space<vmem>>, vector<24x32xf32>
    %86 = arith.addf %84, %85 : vector<24x32xf32>
    %c7_53 = arith.constant 7 : index
    %c128 = arith.constant 128 : index
    %87 = vector.load %arg15[%c7_53, %c128] : memref<38x288xf32, #tpu.memory_space<vmem>>, vector<24x32xf32>
    %88 = arith.addf %86, %87 : vector<24x32xf32>
    %c8_54 = arith.constant 8 : index
    %c160 = arith.constant 160 : index
    %89 = vector.load %arg15[%c8_54, %c160] : memref<38x288xf32, #tpu.memory_space<vmem>>, vector<24x32xf32>
    %90 = arith.addf %88, %89 : vector<24x32xf32>
    %c12_55 = arith.constant 12 : index
    %c192 = arith.constant 192 : index
    %91 = vector.load %arg15[%c12_55, %c192] : memref<38x288xf32, #tpu.memory_space<vmem>>, vector<24x32xf32>
    %92 = arith.addf %90, %91 : vector<24x32xf32>
    %c13_56 = arith.constant 13 : index
    %c224 = arith.constant 224 : index
    %93 = vector.load %arg15[%c13_56, %c224] : memref<38x288xf32, #tpu.memory_space<vmem>>, vector<24x32xf32>
    %94 = arith.addf %92, %93 : vector<24x32xf32>
    %c14_57 = arith.constant 14 : index
    %c256 = arith.constant 256 : index
    %95 = vector.load %arg15[%c14_57, %c256] : memref<38x288xf32, #tpu.memory_space<vmem>>, vector<24x32xf32>
    %96 = arith.addf %94, %95 : vector<24x32xf32>
    %c0_58 = arith.constant 0 : index
    %c0_59 = arith.constant 0 : index
    %c0_60 = arith.constant 0 : index
    %97 = vector.load %arg8[%c0_58, %c0_59, %c0_60] : memref<1x1x32xf32, #tpu.memory_space<vmem>>, vector<1x1x32xf32>
    %98 = vector.shape_cast %97 : vector<1x1x32xf32> to vector<1x32xf32>
    %99 = vector.broadcast %98 : vector<1x32xf32> to vector<24x32xf32>
    %100 = arith.addf %96, %99 : vector<24x32xf32>
    %101 = vector.extract_strided_slice %100 {offsets = [0, 0], sizes = [24, 16], strides = [1, 1]} : vector<24x32xf32> to vector<24x16xf32>
    %102 = vector.extract_strided_slice %100 {offsets = [0, 16], sizes = [24, 16], strides = [1, 1]} : vector<24x32xf32> to vector<24x16xf32>
    %cst_61 = arith.constant -0.00100050028 : f32
    %103 = vector.broadcast %cst_61 : f32 to vector<24x16xf32>
    %104 = arith.addf %102, %103 : vector<24x16xf32>
    %105 = arith.negf %104 : vector<24x16xf32>
    %106 = math.exp %105 : vector<24x16xf32>
    %cst_62 = arith.constant 1.000000e+00 : f32
    %107 = vector.broadcast %cst_62 : f32 to vector<24x16xf32>
    %108 = arith.addf %107, %106 : vector<24x16xf32>
    %109 = arith.divf %107, %108 : vector<24x16xf32>
    %cst_63 = arith.constant 1.999000e+00 : f32
    %110 = vector.broadcast %cst_63 : f32 to vector<24x16xf32>
    %111 = arith.mulf %109, %110 : vector<24x16xf32>
    %cst_64 = arith.constant 1.000000e-03 : f32
    %112 = vector.broadcast %cst_64 : f32 to vector<24x16xf32>
    %113 = arith.addf %111, %112 : vector<24x16xf32>
    %c0_65 = arith.constant 0 : index
    %c0_66 = arith.constant 0 : index
    %114 = vector.load %arg16[%c0_65, %c0_66] : memref<1x128xf32, #tpu.memory_space<vmem>>, vector<1x128xf32>
    %115 = math.log %113 : vector<24x16xf32>
    %116 = vector.broadcast %27 : vector<24x1xf32> to vector<24x16xf32>
    %117 = arith.mulf %115, %116 : vector<24x16xf32>
    %118 = vector.shape_cast %117 : vector<24x16xf32> to vector<1x24x16xf32>
    %cst_67 = arith.constant dense<0.000000e+00> : vector<1xf32>
    %119 = vector.multi_reduction <add>, %118, %cst_67 [1, 2] : vector<1x24x16xf32> to vector<1xf32>
    %120 = vector.shape_cast %119 : vector<1xf32> to vector<1x1x1xf32>
    %121 = vector.extract %120[0, 0, 0] : f32 from vector<1x1x1xf32>
    %122 = vector.broadcast %121 : f32 to vector<1x128xf32>
    %123 = arith.addf %114, %122 : vector<1x128xf32>
    %c0_68 = arith.constant 0 : index
    %c0_69 = arith.constant 0 : index
    %124 = vector.load %arg16[%c0_68, %c0_69] : memref<1x128xf32, #tpu.memory_space<vmem>>, vector<1x128xf32>
    tpu.vector_store %arg16[%c0_68, %c0_69], %123 {strides = array<i32>} : memref<1x128xf32, #tpu.memory_space<vmem>>, vector<1x128xf32>,
    %c0_70 = arith.constant 0 : index
    %c0_71 = arith.constant 0 : index
    %125 = vector.load %arg11[%c0_70, %c0_71] : memref<24x16xf32, #tpu.memory_space<vmem>>, vector<24x16xf32>
    %126 = arith.addf %125, %101 : vector<24x16xf32>
    %127 = arith.mulf %126, %113 : vector<24x16xf32>
    %128 = vector.broadcast %27 : vector<24x1xf32> to vector<24x16xf32>
    %129 = arith.mulf %127, %128 : vector<24x16xf32>
    %c0_72 = arith.constant 0 : index
    %c0_73 = arith.constant 0 : index
    %130 = vector.load %arg12[%c0_72, %c0_73] : memref<24x16xf32, #tpu.memory_space<vmem>>, vector<24x16xf32>
    %c0_74 = arith.constant 0 : index
    %c0_75 = arith.constant 0 : index
    %131 = vector.load %arg11[%c0_74, %c0_75] : memref<24x16xf32, #tpu.memory_space<vmem>>, vector<24x16xf32>
    tpu.vector_store %arg11[%c0_74, %c0_75], %130 {strides = array<i32>} : memref<24x16xf32, #tpu.memory_space<vmem>>, vector<24x16xf32>,
    %c0_76 = arith.constant 0 : index
    %c0_77 = arith.constant 0 : index
    %132 = vector.load %arg12[%c0_76, %c0_77] : memref<24x16xf32, #tpu.memory_space<vmem>>, vector<24x16xf32>
    tpu.vector_store %arg12[%c0_76, %c0_77], %129 {strides = array<i32>} : memref<24x16xf32, #tpu.memory_space<vmem>>, vector<24x16xf32>,
    %c1_i32_78 = arith.constant 1 : i32
    %133 = arith.cmpi eq, %arg1, %c1_i32_78 : i32
    %134 = arith.extui %133 : i1 to i32
    %c0_i32_79 = arith.constant 0 : i32
    %135 = arith.cmpi ne, %134, %c0_i32_79 : i32
    scf.if %135 {
      %c0_80 = arith.constant 0 : index
      %c0_81 = arith.constant 0 : index
      %136 = vector.load %arg11[%c0_80, %c0_81] : memref<24x16xf32, #tpu.memory_space<vmem>>, vector<24x16xf32>
      %c0_82 = arith.constant 0 : index
      %c0_83 = arith.constant 0 : index
      %137 = vector.load %arg12[%c0_82, %c0_83] : memref<24x16xf32, #tpu.memory_space<vmem>>, vector<24x16xf32>
      %138 = tpu.concatenate %136, %137 in 1 : vector<24x16xf32>, vector<24x16xf32> -> vector<24x32xf32>
      %c0_84 = arith.constant 0 : index
      %c0_85 = arith.constant 0 : index
      %c0_86 = arith.constant 0 : index
      %139 = vector.load %arg9[%c0_84, %c0_85, %c0_86] : memref<1x24x32xf32, #tpu.memory_space<vmem>>, vector<1x24x32xf32>
      %140 = vector.shape_cast %139 : vector<1x24x32xf32> to vector<24x32xf32>
      %141 = vector.shape_cast %138 : vector<24x32xf32> to vector<1x24x32xf32>
      tpu.vector_store %arg9[%c0_84, %c0_85, %c0_86], %141 {strides = array<i32>} : memref<1x24x32xf32, #tpu.memory_space<vmem>>, vector<1x24x32xf32>,
      %c0_87 = arith.constant 0 : index
      %c0_88 = arith.constant 0 : index
      %142 = vector.load %arg16[%c0_87, %c0_88] : memref<1x128xf32, #tpu.memory_space<vmem>>, vector<1x128xf32>
      %c0_89 = arith.constant 0 : index
      %c0_90 = arith.constant 0 : index
      %c0_91 = arith.constant 0 : index
      %143 = vector.load %arg10[%c0_89, %c0_90, %c0_91] : memref<1x1x128xf32, #tpu.memory_space<vmem>>, vector<1x1x128xf32>
      %144 = vector.shape_cast %143 : vector<1x1x128xf32> to vector<1x128xf32>
      %145 = vector.shape_cast %142 : vector<1x128xf32> to vector<1x1x128xf32>
      tpu.vector_store %arg10[%c0_89, %c0_90, %c0_91], %145 {strides = array<i32>} : memref<1x1x128xf32, #tpu.memory_space<vmem>>, vector<1x1x128xf32>,
    } else {
    }
    return
  }
  func.func @transform_0(%arg0: i32, %arg1: i32) -> (i32, i32, i32) {
    %c0_i32 = arith.constant 0 : i32
    %c0_i32_0 = arith.constant 0 : i32
    %c0_i32_1 = arith.constant 0 : i32
    return %arg0, %c0_i32, %c0_i32_0 : i32, i32, i32
  }
  func.func @transform_1(%arg0: i32, %arg1: i32) -> (i32, i32, i32) {
    %c0_i32 = arith.constant 0 : i32
    %c0_i32_0 = arith.constant 0 : i32
    %c0_i32_1 = arith.constant 0 : i32
    return %arg1, %c0_i32, %c0_i32_0 : i32, i32, i32
  }
  func.func @transform_2(%arg0: i32, %arg1: i32) -> (i32, i32, i32) {
    %c0_i32 = arith.constant 0 : i32
    %c0_i32_0 = arith.constant 0 : i32
    %c0_i32_1 = arith.constant 0 : i32
    return %arg1, %c0_i32, %c0_i32_0 : i32, i32, i32
  }
  func.func @transform_3(%arg0: i32, %arg1: i32) -> (i32, i32, i32) {
    %c0_i32 = arith.constant 0 : i32
    %c0_i32_0 = arith.constant 0 : i32
    %c0_i32_1 = arith.constant 0 : i32
    return %arg1, %c0_i32, %c0_i32_0 : i32, i32, i32
  }
  func.func @transform_4(%arg0: i32, %arg1: i32) -> (i32, i32, i32) {
    %c0_i32 = arith.constant 0 : i32
    %c0_i32_0 = arith.constant 0 : i32
    %c0_i32_1 = arith.constant 0 : i32
    return %arg1, %c0_i32, %c0_i32_0 : i32, i32, i32
  }
  func.func @transform_5(%arg0: i32, %arg1: i32) -> (i32, i32, i32) {
    %c0_i32 = arith.constant 0 : i32
    %c0_i32_0 = arith.constant 0 : i32
    %c0_i32_1 = arith.constant 0 : i32
    return %arg1, %c0_i32, %c0_i32_0 : i32, i32, i32
  }
  func.func @transform_6(%arg0: i32, %arg1: i32) -> (i32, i32, i32) {
    %c0_i32 = arith.constant 0 : i32
    %c0_i32_0 = arith.constant 0 : i32
    %c0_i32_1 = arith.constant 0 : i32
    return %arg1, %c0_i32, %c0_i32_0 : i32, i32, i32
  }
  func.func @transform_7(%arg0: i32, %arg1: i32) -> (i32, i32, i32) {
    %c0_i32 = arith.constant 0 : i32
    %c0_i32_0 = arith.constant 0 : i32
    %c0_i32_1 = arith.constant 0 : i32
    return %arg0, %c0_i32, %c0_i32_0 : i32, i32, i32
  }
  func.func @transform_8(%arg0: i32, %arg1: i32) -> (i32, i32, i32) {
    %c0_i32 = arith.constant 0 : i32
    %c0_i32_0 = arith.constant 0 : i32
    %c0_i32_1 = arith.constant 0 : i32
    return %arg0, %c0_i32, %c0_i32_0 : i32, i32, i32
  }
}

</mosaic_0001>

<bundles_post_ra>
// kernel: reversible_flow_forward.3
= control target key start
LH: loop header
LB: loop body
LE: loop exit
PB: predicated region body
PF: predicated region fallthrough
CT: control target
= control target key end

     0   :  { %s2016_s27 = smov 0   ;;  %s2018_s28 = smov 0   ;;  %s2414_s0 = inlined_call_operand.vmem [shape: f32[2,24,32], index: 0, kind: input, shape index: {}]   ;;  %s2415_s1 = inlined_call_operand.vmem [shape: bf16[2,144,32], index: 1, kind: input, shape index: {}]   ;;  %s2416_s2 = inlined_call_operand.vmem [shape: f32[2,1,32], index: 2, kind: input, shape index: {}]   ;;  %s2417_s3 = inlined_call_operand.vmem [shape: bf16[2,32,32], index: 3, kind: input, shape index: {}]   ;;  %s2418_s4 = inlined_call_operand.vmem [shape: f32[2,1,32], index: 4, kind: input, shape index: {}]   ;;  %s2419_s5 = inlined_call_operand.vmem [shape: bf16[2,32,288], index: 5, kind: input, shape index: {}]   ;;  %s2420_s6 = inlined_call_operand.vmem [shape: f32[2,1,32], index: 6, kind: input, shape index: {}]   ;;  %s2421_s7 = inlined_call_operand.vmem [shape: f32[2,24,32], index: 7, kind: output, shape index: {0}]   ;;  %s2422_s8 = inlined_call_operand.vmem [shape: f32[2,1,128], index: 8, kind: output, shape index: {1}]  }
   0x1   :  { %2424 = sst [smem:[#allocation11_spill]] %s2414_s0  ;;  %s2020_s29 = smov 0  }
   0x2   :  { %s2022_s30 = smov 0   ;;  %s2024_s9 = smov 0  }
   0x3 LB: > { %2425 = sst [smem:[#allocation8_spill]] %s1951_s30  ;;  %s28_s10 = sadd.s32 1, %s1947_s29  ;;  %s1955_s9 = sphi %s2024_s9, %s19_s9   ;;  %s1951_s30 = sphi %s2022_s30, %s2433_s30   ;;  %s1947_s29 = sphi %s2020_s29, %s2435_s29   ;;  %s1943_s28 = sphi %s2018_s28, %s2431_s28   ;;  %s1939_s27 = sphi %s2016_s27, %s2434_s27  }
   0x4   : > { %s31_s11 = sadd.s32 1, %s1951_s30  ;;  %p29_p0 = scmp.ge.s32.totalorder %s28_s10, 2 }
   0x5   : > { %p1695_p1 = scmp.ge.s32.totalorder %s1955_s9, 1  ;;  %p331_p2 = scmp.lt.s32.totalorder %s1955_s9, 5 }
   0x6   : > { %s2437_s10 = smov (%p29_p0, %s28_s10), 0  ;;  %s2439_s11 = smov (!%p29_p0, %s31_s11), %s1951_s30 }
   0x7   : > { %2426 = sst [smem:[#allocation9_spill]] %s2437_s10  ;;  %p332_p3 = pnand %p1695_p1, %p331_p2 }
   0x8   : > { %p33_p4 = scmp.ge.s32.totalorder %s2439_s11, 2  ;;  %p392_p5 = scmp.lt.s32.totalorder (!%p332_p3), %s1943_s28, 1 }
   0x9   : > { %335 = sbr.rel (%p332_p3) target bundleno = 1597 (0x63d), region = 48  ;;  %p397_p6 = scmp.lt.s32.totalorder (!%p332_p3), %s1939_s27, 1 }
   0xa   : > { %s2441_s11 = smov (%p33_p4, %s2439_s11), 0  ;;  %s2428_s0 = sld [smem:[#allocation11_spill]] (!%p332_p3) }
   0xb   : > { %2427 = sst [smem:[#allocation10_spill]] %s2441_s11  ;;  %p1708_p7 = scmp.ne.s32.totalorder (!%p332_p3), %s1939_s27, 0 }
   0xe   : > { %v430_v0 = vlaneseq  ;;  %s2443_s28 = smov (!%p392_p5, %s1943_s28), 1  ;;  %v1957_v25 = vmov 0.0  }
   0xf   : > { %s2052_s12 = scalar_select %p397_p6, %s1939_s27, 1 }
  0x10   : > { %v431_v1 = vshrl.u32 %v430_v0, 7  ;;  %s1807_s13 = smul.u32 24, %s2443_s28 }
  0x11   : > { %s1808_s17 = smul.u32 72, %s2052_s12  ;;  %s1767_s24 = sshll.u32 %s2052_s12, 4 }
  0x12   : > { %v432_v2 = vadd.s32 8, %v431_v1  ;;  %v433_v3 = vadd.s32 16, %v431_v1  ;;  %v2059_v4 = vmul.u32.u64.low 2863311531, %v431_v1  ;;  %v2060_v5 = vmul.u32.u64.high 2863311531, %v431_v1, %v2059_v4  ;;  %s2070_s23 = scalar_lea.vmem %s2428_s0, %s1807_s13  ;;  %s2087_s19 = scalar_lea.vmem %s2417_s3, %s1767_s24 }
  0x13   : > { %s2082_s14 = scalar_lea.vmem %s2415_s1, %s1808_s17  ;;  %s412_s16 = scalar_lea.vmem %s2418_s4, %s2052_s12 }
  0x14   : > { %v2073_v6 = vmul.u32.u64.low 2863311531, %v432_v2  ;;  %v2074_v7 = vmul.u32.u64.high 2863311531, %v432_v2, %v2073_v6  ;;  %v2076_v8 = vmul.u32.u64.low 2863311531, %v433_v3  ;;  %v2077_v9 = vmul.u32.u64.high 2863311531, %v433_v3, %v2076_v8  ;;  %s1809_s20 = smul.u32 48, %s2052_s12  ;;  %s420_s10 = scalar_lea.vmem %s2420_s6, %s2052_s12 }
  0x15   : > { %v440_v10 = vshrl.u32 %v2060_v5, 2  ;;  %s2102_s17 = scalar_lea.vmem %s2421_s7, %s1807_s13  ;;  %s1958_s0 = smov (!%p1708_p7), 112  }
  0x16   : > { %s2107_s24 = scalar_lea.vmem %s2419_s5, %s1809_s20  ;;  %v451_v12 = vshrl.u32 %v2074_v7, 2  ;;  %v462_v13 = vshrl.u32 %v2077_v9, 2 }
  0x17   : > { %v441_v11 = vmul.u32 6, %v440_v10 }
  0x18   : > { %v452_v15 = vmul.u32 6, %v451_v12  ;;  %v463_v16 = vmul.u32 6, %v462_v13 }
  0x19   : > { %v442_v14 = vsub.s32 %v431_v1, %v441_v11 }
  0x1a   : > { %v453_v17 = vsub.s32 %v432_v2, %v452_v15  ;;  %v464_v18 = vsub.s32 %v433_v3, %v463_v16 }
  0x1b   : > { %vm467_vm0 = vcmp.ne.s32.totalorder %v442_v14, 0  ;;  %vm470_vm1 = vcmp.lt.s32.totalorder %v442_v14, 0  ;;  %v476_v19 = vadd.s32 6, %v442_v14 }
  0x1c   : > { %vm473_vm2 = vmand %vm470_vm1, %vm467_vm0  ;;  %vm468_vm3 = vcmp.ne.s32.totalorder %v453_v17, 0  ;;  %vm469_vm4 = vcmp.ne.s32.totalorder %v464_v18, 0  ;;  %vm471_vm5 = vcmp.lt.s32.totalorder %v453_v17, 0  ;;  %vm472_vm6 = vcmp.lt.s32.totalorder %v464_v18, 0 }
  0x1d   : > { %vm474_vm7 = vmand %vm471_vm5, %vm468_vm3  ;;  %v477_v20 = vadd.s32 6, %v453_v17  ;;  %v478_v21 = vadd.s32 6, %v464_v18  ;;  %v479_v22 = vsel %vm473_vm2, %v476_v19, %v442_v14 }
  0x1e   : > { %vm475_vm8 = vmand %vm472_vm6, %vm469_vm4  ;;  %vm482_vm9 = vcmp.lt.s32.totalorder %v479_v22, 4  ;;  %vm491_vm10 = vcmp.ge.s32.totalorder %v479_v22, 1  ;;  %vm494_vm11 = vcmp.le.s32.totalorder %v479_v22, 4 }
  0x1f   : > { %v480_v23 = vsel %vm474_vm7, %v477_v20, %v453_v17  ;;  %v481_v24 = vsel %vm475_vm8, %v478_v21, %v464_v18  ;;  %v2112_v26 = vsel %vm482_vm9, 1.0, %v1957_v25  ;;  %vm497_vm12 = vmand %vm491_vm10, %vm494_vm11 }
  0x20   : > { %vm483_vm13 = vcmp.lt.s32.totalorder %v480_v23, 4  ;;  %vm484_vm14 = vcmp.lt.s32.totalorder %v481_v24, 4  ;;  %vm492_vm15 = vcmp.ge.s32.totalorder %v480_v23, 1  ;;  %vm493_vm0 = vcmp.ge.s32.totalorder %v481_v24, 1  ;;  %509 = sbr.rel (%p1708_p7) target bundleno = 158 (0x9e), region = 52 }
  0x21   : > { %v2115_v27 = vsel %vm483_vm13, 1.0, %v1957_v25  ;;  %v2118_v28 = vsel %vm484_vm14, 1.0, %v1957_v25  ;;  %vm495_vm1 = vcmp.le.s32.totalorder %v480_v23, 4  ;;  %vm496_vm2 = vcmp.le.s32.totalorder %v481_v24, 4 }
  0x22   : > { %vm498_vm3 = vmand %vm492_vm15, %vm495_vm1  ;;  %v2121_v29 = vsel %vm497_vm12, 1.0, %v1957_v25 }
  0x23   : > { %vm499_vm4 = vmand %vm493_vm0, %vm496_vm2  ;;  %v2124_v30 = vsel %vm498_vm3, 1.0, %v1957_v25 }
  0x24   : > { %v2127_v31 = vsel %vm499_vm4, 1.0, %v1957_v25 }
  0x25   : > { %v510_v32 = vld [vmem:[%s2070_s23] sm:$0xff]  ;;  %vm513_vm5 = vcmask 130048   ;;  %v512_v33 = vld [vmem:[%s2070_s23 + $0x10] sm:$0xff]  ;;  %v511_v34 = vld [vmem:[%s2070_s23 + $0x8] sm:$0xff]  ;;  %v1959_v35 = vmov 0.0   ;;  %vm533_vm6 = vcmask 124928  }
  0x26   : > { %520 = vrot.lane.b32.xlu0 %v510_v32, %s1958_s0  ;;  %514 = vst.msk [vmem:[#allocation2] sm:$0xff] %vm513_vm5, %v510_v32  ;;  %524 = vrot.lane.b32.xlu1 %v512_v33, %s1958_s0  ;;  %516 = vst.msk [vmem:[#allocation2 + $0x10] sm:$0xff] %vm513_vm5, %v512_v33  ;;  %vm535_vm7 = vcmask 125955   ;;  %vm537_vm8 = vcmask 125952   ;;  %v1960_v36 = vmov 0   ;;  %vm541_vm9 = vcmask 257024  }
  0x27   : > { %515 = vst.msk [vmem:[#allocation2 + $0x8] sm:$0xff] %vm513_vm5, %v511_v34  ;;  %532 = vst [vmem:[#allocation7] sm:$0x1] %v1959_v35 }
  0x28   : > { %534 = vst.msk [vmem:[#allocation4] sm:$0x7] %vm533_vm6, %v1960_v36 }
  0x29   : > { %536 = vst.msk [vmem:[#allocation4 + $0xc] sm:$0x8] %vm535_vm7, %v1960_v36 }
  0x2a   : > { %538 = vst.msk [vmem:[#allocation4 + $0x10] sm:$0xf] %vm537_vm8, %v1960_v36  ;;  %522 = vrot.lane.b32.xlu0 %v511_v34, %s1958_s0 }
  0x2b   : > { %542 = vst.msk [vmem:[#allocation5] sm:$0xf] %vm541_vm9, %v1960_v36  ;;  %543 = vst.msk [vmem:[#allocation5 + $0x10] sm:$0xf] %vm541_vm9, %v1960_v36 }
  0x98   : > { %v521_v37 = vpop.permute.xlu0 %520  ;;  %v525_v38 = vpop.permute.xlu1 %524 }
  0x99   : > { %529 = vst.msk [vmem:[#allocation3] sm:$0xff] %vm513_vm5, %v521_v37  ;;  %531 = vst.msk [vmem:[#allocation3 + $0x10] sm:$0xff] %vm513_vm5, %v525_v38 }
  0x9c   : > { %v523_v39 = vpop.permute.xlu0 %522 }
  0x9d   : > { %530 = vst.msk [vmem:[#allocation3 + $0x8] sm:$0xff] %vm513_vm5, %v523_v39 }
  0x9e PF: > { %vm559_vm10 = vcmask 1042432   ;;  %vm560_vm11 = vcmask 1046532   ;;  %vm574_vm12 = vcmask 125955   ;;  %vm579_vm14 = vcmask 124928   ;;  %v1877_v49 = vld [vmem:[%s2082_s14 + $0x38] sm:$0xff]   ;;  %v1878_v53 = vld [vmem:[%s2082_s14 + $0x30] sm:$0xff]   ;;  %s2429_s25 = scalar_lea.vmem %s2416_s2, %s2052_s12 }
  0x9f   : > { %vm561_vm13 = vmor %vm559_vm10, %vm560_vm11  ;;  %vm576_vm15 = vcmask 125952   ;;  %v1961_v56 = vmov 0   ;;  %vm641_vm0 = vcmask 1044480   ;;  %vm627_vm1 = vcmask 1046528   ;;  %v590_v57 = vld [vmem:[#allocation4 + $0x10] sm:$0x3] }
  0xa0   : > { %v546_v40 = vld [vmem:[#allocation3] sm:$0xff]  ;;  %v548_v42 = vld [vmem:[#allocation3 + $0x10] sm:$0xff]  ;;  %848 = vmatprep.subr.bf16.mxu0 %v1961_v56  ;;  %1112 = vmatprep.mubr.bf16.mxu1 %v1961_v56  ;;  %vm686_vm2 = vcmask 1045504   ;;  %v591_v58 = vld [vmem:[#allocation4 + $0x10] sm:$0x7]  ;;  %s1962_s30 = smov 80  }
  0xa1   : > { %v1768_v43 = vpack.c.bf16 %v546_v40, %v546_v40  ;;  %v1770_v45 = vpack.c.bf16 %v548_v42, %v548_v42  ;;  %849 = vmatpush1.bf16.msra.mxu0 %v1877_v49  ;;  %v1879_v59 = vld [vmem:[%s2082_s14 + $0x28] sm:$0xff]   ;;  %vm604_vm3 = vsmask.f32 7424  ;;  %v1880_v11 = vld [vmem:[%s2082_s14 + $0x20] sm:$0xff]   ;;  %v1881_v24 = vld [vmem:[%s2082_s14 + $0x18] sm:$0xff]   ;;  %s1963_s11 = smov 48  }
  0xa2   : > { %850 = vmatprep.subr.bf16.mxu0 %v1961_v56  ;;  %s1964_s13 = smov 32   ;;  %s1965_s20 = smov 96   ;;  %vm652_vm4 = vsmask.f32 4352  ;;  %vm697_vm5 = vsmask.f32 5376 }
  0xa3   : > { %v562_v46 = vrot.slane %v1768_v43, 5  ;;  %v567_v48 = vrot.slane %v1770_v45, 5  ;;  %s1966_s23 = smov 16   ;;  %s1967_s18 = smov 64   ;;  %vm725_vm6 = vcmask 130048   ;;  %vm731_vm7 = vcmask 261120  }
  0xa4   : > { %v547_v41 = vld [vmem:[#allocation3 + $0x8] sm:$0xff]  ;;  %s1968_s21 = smov 112   ;;  %vm736_vm8 = vcmask 392192   ;;  %vm741_vm9 = vcmask 523264   ;;  %vm746_vm11 = vcmask 654336   ;;  %p1764_p8 = scmp.ne.s32.totalorder %s1939_s27, 1 }
  0xa5   : > { %v1769_v44 = vpack.c.bf16 %v547_v41, %v547_v41  ;;  %v563_v50 = vrot.slane %v562_v46, 4  ;;  %575 = vst.msk [vmem:[#allocation4] sm:$0x8] %vm574_vm12, %v562_v46  ;;  %v569_v52 = vrot.slane %v567_v48, 4  ;;  %851 = vmatpush1.bf16.msra.mxu0 %v1878_v53  ;;  %v1882_v53 = vld [vmem:[%s2082_s14 + $0x10] sm:$0xff]   ;;  %vm751_vm12 = vcmask 785408  }
  0xa6   : > { %852 = vmatprep.subr.bf16.mxu0 %v1961_v56  ;;  %s1970_s12 = smov (!%p1764_p8), 16  }
  0xa7   : > { %v564_v47 = vrot.slane %v1769_v44, 5  ;;  %580 = vst.msk [vmem:[#allocation4 + $0xc] sm:$0x7] %vm579_vm14, %v569_v52 }
  0xa9   : > { %v566_v51 = vrot.slane %v564_v47, 4  ;;  %v565_v54 = vsel %vm561_vm13, %v563_v50, %v564_v47  ;;  %853 = vmatpush1.bf16.msra.mxu0 %v1879_v59 }
  0xaa   : > { %577 = vst.msk [vmem:[#allocation4 + $0x4] sm:$0xf] %vm576_vm15, %v565_v54  ;;  %854 = vmatprep.subr.bf16.mxu0 %v1961_v56 }
  0xab   : > { %v568_v55 = vsel %vm561_vm13, %v566_v51, %v567_v48  ;;  %vm756_vm13 = vcmask 916480  }
  0xac   : > { %578 = vst.msk [vmem:[#allocation4 + $0x8] sm:$0xf] %vm576_vm15, %v568_v55  ;;  %v581_v60 = vld [vmem:[#allocation4] sm:$0xf] }
  0xad   : > { %v586_v61 = vld [vmem:[#allocation4] sm:$0x8]  ;;  %855 = vmatpush1.bf16.msra.mxu0 %v1880_v11  ;;  %v1884_v11 = vld [vmem:[%s2082_s14] sm:$0xff]  }
  0xae   : > { %v585_v62 = vld [vmem:[#allocation4] sm:$0xe]  ;;  %v587_v63 = vld [vmem:[#allocation4 + $0xc] sm:$0x7]  ;;  %856 = vmatprep.subr.bf16.mxu0 %v1961_v56 }
  0xaf   : > { %v584_v0 = vld [vmem:[#allocation4 + $0xc] sm:$0x1] }
  0xb0   : > { %v2147_v1 = vld [vmem:[#allocation4 + $0xc] sm:$0xf] }
  0xb1   : > { %v582_v2 = vld [vmem:[#allocation4 + $0x4] sm:$0xf]  ;;  %v1722_v5 = vcombine.low %v2147_v1, %v590_v57  ;;  %v2153_v6 = vcombine.low %v2147_v1, %v591_v58  ;;  %857 = vmatpush1.bf16.msra.mxu0 %v1881_v24 }
  0xb2   : > { %v589_v4 = vld [vmem:[#allocation4 + $0x4] sm:$0xc]  ;;  %v2156_v8 = vcombine.low %v581_v60, %v582_v2  ;;  %v1716_v9 = vcombine.low %v586_v61, %v582_v2  ;;  %v1715_v13 = vcombine.low %v585_v62, %v582_v2  ;;  %858 = vmatprep.subr.bf16.mxu0 %v1961_v56 }
  0xb3   : > { %v2149_v3 = vld [vmem:[#allocation4 + $0x8] sm:$0xf]  ;;  %v2164_v15 = vrot.slane %v1722_v5, 2  ;;  %v592_v48 = vld [vmem:[#allocation4 + $0x4] sm:$0x8]  ;;  %v707_v57 = vshrl.u32 %v2153_v6, 16 }
  0xb4   : > { %v1719_v7 = vcombine.low %v582_v2, %v2149_v3  ;;  %v1717_v10 = vcombine.low %v2149_v3, %v587_v63  ;;  %v2161_v12 = vcombine.low %v2149_v3, %v584_v0  ;;  %v1721_v14 = vcombine.low %v589_v4, %v2149_v3  ;;  %v1883_v0 = vld [vmem:[%s2082_s14 + $0x8] sm:$0xff]  }
  0xb5   : > { %v642_v16 = vrot.slane %v1716_v9, 3  ;;  %v606_v18 = vshrl.u32 %v2156_v8, 16  ;;  %v608_v19 = vshll.u32 %v2156_v8, 16  ;;  %v628_v20 = vrot.slane %v1715_v13, 1  ;;  %859 = vmatpush1.bf16.msra.mxu0 %v1882_v53 }
  0xb6   : > { %676 = vrot.lane.b32.xlu0 %v1719_v7, %s1962_s30  ;;  %v2168_v17 = vrot.slane %v1717_v10, 3  ;;  %v629_v21 = vrot.slane %v2161_v12, 1  ;;  %v687_v22 = vrot.slane %v1721_v14, 2  ;;  %v613_v23 = vshll.u32 %v2161_v12, 16  ;;  %860 = vmatprep.subr.bf16.mxu0 %v1961_v56 }
  0xb7   : > { %v610_v33 = vrot.slane %v608_v19, 1  ;;  %v617_v34 = vshrl.u32 %v2161_v12, 16  ;;  %v1718_v35 = vcombine.low %v2149_v3, %v2147_v1  ;;  %v654_v39 = vshrl.u32 %v1716_v9, 16 }
  0xb8   : > { %v644_v32 = vsel %vm641_vm0, %v642_v16, %v2168_v17  ;;  %v630_v36 = vsel %vm627_vm1, %v628_v20, %v629_v21  ;;  %v689_v37 = vsel %vm686_vm2, %v687_v22, %v2164_v15  ;;  %v615_v38 = vrot.slane %v613_v23, 1 }
  0xb9   : > { %645 = vrot.lane.b32.xlu1 %v644_v32, %s1963_s11  ;;  %v611_v40 = vor.u32 %v610_v33, %v606_v18  ;;  %v657_v41 = vshll.u32 %v1716_v9, 16  ;;  %v662_v42 = vshrl.u32 %v1718_v35, 16  ;;  %v665_v43 = vshll.u32 %v1718_v35, 16  ;;  %861 = vmatpush1.bf16.msra.mxu0 %v1883_v0 }
  0xba   : > { %631 = vrot.lane.b32.xlu0 %v630_v36, %s1964_s13  ;;  %v619_v44 = vor.u32 %v617_v34, %v615_v38  ;;  %v656_v45 = vrot.slane %v654_v39, 3  ;;  %v699_v46 = vshrl.u32 %v1721_v14, 16  ;;  %v702_v47 = vshll.u32 %v1721_v14, 16  ;;  %862 = vmatprep.subr.bf16.mxu0 %v1961_v56 }
  0xbb   : > { %v616_v49 = vsel %vm604_vm3, %v611_v40, %v615_v38  ;;  %v659_v50 = vrot.slane %v657_v41, 4  ;;  %v664_v51 = vrot.slane %v662_v42, 3  ;;  %v667_v52 = vrot.slane %v665_v43, 4 }
  0xbc   : > { %v701_v54 = vrot.slane %v699_v46, 2  ;;  %v704_v55 = vrot.slane %v702_v47, 3  ;;  %v710_v58 = vshll.u32 %v2153_v6, 16  ;;  %v709_v62 = vrot.slane %v707_v57, 2  ;;  %v1886_v47 = vld [vmem:[%s2087_s19 + $0x8] sm:$0xff]  }
  0xbd   : > { %690 = vrot.lane.b32.xlu1 %v689_v37, %s1965_s20  ;;  %v660_v59 = vor.u32 %v659_v50, %v656_v45  ;;  %v668_v60 = vor.u32 %v667_v52, %v664_v51  ;;  %v1724_v2 = vcombine.low %v592_v48, %v2149_v3  ;;  %v723_v4 = vrot.slane %v2153_v6, 3  ;;  %863 = vmatpush1.bf16.msra.mxu0 %v1884_v11  ;;  %v1885_v6 = vld [vmem:[%s2082_s14 + $0x40] sm:$0xff]  }
  0xbe   : > { %620 = vrot.lane.b32.xlu0 %v616_v49, %s1966_s23  ;;  %v705_v61 = vor.u32 %v704_v55, %v701_v54  ;;  %v712_v63 = vrot.slane %v710_v58, 3  ;;  %v1720_v13 = vcombine.low %v2147_v1, %v2147_v1  ;;  %878 = vmatprep.subr.bf16.mxu0 %v1961_v56  ;;  %v1713_v22 = vcombine.low %v2149_v3, %v2149_v3  ;;  %v1887_v48 = vld [vmem:[%s2087_s19] sm:$0xff]  }
  0xbf   : > { %v669_v7 = vsel %vm652_vm4, %v660_v59, %v668_v60  ;;  %v722_v9 = vrot.slane %v1724_v2, 3  ;;  %v1725_v49 = vld [vmem:[%s2429_s25] ss:$0 sm:$0xff]  ;;  %v1890_v11 = vld [vmem:[%s2107_s24 + $0x18] ss:$12 sps:$4 sm:$0xff]  }
  0xc0   : > { %v713_v5 = vor.u32 %v712_v63, %v709_v62 }
  0xc1   : > { %622 = vrot.lane.b32.xlu1 %v619_v44, %s1966_s23  ;;  %v724_v12 = vsel %vm641_vm0, %v722_v9, %v723_v4  ;;  %879 = vmatpush2.bf16.msra.mxu0 %v1885_v6  ;;  %v1893_v6 = vld [vmem:[%s2107_s24] ss:$12 sps:$4 sm:$0xff]  }
  0xc2   : > { %633 = vrot.lane.b32.xlu0 %v629_v21, %s1964_s13  ;;  %v714_v10 = vsel %vm697_vm5, %v705_v61, %v713_v5  ;;  %1735 = vmatprep.mubr.msk.bf16.mxu0 %vm725_vm6, %v724_v12  ;;  %v1891_v12 = vld [vmem:[%s2107_s24 + $0x4] ss:$12 sps:$4 sm:$0xff]   ;;  %vm1009_vm5 = vcmask 257024  }
  0xc3   : > { %1783 = vmatprep.subr.bf16.mxu0 %v1886_v47 }
  0xc5   : > { %670 = vrot.lane.b32.xlu1 %v669_v7, %s1967_s18 }
  0xc6   : > { %715 = vrot.lane.b32.xlu0 %v714_v10, %s1968_s21  ;;  %v1888_v10 = vld [vmem:[%s2107_s24 + $0x1c] ss:$12 sps:$4 sm:$0xff]  }
  0xc7   : > { %1092 = vmatprep.subr.bf16.mxu1 %v1888_v10 }
  0xc8   : > { %1093 = vmatpush1.bf16.msra.mxu1 %v1890_v11 }
  0xc9   : > { %647 = vrot.lane.b32.xlu1 %v2168_v17, %s1963_s11  ;;  %1094 = vmatprep.subr.bf16.mxu1 %v1891_v12 }
  0xca   : > { %672 = vrot.lane.b32.xlu0 %v668_v60, %s1967_s18 }
  0xcc   : > { %1095 = vmatpush1.bf16.msra.mxu1 %v1893_v6 }
  0xcd   : > { %678 = vrot.lane.b32.xlu1 %v1720_v13, %s1962_s30  ;;  %1791 = vmatprep.subr.bf16.mxu1 %v1957_v25  ;;  %v1737_v13 = vld [vmem:[%s412_s16] ss:$0 sm:$0xff]  ;;  %s2430_s30 = scalar_lea.vmem (!%p1764_p8), %s2422_s8, %s2443_s28 }
  0xce   : > { %692 = vrot.lane.b32.xlu0 %v2164_v15, %s1965_s20 }
  0xd1   : > { %717 = vrot.lane.b32.xlu1 %v713_v5, %s1968_s21 }
 0x128   : > { %v677_v14 = vpop.permute.xlu0 %676 }
 0x12b   : > { %v646_v16 = vpop.permute.xlu1 %645 }
 0x12c   : > { %v632_v18 = vpop.permute.xlu0 %631 }
 0x12f   : > { %v691_v19 = vpop.permute.xlu1 %690 }
 0x130   : > { %v621_v17 = vpop.permute.xlu0 %620 }
 0x131   : > { %v727_v1 = vsel %vm725_vm6, %v2156_v8, %v621_v17 }
 0x132   : > { %v733_v21 = vsel %vm731_vm7, %v727_v1, %v632_v18 }
 0x133   : > { %v623_v20 = vpop.permute.xlu1 %622  ;;  %v738_v24 = vsel %vm736_vm8, %v733_v21, %v646_v16 }
 0x134   : > { %v634_v23 = vpop.permute.xlu0 %633  ;;  %v730_v32 = vsel %vm725_vm6, %v1713_v22, %v623_v20 }
 0x135   : > { %v735_v3 = vsel %vm731_vm7, %v730_v32, %v634_v23 }
 0x137   : > { %v671_v15 = vpop.permute.xlu1 %670 }
 0x138   : > { %v743_v33 = vsel %vm741_vm9, %v738_v24, %v671_v15  ;;  %v716_v34 = vpop.permute.xlu0 %715 }
 0x139   : > { %v748_v8 = vsel %vm746_vm11, %v743_v33, %v677_v14 }
 0x13a   : > { %v753_v35 = vsel %vm751_vm12, %v748_v8, %v691_v19 }
 0x13b   : > { %v648_v36 = vpop.permute.xlu1 %647  ;;  %v758_v37 = vsel %vm756_vm13, %v753_v35, %v716_v34 }
 0x13c   : > { %v740_v38 = vsel %vm736_vm8, %v735_v3, %v648_v36  ;;  %881 = vmatmul.mubr.bf16.vlgmr.msra.gmra.mxu0 %v758_v37  ;;  %v673_v39 = vpop.permute.xlu0 %672 }
 0x13d   : > { %1736 = vmatprep.mubr.msk.bf16.mxu0 %vm725_vm6, %v723_v4  ;;  %v745_v40 = vsel %vm741_vm9, %v740_v38, %v673_v39  ;;  %1784 = vmatpush3.bf16.msra.mxu0 %v1886_v47  ;;  %v1898_v38 = vld [vmem:[%s2107_s24 + $0x8] ss:$12 sps:$4 sm:$0xff]   ;;  %v1896_v39 = vld [vmem:[#allocation5 + $0x10] ss:$0 sps:$4 sm:$0x77]   ;;  %vm1969_vm9 = vmmov 0  }
 0x13e   : > { %1785 = vmatprep.subr.bf16.mxu0 %v1887_v48 }
 0x13f   : > { %v679_v41 = vpop.permute.xlu1 %678 }
 0x140   : > { %v750_v42 = vsel %vm746_vm11, %v745_v40, %v679_v41  ;;  %v693_v43 = vpop.permute.xlu0 %692  ;;  %vm1301_vm11 = vcmask 1040384  }
 0x141   : > { %v755_v44 = vsel %vm751_vm12, %v750_v42, %v693_v43  ;;  %1786 = vmatpush3.bf16.msra.mxu0 %v1887_v48  ;;  %vm1273_vm12 = vcmask 1041408  }
 0x143   : > { %v718_v45 = vpop.permute.xlu1 %717 }
 0x144   : > { %v761_v46 = vsel %vm756_vm13, %v755_v44, %v718_v45  ;;  %vm1333_vm13 = vcmask 1043456  }
 0x145   : > { %889 = vmatmul.mubr.bf16.gmra.mxu0 %v761_v46 }
 0x1fc   : > { %v882_v50 = vpop.f32.mrf.mxu0 }
 0x1fd   : > { %v883_v51 = vadd.f32 %v1725_v49, %v882_v50 }
 0x1fe   : > { %v884_v52 = vpop.f32.mrf.mxu0 }
 0x1ff   : > { %v899_v54 = vmul.f32 0.01, %v883_v51  ;;  %vm896_vm14 = vcmp.ge.f32.partialorder %v883_v51, 0.0 }
 0x200   : > { %v885_v53 = vpop.f32.mrf.mxu0 }
 0x201   : > { %v886_v55 = vadd.f32 %v1725_v49, %v885_v53  ;;  %v902_v59 = vsel %vm896_vm14, %v883_v51, %v899_v54 }
 0x202   : > { %v887_v57 = vpop.f32.mrf.mxu0 }
 0x203   : > { %vm897_vm15 = vcmp.ge.f32.partialorder %v886_v55, 0.0  ;;  %v900_v58 = vmul.f32 0.01, %v886_v55 }
 0x205   : > { %v903_v60 = vsel %vm897_vm15, %v886_v55, %v900_v58  ;;  %v890_v61 = vpop.f32.mrf.mxu0 }
 0x206   : > { %v905_v62 = vpack.c.bf16 %v903_v60, %v902_v59  ;;  %v891_v63 = vadd.f32 %v1725_v49, %v890_v61 }
 0x207   : > { %v892_v0 = vpop.f32.mrf.mxu0 }
 0x208   : > { %vm898_vm0 = vcmp.ge.f32.partialorder %v891_v63, 0.0  ;;  %v901_v2 = vmul.f32 0.01, %v891_v63  ;;  %1787 = vmatprep.mubr.msk.bf16.mxu0 %vm731_vm7, %v905_v62 }
 0x209   : > { %v893_v4 = vpop.f32.mrf.mxu0 }
 0x20a   : > { %v904_v5 = vsel %vm898_vm0, %v891_v63, %v901_v2 }
 0x20b   : > { %v906_v7 = vpack.c.bf16 %v904_v5, %v904_v5  ;;  %v894_v9 = vpop.f32.mrf.mxu0 }
 0x20d   : > { %1788 = vmatmul.mubr.msk.bf16.vlgmr.msra.gmra.mxu0 %vm731_vm7, %v906_v7 }
 0x2cd   : > { %v1789_v14 = vpop.f32.mrf.mxu0 }
 0x2ce   : > { %v979_v16 = vadd.f32 %v1789_v14, %v1737_v13 }
 0x2cf   : > { %v970_v18 = vpop.f32.mrf.mxu0 }
 0x2d0   : > { %vm986_vm3 = vcmp.ge.f32.partialorder %v979_v16, 0.0  ;;  %v989_v19 = vmul.f32 0.01, %v979_v16  ;;  %v971_v17 = vadd.f32 %v1737_v13, %v970_v18 }
 0x2d1   : > { %v1790_v1 = vpop.f32.mrf.mxu0 }
 0x2d2   : > { %v992_v20 = vsel %vm986_vm3, %v979_v16, %v989_v19  ;;  %vm984_vm4 = vcmp.ge.f32.partialorder %v971_v17, 0.0  ;;  %v987_v21 = vmul.f32 0.01, %v971_v17 }
 0x2d3   : > { %v995_v22 = vmul.f32 %v2118_v28, %v992_v20  ;;  %v973_v23 = vpop.f32.mrf.mxu0  ;;  %v1897_v28 = vld [vmem:[%s2107_s24 + $0x20] ss:$12 sps:$4 sm:$0xff]  }
 0x2d4   : > { %v990_v15 = vsel %vm984_vm4, %v971_v17, %v987_v21  ;;  %v974_v24 = vadd.f32 %v1737_v13, %v973_v23 }
 0x2d5   : > { %v1773_v32 = vpack.c.bf16 %v995_v22, %v995_v22  ;;  %v993_v33 = vmul.f32 %v2112_v26, %v990_v15 }
 0x2d6   : > { %vm985_vm8 = vcmp.ge.f32.partialorder %v974_v24, 0.0  ;;  %v988_v34 = vmul.f32 0.01, %v974_v24 }
 0x2d7   : > { %1012 = vst.msk [vmem:[#allocation5 + $0xc] sm:$0xf] %vm1009_vm5, %v1773_v32  ;;  %v1771_v8 = vpack.c.bf16 %v993_v33, %v993_v33 }
 0x2d8   : > { %v991_v35 = vsel %vm985_vm8, %v974_v24, %v988_v34 }
 0x2d9   : > { %1010 = vst.msk [vmem:[#allocation5 + $0x4] sm:$0xf] %vm1009_vm5, %v1771_v8  ;;  %v994_v3 = vmul.f32 %v2115_v27, %v991_v35 }
 0x2db   : > { %v1772_v36 = vpack.c.bf16 %v994_v3, %v994_v3 }
 0x2dd   : > { %1011 = vst.msk [vmem:[#allocation5 + $0x8] sm:$0xf] %vm1009_vm5, %v1772_v36 }
 0x2e0   : > { %v1894_v37 = vld [vmem:[#allocation5] sm:$0xff]  }
 0x2e1   : > { %1754 = vmatmul.mubr.msk.bf16.vlgmr.msra.gmra.mxu1 %vm731_vm7, %v1894_v37 }
 0x2e2   : > { %1122 = vmatprep.mubr.bf16.mxu1 %v1961_v56  ;;  %1792 = vmatpush3.bf16.msra.mxu1 %v1897_v28 }
 0x2e3   : > { %1793 = vmatprep.subr.bf16.mxu1 %v1957_v25 }
 0x2e4   : > { %v1895_v26 = vld [vmem:[#allocation5 + $0x8] sm:$0xff]  }
 0x2e6   : > { %1794 = vmatpush3.bf16.msra.mxu1 %v1898_v38 }
 0x2e9   : > { %1755 = vmatmul.mubr.msk.bf16.gmra.mxu1 %vm731_vm7, %v1895_v26 }
 0x2ea   : > { %1132 = vmatprep.mubr.bf16.mxu1 %v1961_v56 }
 0x2f1   : > { %1756 = vmatmul.mubr.msk.bf16.gmra.mxu1 %vm731_vm7, %v1896_v39 }
 0x2f2   : > { %1795 = vmatprep.mubr.msk.bf16.mxu1 %vm1969_vm9, %v1957_v25 }
 0x2f9   : > { %1796 = vmatmul.mubr.msk.bf16.vlgmr.msra.gmra.mxu1 %vm731_vm7, %v1894_v37 }
 0x2fa   : > { %1799 = vmatprep.mubr.msk.bf16.mxu1 %vm1969_vm9, %v1957_v25 }
 0x301   : > { %1800 = vmatmul.mubr.msk.bf16.gmra.mxu1 %vm731_vm7, %v1895_v26 }
 0x302   : > { %1803 = vmatprep.mubr.msk.bf16.mxu1 %vm1969_vm9, %v1957_v25 }
 0x309   : > { %1804 = vmatmul.mubr.msk.bf16.gmra.mxu1 %vm731_vm7, %v1896_v39 }
 0x3a1   : > { %v2266_v27 = vpop.f32.mrf.mxu1 }
 0x3a2   : > { %1197 = vst [vmem:[#allocation6] sm:$0xff] %v2266_v27 }
 0x3a3   : > { %v1116_v56 = vpop.f32.mrf.mxu1 }
 0x3a4   : > { %1198 = vst [vmem:[#allocation6 + $0x8] sm:$0xff] %v1116_v56 }
 0x3a5   : > { %v2269_v40 = vpop.f32.mrf.mxu1 }
 0x3a6   : > { %v1227_v46 = vrot.slane %v2269_v40, 1  ;;  %v1251_v48 = vrot.slane %v2269_v40, 2  ;;  %v1275_v58 = vrot.slane %v2269_v40, 6 }
 0x3a7   : > { %v2271_v41 = vpop.f32.mrf.mxu1 }
 0x3a8   : > { %1201 = vst [vmem:[#allocation6 + $0x20] sm:$0xff] %v2271_v41  ;;  %1317 = vrot.lane.b32.xlu1 %v2271_v41, %s1965_s20  ;;  %v1303_v55 = vrot.slane %v2271_v41, 7 }
 0x3a9   : > { %v2276_v42 = vpop.f32.mrf.mxu1  ;;  %v1219_v25 = vld [vmem:[#allocation6] sm:$0xfe] }
 0x3aa   : > { %v1245_v43 = vld [vmem:[#allocation6] sm:$0xfc]  ;;  %v1226_v45 = vrot.slane %v1219_v25, 1  ;;  %v1229_v53 = vrot.slane %v2276_v42, 1  ;;  %v1277_v63 = vrot.slane %v2276_v42, 6  ;;  %v1253_v5 = vrot.slane %v2276_v42, 2 }
 0x3ab   : > { %v1269_v44 = vld [vmem:[#allocation6] sm:$0xc0]  ;;  %v1250_v47 = vrot.slane %v1245_v43, 2  ;;  %v2280_v49 = vpop.f32.mrf.mxu1 }
 0x3ac   : > { %v1228_v50 = vsel %vm627_vm1, %v1226_v45, %v1227_v46  ;;  %v1274_v52 = vrot.slane %v1269_v44, 6  ;;  %v1305_v57 = vrot.slane %v2280_v49, 7  ;;  %v1230_v62 = vsel %vm627_vm1, %v1227_v46, %v1229_v53 }
 0x3ad   : > { %v1252_v51 = vsel %vm686_vm2, %v1250_v47, %v1251_v48  ;;  %v1128_v54 = vpop.f32.mrf.mxu1  ;;  %1233 = vrot.lane.b32.xlu0 %v1228_v50, %s1965_s20  ;;  %v1278_v4 = vsel %vm1273_vm12, %v1275_v58, %v1277_v63  ;;  %v1254_v12 = vsel %vm686_vm2, %v1251_v48, %v1253_v5  ;;  %v1335_v19 = vrot.slane %v2280_v49, 4 }
 0x3ae   : > { %1257 = vrot.lane.b32.xlu1 %v1252_v51, %s1967_s18  ;;  %1206 = vst [vmem:[#allocation6 + $0x48] sm:$0xff] %v1128_v54  ;;  %v2297_v60 = vsel %vm1301_vm11, %v1303_v55, %v1305_v57  ;;  %v1276_v61 = vsel %vm1273_vm12, %v1274_v52, %v1275_v58  ;;  %v1359_v24 = vrot.slane %v2280_v49, 5 }
 0x3af   : > { %v2290_v59 = vpop.f32.mrf.mxu1  ;;  %v1329_v9 = vld [vmem:[#allocation6 + $0x20] sm:$0xf0] }
 0x3b0   : > { %1207 = vst [vmem:[#allocation6 + $0x50] sm:$0xff] %v2290_v59  ;;  %v1334_v6 = vrot.slane %v1329_v9, 4  ;;  %v1353_v18 = vld [vmem:[#allocation6 + $0x20] sm:$0xe0]  ;;  %v1337_v33 = vrot.slane %v2290_v59, 4  ;;  %v1361_v43 = vrot.slane %v2290_v59, 5 }
 0x3b1   : > { %v1134_v0 = vpop.f32.mrf.mxu1  ;;  %1281 = vrot.lane.b32.xlu0 %v1276_v61, %s1964_s13  ;;  %v1358_v22 = vrot.slane %v1353_v18, 5 }
 0x3b2   : > { %1235 = vrot.lane.b32.xlu1 %v1230_v62, %s1965_s20  ;;  %v1336_v1 = vsel %vm1333_vm13, %v1334_v6, %v1335_v19  ;;  %v1338_v26 = vsel %vm1333_vm13, %v1335_v19, %v1337_v33  ;;  %v1362_v50 = vsel %vm559_vm10, %v1359_v24, %v1361_v43  ;;  %v1293_v0 = vld [vmem:[#allocation6 + $0x8] sm:$0x80] }
 0x3b3   : > { %v1136_v2 = vpop.f32.mrf.mxu1  ;;  %v1360_v8 = vsel %vm559_vm10, %v1358_v22, %v1359_v24 }
 0x3b4   : > { %1210 = vst [vmem:[#allocation6 + $0x68] sm:$0x3f] %v1136_v2  ;;  %v1302_v2 = vrot.slane %v1293_v0, 7 }
 0x3b5   : > { %v1138_v7 = vpop.f32.mrf.mxu1  ;;  %1319 = vrot.lane.b32.xlu0 %v2280_v49, %s1965_s20  ;;  %v1246_v10 = vld [vmem:[#allocation6 + $0x48] sm:$0x3] }
 0x3b6   : > { %1283 = vrot.lane.b32.xlu1 %v1278_v4, %s1964_s13  ;;  %v1255_v13 = vrot.slane %v1246_v10, 2  ;;  %v1220_v16 = vld [vmem:[#allocation6 + $0x48] sm:$0x1]  ;;  %v1304_v9 = vsel %vm1301_vm11, %v1302_v2, %v1303_v55 }
 0x3b7   : > { %v1139_v11 = vpop.f32.mrf.mxu1  ;;  %v1231_v21 = vrot.slane %v1220_v16, 1  ;;  %v1270_v15 = vld [vmem:[#allocation6 + $0x48] sm:$0x3f] }
 0x3b8   : > { %v1256_v20 = vsel %vm686_vm2, %v1253_v5, %v1255_v13  ;;  %v1279_v35 = vrot.slane %v1270_v15, 6 }
 0x3b9   : > { %v1175_v14 = vpop.f32.mrf.mxu1  ;;  %1259 = vrot.lane.b32.xlu0 %v1254_v12, %s1967_s18  ;;  %v1232_v34 = vsel %vm627_vm1, %v1229_v53, %v1231_v21  ;;  %vm1211_vm1 = vcmask 259072  }
 0x3ba   : > { %1321 = vrot.lane.b32.xlu1 %v2290_v59, %s1965_s20  ;;  %v1280_v38 = vsel %vm1273_vm12, %v1277_v63, %v1279_v35  ;;  %v1474_v35 = vld [vmem:[#allocation2] sm:$0xff] }
 0x3bb   : > { %v1797_v17 = vpop.f32.mrf.mxu1  ;;  %v1330_v36 = vld [vmem:[#allocation6 + $0x68] sm:$0xf] }
 0x3bc   : > { %v1354_v28 = vld [vmem:[#allocation6 + $0x68] sm:$0x1f]  ;;  %v1339_v39 = vrot.slane %v1330_v36, 4 }
 0x3bd   : > { %v1178_v23 = vpop.f32.mrf.mxu1  ;;  %1341 = vrot.lane.b32.xlu0 %v1336_v1, %s1967_s18  ;;  %v1363_v56 = vrot.slane %v1354_v28, 5 }
 0x3be   : > { %1261 = vrot.lane.b32.xlu1 %v1256_v20, %s1967_s18  ;;  %1202 = vst.msk [vmem:[#allocation6 + $0x28] sm:$0xff] %vm731_vm7, %v1178_v23  ;;  %v1340_v45 = vsel %vm1333_vm13, %v1337_v33, %v1339_v39  ;;  %v1296_v20 = vld [vmem:[#allocation6 + $0x50] sm:$0x7f] }
 0x3bf   : > { %v1798_v32 = vpop.f32.mrf.mxu1  ;;  %v1364_v46 = vsel %vm559_vm10, %v1361_v43, %v1363_v56 }
 0x3c0   : > { %v1307_v32 = vrot.slane %v1296_v20, 7 }
 0x3c1   : > { %v1183_v3 = vpop.f32.mrf.mxu1  ;;  %1237 = vrot.lane.b32.xlu0 %v1232_v34, %s1965_s20 }
 0x3c2   : > { %1365 = vrot.lane.b32.xlu1 %v1360_v8, %s1964_s13  ;;  %1205 = vst.msk [vmem:[#allocation6 + $0x40] sm:$0xff] %vm731_vm7, %v1183_v3 }
 0x3c3   : > { %v1801_v37 = vpop.f32.mrf.mxu1 }
 0x3c5   : > { %v1186_v25 = vpop.f32.mrf.mxu1  ;;  %1285 = vrot.lane.b32.xlu0 %v1280_v38, %s1964_s13  ;;  %v1377_v19 = vld [vmem:[#allocation6 + $0x28] sm:$0xc0] }
 0x3c6   : > { %1343 = vrot.lane.b32.xlu1 %v1338_v26, %s1967_s18  ;;  %1208 = vst.msk [vmem:[#allocation6 + $0x58] sm:$0xff] %vm731_vm7, %v1186_v25  ;;  %v1385_v41 = vrot.slane %v1377_v19, 6 }
 0x3c7   : > { %v1802_v44 = vpop.f32.mrf.mxu1 }
 0x3c9   : > { %v1191_v47 = vpop.f32.mrf.mxu1  ;;  %1345 = vrot.lane.b32.xlu0 %v1340_v45, %s1967_s18  ;;  %v1378_v13 = vld [vmem:[#allocation6 + $0x40] sm:$0xff] }
 0x3ca   : > { %1369 = vrot.lane.b32.xlu1 %v1364_v46, %s1964_s13  ;;  %1212 = vst.msk [vmem:[#allocation6 + $0x70] sm:$0x3f] %vm1211_vm1, %v1191_v47  ;;  %v1386_v17 = vrot.slane %v1378_v13, 6 }
 0x3cb   : > { %v1805_v48 = vpop.f32.mrf.mxu1 }
 0x3cc   : > { %v1387_v24 = vsel %vm1273_vm12, %v1385_v41, %v1386_v17 }
 0x3cd   : > { %1367 = vrot.lane.b32.xlu0 %v1362_v50, %s1964_s13  ;;  %v1194_v51 = vpop.f32.mrf.mxu1  ;;  %v1379_v39 = vld [vmem:[#allocation6 + $0x58] sm:$0xff] }
 0x3ce   : > { %v1388_v47 = vrot.slane %v1379_v39, 6 }
 0x3cf   : > { %v1806_v52 = vpop.f32.mrf.mxu1 }
 0x3d1   : > { %v1380_v56 = vld [vmem:[#allocation6 + $0x70] sm:$0x3f] }
 0x3d2   : > { %v1390_v48 = vrot.slane %v1380_v56, 6 }
 0x41a   : > { %v1318_v53 = vpop.permute.xlu1 %1317 }
 0x41f   : > { %v1234_v54 = vpop.permute.xlu0 %1233 }
 0x420   : > { %v1258_v58 = vpop.permute.xlu1 %1257  ;;  %v1242_v59 = vadd.f32 %v1234_v54, %v2266_v27  ;;  %v1389_v54 = vsel %vm1273_vm12, %v1386_v17, %v1388_v47 }
 0x422   : > { %v1266_v63 = vadd.f32 %v1258_v58, %v1242_v59 }
 0x423   : > { %v1282_v61 = vpop.permute.xlu0 %1281 }
 0x424   : > { %v1236_v62 = vpop.permute.xlu1 %1235  ;;  %v1290_v7 = vadd.f32 %v1282_v61, %v1266_v63  ;;  %v1475_v61 = vld [vmem:[#allocation2 + $0x8] sm:$0xff] }
 0x425   : > { %v1243_v6 = vadd.f32 %v1236_v62, %v2269_v40  ;;  %v1760_v40 = vld [vmem:[%s420_s10] ss:$0 sm:$0xff]  ;;  %v1476_v62 = vld [vmem:[#allocation2 + $0x10] sm:$0xff] }
 0x426   : > { %v1312_v12 = vadd.f32 %v1304_v9, %v1290_v7 }
 0x427   : > { %v1320_v4 = vpop.permute.xlu0 %1319 }
 0x428   : > { %v1284_v5 = vpop.permute.xlu1 %1283  ;;  %v1326_v18 = vadd.f32 %v1318_v53, %v1312_v12  ;;  %v1391_v53 = vsel %vm1273_vm12, %v1388_v47, %v1390_v48 }
 0x42b   : > { %v1260_v10 = vpop.permute.xlu0 %1259 }
 0x42c   : > { %v1322_v11 = vpop.permute.xlu1 %1321  ;;  %v1267_v16 = vadd.f32 %v1260_v10, %v1243_v6 }
 0x42e   : > { %v1291_v23 = vadd.f32 %v1284_v5, %v1267_v16 }
 0x42f   : > { %v1342_v27 = vpop.permute.xlu0 %1341 }
 0x430   : > { %v1262_v14 = vpop.permute.xlu1 %1261  ;;  %v1350_v1 = vadd.f32 %v1342_v27, %v1326_v18  ;;  %v1313_v28 = vadd.f32 %v2297_v60, %v1291_v23 }
 0x432   : > { %v1327_v45 = vadd.f32 %v1320_v4, %v1313_v28 }
 0x433   : > { %v1238_v21 = vpop.permute.xlu0 %1237 }
 0x434   : > { %v1366_v22 = vpop.permute.xlu1 %1365  ;;  %v1244_v55 = vadd.f32 %v1238_v21, %v2276_v42  ;;  %v1308_v42 = vsel %vm1301_vm11, %v1305_v57, %v1307_v32  ;;  %v1499_v32 = vld [vmem:[#allocation3 + $0x8] sm:$0xff] }
 0x435   : > { %v1374_v15 = vadd.f32 %v1366_v22, %v1350_v1  ;;  %1502 = vst.msk [vmem:[#allocation2 + $0x8] sm:$0xff] %vm725_vm6, %v1499_v32 }
 0x436   : > { %v1268_v34 = vadd.f32 %v1262_v14, %v1244_v55 }
 0x437   : > { %v1395_v33 = vadd.f32 %v1387_v24, %v1374_v15  ;;  %v1286_v8 = vpop.permute.xlu0 %1285 }
 0x438   : > { %v1292_v36 = vadd.f32 %v1286_v8, %v1268_v34  ;;  %v1344_v37 = vpop.permute.xlu1 %1343 }
 0x439   : > { %v1405_v3 = vadd.f32 %v1760_v40, %v1395_v33  ;;  %v1351_v50 = vadd.f32 %v1344_v37, %v1327_v45 }
 0x43a   : > { %v1314_v26 = vadd.f32 %v1308_v42, %v1292_v36  ;;  %v1500_v36 = vld [vmem:[#allocation3 + $0x10] sm:$0xff] }
 0x43b   : > { %v1408_v38 = vadd.f32 -0.0010005003, %v1405_v3  ;;  %v2355_v25 = vadd.f32 %v1474_v35, %v1405_v3  ;;  %v1346_v43 = vpop.permute.xlu0 %1345  ;;  %1503 = vst.msk [vmem:[#allocation2 + $0x10] sm:$0xff] %vm725_vm6, %v1500_v36 }
 0x43c   : > { %v1328_v46 = vadd.f32 %v1322_v11, %v1314_v26  ;;  %v1370_v51 = vpop.permute.xlu1 %1369 }
 0x43d   : > { %v1761_v44 = vmul.f32 -1.442695, %v1408_v38 }
 0x43e   : > { %v1352_v60 = vadd.f32 %v1346_v43, %v1328_v46 }
 0x43f   : > { %1899 = vpow2.f32 %v1761_v44  ;;  %v1368_v49 = vpop.permute.xlu0 %1367 }
 0x440   : > { %v1376_v52 = vadd.f32 %v1370_v51, %v1352_v60  ;;  %v1375_v57 = vadd.f32 %v1368_v49, %v1351_v50 }
 0x442   : > { %v1397_v58 = vadd.f32 %v1391_v53, %v1376_v52  ;;  %v1396_v59 = vadd.f32 %v1389_v54, %v1375_v57 }
 0x444   : > { %v1407_v63 = vadd.f32 %v1760_v40, %v1397_v58  ;;  %v1406_v0 = vadd.f32 %v1760_v40, %v1396_v59  ;;  %v1498_v40 = vld [vmem:[#allocation3] sm:$0xff] }
 0x445   : > { %1501 = vst.msk [vmem:[#allocation2] sm:$0xff] %vm725_vm6, %v1498_v40  ;;  %v1435_v59 = vld [vmem:[#allocation7] sm:$0x1] }
 0x446   : > { %v1410_v2 = vadd.f32 -0.0010005003, %v1407_v63  ;;  %v1409_v4 = vadd.f32 -0.0010005003, %v1406_v0  ;;  %v1478_v5 = vadd.f32 %v1475_v61, %v1406_v0  ;;  %v2359_v7 = vadd.f32 %v1476_v62, %v1407_v63 }
 0x448   : > { %v1763_v9 = vmul.f32 -1.442695, %v1410_v2  ;;  %v1762_v10 = vmul.f32 -1.442695, %v1409_v4 }
 0x44a   : > { %1901 = vpow2.f32 %v1763_v9 }
 0x44b   : > { %1903 = vpow2.f32 %v1762_v10 }
 0x44c   : > { %v1900_v11 = vpop.eup %1899 }
 0x44d   : > { %v1420_v12 = vadd.f32 1.0, %v1900_v11 }
 0x44f   : > { %1905 = vrcp.f32 %v1420_v12 }
 0x457   : > { %v1902_v6 = vpop.eup %1901 }
 0x458   : > { %v1904_v13 = vpop.eup %1903  ;;  %v1422_v27 = vadd.f32 1.0, %v1902_v6 }
 0x459   : > { %v1421_v14 = vadd.f32 1.0, %v1904_v13 }
 0x45a   : > { %1907 = vrcp.f32 %v1422_v27 }
 0x45b   : > { %1909 = vrcp.f32 %v1421_v14 }
 0x45c   : > { %v1906_v16 = vpop.eup %1905 }
 0x45d   : > { %v1429_v18 = vmul.f32 1.999, %v1906_v16 }
 0x45f   : > { %v1432_v19 = vadd.f32 0.001, %v1429_v18 }
 0x461   : > { %1911 = vlog2.f32 %v1432_v19 }
 0x467   : > { %v1908_v17 = vpop.eup %1907 }
 0x468   : > { %v1910_v1 = vpop.eup %1909  ;;  %v1431_v20 = vmul.f32 1.999, %v1908_v17 }
 0x469   : > { %v1430_v21 = vmul.f32 1.999, %v1910_v1 }
 0x46a   : > { %v1434_v22 = vadd.f32 0.001, %v1431_v20 }
 0x46b   : > { %v1433_v41 = vadd.f32 0.001, %v1430_v21 }
 0x46c   : > { %1913 = vlog2.f32 %v1434_v22 }
 0x46d   : > { %1915 = vlog2.f32 %v1433_v41 }
 0x46e   : > { %v1912_v23 = vpop.eup %1911 }
 0x46f   : > { %v1437_v55 = vmul.f32 0.6931472, %v1912_v23 }
 0x471   : > { %v1442_v15 = vmul.f32 %v2121_v29, %v1437_v55 }
 0x473   : > { %1448 = vrot.lane.b32.xlu0 %v1442_v15, %s1968_s21 }
 0x479   : > { %v1914_v24 = vpop.eup %1913 }
 0x47a   : > { %v1916_v33 = vpop.eup %1915  ;;  %v1441_v34 = vmul.f32 0.6931472, %v1914_v24 }
 0x47b   : > { %v1439_v8 = vmul.f32 0.6931472, %v1916_v33 }
 0x47c   : > { %v1444_v35 = vmul.f32 %v2127_v31, %v1441_v34 }
 0x47d   : > { %v1443_v3 = vmul.f32 %v2124_v30, %v1439_v8 }
 0x47e   : > { %1452 = vrot.lane.b32.xlu0 %v1444_v35, %s1968_s21 }
 0x47f   : > { %1450 = vrot.lane.b32.xlu1 %v1443_v3, %s1968_s21 }
 0x482   : > { %1483 = vrot.lane.b32.xlu0 %v1432_v19, %s1968_s21 }
 0x486   : > { %1485 = vrot.lane.b32.xlu0 %v1433_v41, %s1968_s21 }
 0x48a   : > { %1487 = vrot.lane.b32.xlu0 %v1434_v22, %s1968_s21 }
 0x4e5   : > { %v1449_v28 = vpop.permute.xlu0 %1448 }
 0x4e6   : > { %v1457_v38 = vsel %vm725_vm6, %v1449_v28, 0.0 }
 0x4f0   : > { %v1453_v42 = vpop.permute.xlu0 %1452 }
 0x4f1   : > { %v1451_v37 = vpop.permute.xlu1 %1450  ;;  %v1460_v56 = vsel %vm725_vm6, %v1453_v42, 0.0 }
 0x4f2   : > { %v1458_v26 = vsel %vm725_vm6, %v1451_v37, 0.0 }
 0x4f3   : > { %v1459_v39 = vadd.f32 %v1458_v26, %v1457_v38 }
 0x4f4   : > { %v1484_v43 = vpop.permute.xlu0 %1483 }
 0x4f5   : > { %v1492_v44 = vmul.f32 %v1484_v43, %v2355_v25  ;;  %v1461_v45 = vadd.f32 %v1460_v56, %v1459_v39 }
 0x4f7   : > { %v1495_v46 = vmul.f32 %v2121_v29, %v1492_v44  ;;  %1462 = vadd.xlane.f32.xlu1 %v1461_v45 }
 0x4f8   : > { %v1486_v47 = vpop.permute.xlu0 %1485 }
 0x4f9   : > { %1504 = vst.msk [vmem:[#allocation3] sm:$0xff] %vm725_vm6, %v1495_v46  ;;  %v1493_v48 = vmul.f32 %v1486_v47, %v1478_v5 }
 0x4fb   : > { %v1496_v50 = vmul.f32 %v2124_v30, %v1493_v48 }
 0x4fc   : > { %v1488_v60 = vpop.permute.xlu0 %1487 }
 0x4fd   : > { %1505 = vst.msk [vmem:[#allocation3 + $0x8] sm:$0xff] %vm725_vm6, %v1496_v50  ;;  %v1494_v51 = vmul.f32 %v1488_v60, %v2359_v7 }
 0x4ff   : > { %v1497_v49 = vmul.f32 %v2127_v31, %v1494_v51 }
 0x501   : > { %1506 = vst.msk [vmem:[#allocation3 + $0x10] sm:$0xff] %vm725_vm6, %v1497_v49 }
 0x580   : > { %v1463_v25 = vpop.xlane.xlu1 %1462 }
 0x581   : > { %v1464_v52 = vrot.slane %v1463_v25, 4 }
 0x583   : > { %v1465_v57 = vadd.f32 %v1464_v52, %v1463_v25 }
 0x585   : > { %v1466_v29 = vrot.slane %v1465_v57, 2 }
 0x587   : > { %v1467_v53 = vadd.f32 %v1466_v29, %v1465_v57 }
 0x589   : > { %v1468_v54 = vrot.slane %v1467_v53, 1 }
 0x58b   : > { %v1469_v58 = vadd.f32 %v1468_v54, %v1467_v53 }
 0x58d   : > { %1816 = vpush %v1469_v58 }
 0x5be   : > { %s1817_s10 = spop %1816  ;;  %1510 = sbr.rel (%p1764_p8) target bundleno = 1597 (0x63d), region = 56 }
 0x5bf   : > { %v1471_v30 = vstv %s1817_s10 }
 0x5c0   : > { %v1472_v61 = vadd.f32 %v1471_v30, %v1435_v59 }
 0x5c2   : > { %1473 = vst [vmem:[#allocation7] sm:$0x1] %v1472_v61 }
 0x5c3   : > { %v1514_v62 = vld [vmem:[#allocation3] sm:$0xff]  ;;  %v1516_v31 = vld [vmem:[#allocation3 + $0x10] sm:$0xff]  ;;  %v1515_v63 = vld [vmem:[#allocation3 + $0x8] sm:$0xff] }
 0x5c4   : > { %1520 = vrot.lane.b32.xlu0 %v1514_v62, %s1970_s12  ;;  %1524 = vrot.lane.b32.xlu1 %v1516_v31, %s1970_s12  ;;  %v1511_v2 = vld [vmem:[#allocation2] sm:$0xff]  ;;  %v1513_v4 = vld [vmem:[#allocation2 + $0x10] sm:$0xff]  ;;  %v1512_v11 = vld [vmem:[#allocation2 + $0x8] sm:$0xff] }
 0x5c8   : > { %1522 = vrot.lane.b32.xlu0 %v1515_v63, %s1970_s12 }
 0x5c9   : > { %v1535_v0 = vld [vmem:[#allocation7] sm:$0x1] }
 0x5ca   : > { %1536 = vst [vmem:[%s2430_s30] sm:$0x1] %v1535_v0 }
 0x636   : > { %v1521_v5 = vpop.permute.xlu0 %1520  ;;  %v1525_v7 = vpop.permute.xlu1 %1524 }
 0x637   : > { %v1529_v9 = vsel %vm725_vm6, %v1511_v2, %v1521_v5  ;;  %v1531_v10 = vsel %vm725_vm6, %v1513_v4, %v1525_v7 }
 0x638   : > { %1532 = vst.msk [vmem:[%s2102_s17] sm:$0xff] %vm731_vm7, %v1529_v9  ;;  %1534 = vst.msk [vmem:[%s2102_s17 + $0x10] sm:$0xff] %vm731_vm7, %v1531_v10 }
 0x63a   : > { %v1523_v12 = vpop.permute.xlu0 %1522 }
 0x63b   : > { %v1530_v6 = vsel %vm725_vm6, %v1512_v11, %v1523_v12 }
 0x63c   : > { %1533 = vst.msk [vmem:[%s2102_s17 + $0x8] sm:$0xff] %vm731_vm7, %v1530_v6 }
 0x63d PF: > { %s19_s9 = sadd.s32 1, %s1955_s9   ;;  %s2431_s28 = sld [smem:[#allocation8_spill]] }
 0x63e   : > { %p16_p9 = scmp.ge.s32.totalorder %s19_s9, 6   ;;  %s2432_s11 = sld [smem:[#allocation9_spill]] }
 0x63f   : > { %s2433_s30 = sld [smem:[#allocation10_spill]]  ;;  %s2434_s27 = smov %s1947_s29 }
 0x640   :  { %18 = sbr.rel (!%p16_p9) target bundleno = 3 (0x3), region = 116 }
 0x644   : > { %s2435_s29 = smov %s2432_s11 }

// kernel: reversible_flow_forward.2
= control target key start
LH: loop header
LB: loop body
LE: loop exit
PB: predicated region body
PF: predicated region fallthrough
CT: control target
= control target key end

     0   :  { %s3534_s27 = smov 0   ;;  %s3536_s28 = smov 0   ;;  %s4742_s0 = inlined_call_operand.vmem [shape: f32[2,80,16], index: 0, kind: input, shape index: {}]   ;;  %s4743_s1 = inlined_call_operand.vmem [shape: bf16[2,72,32], index: 1, kind: input, shape index: {}]   ;;  %s4744_s2 = inlined_call_operand.vmem [shape: f32[2,1,32], index: 2, kind: input, shape index: {}]   ;;  %s4745_s3 = inlined_call_operand.vmem [shape: bf16[2,32,32], index: 3, kind: input, shape index: {}]   ;;  %s4746_s4 = inlined_call_operand.vmem [shape: f32[2,1,32], index: 4, kind: input, shape index: {}]   ;;  %s4747_s5 = inlined_call_operand.vmem [shape: bf16[2,32,144], index: 5, kind: input, shape index: {}]   ;;  %s4748_s6 = inlined_call_operand.vmem [shape: f32[2,1,16], index: 6, kind: input, shape index: {}]   ;;  %s4749_s7 = inlined_call_operand.vmem [shape: f32[2,80,16], index: 7, kind: output, shape index: {0}]   ;;  %s4750_s8 = inlined_call_operand.vmem [shape: f32[2,1,128], index: 8, kind: output, shape index: {1}]  }
   0x1   :  { %s3538_s29 = smov 0   ;;  %s3540_s30 = smov 0  }
   0x2   :  { %s3542_s9 = smov 0  }
   0x3 LB: > { %s28_s10 = sadd.s32 1, %s3460_s29  ;;  %s31_s11 = sadd.s32 1, %s3464_s30  ;;  %s3468_s9 = sphi %s3542_s9, %s19_s9   ;;  %s3464_s30 = sphi %s3540_s30, %s4777_s30   ;;  %s3460_s29 = sphi %s3538_s29, %s4776_s29   ;;  %s3456_s28 = sphi %s3536_s28, %s4775_s28   ;;  %s3452_s27 = sphi %s3534_s27, %s4774_s27  }
   0x4   : > { %p29_p0 = scmp.ge.s32.totalorder %s28_s10, 2  ;;  %p3034_p1 = scmp.ge.s32.totalorder %s3468_s9, 1 }
   0x5   : > { %p331_p2 = scmp.lt.s32.totalorder %s3468_s9, 5 }
   0x6   : > { %s4779_s10 = smov (%p29_p0, %s28_s10), 0  ;;  %s4781_s11 = smov (!%p29_p0, %s31_s11), %s3464_s30 }
   0x7   : > { %p332_p3 = pnand %p3034_p1, %p331_p2  ;;  %p33_p4 = scmp.ge.s32.totalorder %s4781_s11, 2 }
   0x8   : > { %p392_p5 = scmp.lt.s32.totalorder (!%p332_p3), %s3456_s28, 1  ;;  %p397_p6 = scmp.lt.s32.totalorder (!%p332_p3), %s3452_s27, 1 }
   0x9   : > { %s4783_s11 = smov (%p33_p4, %s4781_s11), 0  ;;  %335 = sbr.rel (%p332_p3) target bundleno = 1747 (0x6d3), region = 48 }
   0xa   : > { %p3062_p7 = scmp.ne.s32.totalorder (!%p332_p3), %s3452_s27, 0 }
   0xe   : > { %v430_v0 = vlaneseq  ;;  %s4785_s28 = smov (!%p392_p5, %s3456_s28), 1 }
   0xf   : > { %s3570_s12 = scalar_select %p397_p6, %s3452_s27, 1 }
  0x10   : > { %v431_v1 = vshrl.u32 %v430_v0, 7  ;;  %s3251_s13 = smul.u32 80, %s4785_s28 }
  0x11   : > { %s3252_s17 = smul.u32 36, %s3570_s12  ;;  %s3154_s24 = sshll.u32 %s3570_s12, 4 }
  0x12   : > { %v432_v2 = vadd.s32 8, %v431_v1  ;;  %v433_v3 = vadd.s32 16, %v431_v1  ;;  %v434_v4 = vadd.s32 24, %v431_v1  ;;  %v435_v5 = vadd.s32 32, %v431_v1  ;;  %s3587_s23 = scalar_lea.vmem %s4742_s0, %s3251_s13  ;;  %s3601_s19 = scalar_lea.vmem %s4745_s3, %s3154_s24 }
  0x13   : > { %v436_v6 = vadd.s32 40, %v431_v1  ;;  %v437_v7 = vadd.s32 48, %v431_v1  ;;  %v438_v8 = vadd.s32 56, %v431_v1  ;;  %v439_v9 = vadd.s32 64, %v431_v1  ;;  %s3596_s14 = scalar_lea.vmem %s4743_s1, %s3252_s17  ;;  %s3155_s20 = sshll.u32 %s3570_s12, 5 }
  0x14   : > { %v3590_v10 = vmul.u32.u64.low 3435973837, %v431_v1  ;;  %v3591_v11 = vmul.u32.u64.high 3435973837, %v431_v1, %v3590_v10  ;;  %v3603_v12 = vmul.u32.u64.low 3435973837, %v432_v2  ;;  %v3604_v13 = vmul.u32.u64.high 3435973837, %v432_v2, %v3603_v12  ;;  %s3623_s25 = scalar_lea.vmem %s4747_s5, %s3155_s20  ;;  %s420_s18 = scalar_lea.vmem %s4748_s6, %s3570_s12 }
  0x15   : > { %v3606_v14 = vmul.u32.u64.low 3435973837, %v433_v3  ;;  %v3607_v15 = vmul.u32.u64.high 3435973837, %v433_v3, %v3606_v14  ;;  %v3614_v16 = vmul.u32.u64.low 3435973837, %v434_v4  ;;  %v3615_v17 = vmul.u32.u64.high 3435973837, %v434_v4, %v3614_v16  ;;  %s3640_s16 = scalar_lea.vmem %s4749_s7, %s3251_s13  ;;  %s3471_s13 = smov (!%p3062_p7), 120  }
  0x16   : > { %v3617_v18 = vmul.u32.u64.low 3435973837, %v435_v5  ;;  %v3618_v19 = vmul.u32.u64.high 3435973837, %v435_v5, %v3617_v18  ;;  %v3629_v20 = vmul.u32.u64.low 3435973837, %v436_v6  ;;  %v3630_v21 = vmul.u32.u64.high 3435973837, %v436_v6, %v3629_v20 }
  0x17   : > { %v3632_v22 = vmul.u32.u64.low 3435973837, %v437_v7  ;;  %v3633_v23 = vmul.u32.u64.high 3435973837, %v437_v7, %v3632_v22  ;;  %v447_v24 = vshrl.u32 %v3591_v11, 3  ;;  %v458_v27 = vshrl.u32 %v3604_v13, 3 }
  0x18   : > { %v3643_v25 = vmul.u32.u64.low 3435973837, %v438_v8  ;;  %v3644_v26 = vmul.u32.u64.high 3435973837, %v438_v8, %v3643_v25  ;;  %v469_v28 = vshrl.u32 %v3607_v15, 3  ;;  %v440_v31 = vadd.s32 72, %v431_v1 }
  0x19   : > { %v3648_v29 = vmul.u32.u64.low 3435973837, %v439_v9  ;;  %v3649_v30 = vmul.u32.u64.high 3435973837, %v439_v9, %v3648_v29  ;;  %v448_v32 = vmul.u32 10, %v447_v24  ;;  %v480_v33 = vshrl.u32 %v3615_v17, 3 }
  0x1a   : > { %v491_v34 = vshrl.u32 %v3618_v19, 3  ;;  %v459_v35 = vmul.u32 10, %v458_v27  ;;  %v470_v36 = vmul.u32 10, %v469_v28  ;;  %v502_v37 = vshrl.u32 %v3630_v21, 3 }
  0x1b   : > { %v513_v38 = vshrl.u32 %v3633_v23, 3  ;;  %v449_v39 = vsub.s32 %v431_v1, %v448_v32  ;;  %v481_v40 = vmul.u32 10, %v480_v33  ;;  %v524_v42 = vshrl.u32 %v3644_v26, 3 }
  0x1c   : > { %v492_v41 = vmul.u32 10, %v491_v34  ;;  %v460_v43 = vsub.s32 %v432_v2, %v459_v35  ;;  %v471_v44 = vsub.s32 %v433_v3, %v470_v36  ;;  %v503_v45 = vmul.u32 10, %v502_v37 }
  0x1d   : > { %v514_v46 = vmul.u32 10, %v513_v38  ;;  %v482_v47 = vsub.s32 %v434_v4, %v481_v40  ;;  %v525_v49 = vmul.u32 10, %v524_v42  ;;  %v535_v50 = vshrl.u32 %v3649_v30, 3 }
  0x1e   : > { %v493_v48 = vsub.s32 %v435_v5, %v492_v41  ;;  %v504_v51 = vsub.s32 %v436_v6, %v503_v45  ;;  %v3657_v53 = vmul.u32.u64.low 3435973837, %v440_v31  ;;  %v3658_v54 = vmul.u32.u64.high 3435973837, %v440_v31, %v3657_v53 }
  0x1f   : > { %v515_v52 = vsub.s32 %v437_v7, %v514_v46  ;;  %v526_v55 = vsub.s32 %v438_v8, %v525_v49  ;;  %v536_v56 = vmul.u32 10, %v535_v50  ;;  %vm551_vm0 = vcmp.ne.s32.totalorder %v449_v39, 0 }
  0x20   : > { %vm552_vm1 = vcmp.ne.s32.totalorder %v460_v43, 0  ;;  %vm553_vm2 = vcmp.ne.s32.totalorder %v471_v44, 0  ;;  %vm561_vm8 = vcmp.lt.s32.totalorder %v449_v39, 0  ;;  %v546_v58 = vshrl.u32 %v3658_v54, 3 }
  0x21   : > { %v537_v57 = vsub.s32 %v439_v9, %v536_v56  ;;  %vm562_vm9 = vcmp.lt.s32.totalorder %v460_v43, 0  ;;  %vm563_vm10 = vcmp.lt.s32.totalorder %v471_v44, 0  ;;  %vm564_vm11 = vcmp.lt.s32.totalorder %v482_v47, 0  ;;  %vm3662_vm12 = vmand %vm561_vm8, %vm551_vm0 }
  0x22   : > { %vm565_vm14 = vcmp.lt.s32.totalorder %v493_v48, 0  ;;  %vm566_vm15 = vcmp.lt.s32.totalorder %v504_v51, 0  ;;  %vm567_vm3 = vcmp.lt.s32.totalorder %v515_v52, 0  ;;  %vm3667_vm5 = vmand %vm562_vm9, %vm552_vm1  ;;  %v547_v61 = vmul.u32 10, %v546_v58 }
  0x23   : > { %vm559_vm13 = vcmp.ne.s32.totalorder %v537_v57, 0  ;;  %vm568_vm7 = vcmp.lt.s32.totalorder %v526_v55, 0  ;;  %vm569_vm6 = vcmp.lt.s32.totalorder %v537_v57, 0  ;;  %vm3672_vm4 = vmand %vm563_vm10, %vm553_vm2  ;;  %v581_v63 = vadd.s32 10, %v449_v39 }
  0x24   : > { %vm4757_vm0 = vcmp.ne.s32.totalorder %v482_v47, 0  ;;  %v582_v1 = vadd.s32 10, %v460_v43  ;;  %v583_v2 = vadd.s32 10, %v471_v44  ;;  %v584_v3 = vadd.s32 10, %v482_v47 }
  0x25   : > { %vm3677_vm8 = vmand %vm564_vm11, %vm4757_vm0  ;;  %v585_v4 = vadd.s32 10, %v493_v48  ;;  %v548_v5 = vsub.s32 %v440_v31, %v547_v61  ;;  %vm4760_vm1 = vcmp.ne.s32.totalorder %v493_v48, 0  ;;  %v586_v7 = vadd.s32 10, %v504_v51 }
  0x26   : > { %vm3683_vm9 = vmand %vm565_vm14, %vm4760_vm1  ;;  %v587_v8 = vadd.s32 10, %v515_v52  ;;  %v588_v9 = vadd.s32 10, %v526_v55  ;;  %vm4763_vm2 = vcmp.ne.s32.totalorder %v504_v51, 0  ;;  %v589_v10 = vadd.s32 10, %v537_v57 }
  0x27   : > { %vm576_vm10 = vmand %vm566_vm15, %vm4763_vm2  ;;  %v591_v11 = vsel %vm3662_vm12, %v581_v63, %v449_v39  ;;  %v592_v12 = vsel %vm3667_vm5, %v582_v1, %v460_v43  ;;  %v593_v13 = vsel %vm3672_vm4, %v583_v2, %v471_v44  ;;  %vm570_vm14 = vcmp.lt.s32.totalorder %v548_v5, 0 }
  0x28   : > { %vm4764_vm0 = vcmp.ne.s32.totalorder %v515_v52, 0  ;;  %v590_v14 = vadd.s32 10, %v548_v5  ;;  %v594_v15 = vsel %vm3677_vm8, %v584_v3, %v482_v47  ;;  %vm4765_vm15 = vcmp.ne.s32.totalorder %v526_v55, 0  ;;  %vm579_vm4 = vmand %vm569_vm6, %vm559_vm13 }
  0x29   : > { %vm577_vm1 = vmand %vm567_vm3, %vm4764_vm0  ;;  %v595_v16 = vsel %vm3683_vm9, %v585_v4, %v493_v48  ;;  %v596_v17 = vsel %vm576_vm10, %v586_v7, %v504_v51  ;;  %vm601_vm5 = vcmp.lt.s32.totalorder %v591_v11, 8  ;;  %vm602_vm12 = vcmp.lt.s32.totalorder %v592_v12, 8 }
  0x2a   : > { %vm578_vm2 = vmand %vm568_vm7, %vm4765_vm15  ;;  %v597_v18 = vsel %vm577_vm1, %v587_v8, %v515_v52  ;;  %vm603_vm11 = vcmp.lt.s32.totalorder %v593_v13, 8  ;;  %vm604_vm3 = vcmp.lt.s32.totalorder %v594_v15, 8  ;;  %vm4766_vm0 = vcmp.ne.s32.totalorder %v548_v5, 0 }
  0x2b   : > { %v598_v19 = vsel %vm578_vm2, %v588_v9, %v526_v55  ;;  %vm580_vm8 = vmand %vm570_vm14, %vm4766_vm0  ;;  %v599_v20 = vsel %vm579_vm4, %v589_v10, %v537_v57  ;;  %vm605_vm7 = vcmp.lt.s32.totalorder %v595_v16, 8  ;;  %vm606_vm15 = vcmp.lt.s32.totalorder %v596_v17, 8 }
  0x2c   : > { %vm607_vm9 = vcmp.lt.s32.totalorder %v597_v18, 8  ;;  %v600_v21 = vsel %vm580_vm8, %v590_v14, %v548_v5  ;;  %vm608_vm10 = vcmp.lt.s32.totalorder %v598_v19, 8  ;;  %vm609_vm1 = vcmp.lt.s32.totalorder %v599_v20, 8 }
  0x2d   : > { %v3470_v22 = vmov 0.0   ;;  %vm610_vm6 = vcmp.lt.s32.totalorder %v600_v21, 8  ;;  %vm631_vm13 = vcmp.ge.s32.totalorder %v591_v11, 1  ;;  %vm633_vm14 = vcmp.ge.s32.totalorder %v593_v13, 1 }
  0x2e   : > { %v3707_v23 = vsel %vm601_vm5, 1.0, %v3470_v22  ;;  %v3710_v24 = vsel %vm602_vm12, 1.0, %v3470_v22  ;;  %v3713_v25 = vsel %vm603_vm11, 1.0, %v3470_v22  ;;  %v3716_v26 = vsel %vm604_vm3, 1.0, %v3470_v22 }
  0x2f   : > { %v3719_v27 = vsel %vm605_vm7, 1.0, %v3470_v22  ;;  %v3722_v28 = vsel %vm606_vm15, 1.0, %v3470_v22  ;;  %v3725_v29 = vsel %vm607_vm9, 1.0, %v3470_v22  ;;  %v3728_v30 = vsel %vm608_vm10, 1.0, %v3470_v22 }
  0x30   : > { %v3731_v31 = vsel %vm609_vm1, 1.0, %v3470_v22  ;;  %v3734_v32 = vsel %vm610_vm6, 1.0, %v3470_v22  ;;  %vm632_vm11 = vcmp.ge.s32.totalorder %v592_v12, 1  ;;  %vm641_vm2 = vcmp.le.s32.totalorder %v591_v11, 8 }
  0x31   : > { %vm642_vm5 = vcmp.le.s32.totalorder %v592_v12, 8  ;;  %vm643_vm4 = vcmp.le.s32.totalorder %v593_v13, 8  ;;  %vm634_vm12 = vcmp.ge.s32.totalorder %v594_v15, 1  ;;  %vm644_vm3 = vcmp.le.s32.totalorder %v594_v15, 8  ;;  %vm651_vm0 = vmand %vm631_vm13, %vm641_vm2 }
  0x32   : > { %vm635_vm8 = vcmp.ge.s32.totalorder %v595_v16, 1  ;;  %vm645_vm7 = vcmp.le.s32.totalorder %v595_v16, 8  ;;  %vm652_vm15 = vmand %vm632_vm11, %vm642_vm5  ;;  %v3737_v33 = vsel %vm651_vm0, 1.0, %v3470_v22  ;;  %vm636_vm9 = vcmp.ge.s32.totalorder %v596_v17, 1 }
  0x33   : > { %vm646_vm10 = vcmp.le.s32.totalorder %v596_v17, 8  ;;  %vm653_vm1 = vmand %vm633_vm14, %vm643_vm4  ;;  %v3740_v34 = vsel %vm652_vm15, 1.0, %v3470_v22  ;;  %vm637_vm6 = vcmp.ge.s32.totalorder %v597_v18, 1  ;;  %vm647_vm2 = vcmp.le.s32.totalorder %v597_v18, 8 }
  0x34   : > { %vm654_vm13 = vmand %vm634_vm12, %vm644_vm3  ;;  %v3743_v35 = vsel %vm653_vm1, 1.0, %v3470_v22  ;;  %vm638_vm5 = vcmp.ge.s32.totalorder %v598_v19, 1  ;;  %vm648_vm11 = vcmp.le.s32.totalorder %v598_v19, 8  ;;  %vm639_vm4 = vcmp.ge.s32.totalorder %v599_v20, 1 }
  0x35   : > { %vm655_vm0 = vmand %vm635_vm8, %vm645_vm7  ;;  %v3746_v36 = vsel %vm654_vm13, 1.0, %v3470_v22  ;;  %vm649_vm14 = vcmp.le.s32.totalorder %v599_v20, 8  ;;  %vm640_vm3 = vcmp.ge.s32.totalorder %v600_v21, 1  ;;  %vm650_vm12 = vcmp.le.s32.totalorder %v600_v21, 8 }
  0x36   : > { %vm656_vm15 = vmand %vm636_vm9, %vm646_vm10  ;;  %v3749_v37 = vsel %vm655_vm0, 1.0, %v3470_v22 }
  0x37   : > { %vm657_vm1 = vmand %vm637_vm6, %vm647_vm2  ;;  %v3752_v38 = vsel %vm656_vm15, 1.0, %v3470_v22  ;;  %684 = sbr.rel (%p3062_p7) target bundleno = 193 (0xc1), region = 52 }
  0x38   : > { %vm658_vm7 = vmand %vm638_vm5, %vm648_vm11  ;;  %v3755_v39 = vsel %vm657_vm1, 1.0, %v3470_v22 }
  0x39   : > { %vm659_vm8 = vmand %vm639_vm4, %vm649_vm14  ;;  %v3758_v40 = vsel %vm658_vm7, 1.0, %v3470_v22 }
  0x3a   : > { %vm660_vm13 = vmand %vm640_vm3, %vm650_vm12  ;;  %v3761_v41 = vsel %vm659_vm8, 1.0, %v3470_v22 }
  0x3b   : > { %v3764_v42 = vsel %vm660_vm13, 1.0, %v3470_v22 }
  0x3c   : > { %v687_v43 = vld [vmem:[%s3587_s23 + $0x10] sm:$0xff]  ;;  %vm695_vm9 = vcmask 64512   ;;  %v685_v44 = vld [vmem:[%s3587_s23] sm:$0xff]  ;;  %v688_v45 = vld [vmem:[%s3587_s23 + $0x18] sm:$0xff]  ;;  %vm757_vm10 = vcmask 60416   ;;  %vm759_vm6 = vcmask 57344  }
  0x3d   : > { %720 = vrot.lane.b32.xlu1 %v687_v43, %s3471_s13  ;;  %698 = vst.msk [vmem:[#allocation2 + $0x10] sm:$0xff] %vm695_vm9, %v687_v43  ;;  %716 = vrot.lane.b32.xlu0 %v685_v44, %s3471_s13  ;;  %696 = vst.msk [vmem:[#allocation2] sm:$0xff] %vm695_vm9, %v685_v44  ;;  %v686_v46 = vld [vmem:[%s3587_s23 + $0x8] sm:$0xff]  ;;  %v689_v48 = vld [vmem:[%s3587_s23 + $0x20] sm:$0xff]  ;;  %v3472_v53 = vmov 0.0   ;;  %v3473_v54 = vmov 0  }
  0x3e   : > { %699 = vst.msk [vmem:[#allocation2 + $0x18] sm:$0xff] %vm695_vm9, %v688_v45  ;;  %v690_v47 = vld [vmem:[%s3587_s23 + $0x28] sm:$0xff]  ;;  %697 = vst.msk [vmem:[#allocation2 + $0x8] sm:$0xff] %vm695_vm9, %v686_v46  ;;  %v692_v49 = vld [vmem:[%s3587_s23 + $0x38] sm:$0xff]  ;;  %vm761_vm2 = vcmask 60417   ;;  %vm766_vm5 = vcmask 257024  }
  0x3f   : > { %701 = vst.msk [vmem:[#allocation2 + $0x28] sm:$0xff] %vm695_vm9, %v690_v47  ;;  %v691_v50 = vld [vmem:[%s3587_s23 + $0x30] sm:$0xff]  ;;  %700 = vst.msk [vmem:[#allocation2 + $0x20] sm:$0xff] %vm695_vm9, %v689_v48  ;;  %v694_v51 = vld [vmem:[%s3587_s23 + $0x48] sm:$0xff]  ;;  %vm768_vm11 = vcmask 254976   ;;  %vm770_vm0 = vcmask 257026  }
  0x40   : > { %703 = vst.msk [vmem:[#allocation2 + $0x38] sm:$0xff] %vm695_vm9, %v692_v49  ;;  %702 = vst.msk [vmem:[#allocation2 + $0x30] sm:$0xff] %vm695_vm9, %v691_v50  ;;  %v693_v52 = vld [vmem:[%s3587_s23 + $0x40] sm:$0xff] }
  0x41   : > { %705 = vst.msk [vmem:[#allocation2 + $0x48] sm:$0xff] %vm695_vm9, %v694_v51  ;;  %704 = vst.msk [vmem:[#allocation2 + $0x40] sm:$0xff] %vm695_vm9, %v693_v52  ;;  %722 = vrot.lane.b32.xlu1 %v688_v45, %s3471_s13  ;;  %718 = vrot.lane.b32.xlu0 %v686_v46, %s3471_s13 }
  0x42   : > { %756 = vst [vmem:[#allocation7] sm:$0x1] %v3472_v53  ;;  %758 = vst.msk [vmem:[#allocation4] sm:$0xf] %vm757_vm10, %v3473_v54 }
  0x43   : > { %760 = vst.msk [vmem:[#allocation4 + $0x4] sm:$0x1] %vm759_vm6, %v3473_v54 }
  0x44   : > { %763 = vst.msk [vmem:[#allocation4 + $0x30] sm:$0xf] %vm757_vm10, %v3473_v54 }
  0x45   : > { %762 = vst.msk [vmem:[#allocation4 + $0x2c] sm:$0xe] %vm761_vm2, %v3473_v54  ;;  %726 = vrot.lane.b32.xlu1 %v690_v47, %s3471_s13  ;;  %724 = vrot.lane.b32.xlu0 %v689_v48, %s3471_s13 }
  0x46   : > { %767 = vst.msk [vmem:[#allocation5] sm:$0xf] %vm766_vm5, %v3473_v54  ;;  %772 = vst.msk [vmem:[#allocation5 + $0x30] sm:$0xf] %vm766_vm5, %v3473_v54 }
  0x47   : > { %769 = vst.msk [vmem:[#allocation5 + $0x4] sm:$0x3] %vm768_vm11, %v3473_v54 }
  0x48   : > { %771 = vst.msk [vmem:[#allocation5 + $0x2c] sm:$0xc] %vm770_vm0, %v3473_v54 }
  0x49   : > { %730 = vrot.lane.b32.xlu1 %v692_v49, %s3471_s13  ;;  %728 = vrot.lane.b32.xlu0 %v691_v50, %s3471_s13 }
  0x4d   : > { %734 = vrot.lane.b32.xlu1 %v694_v51, %s3471_s13  ;;  %732 = vrot.lane.b32.xlu0 %v693_v52, %s3471_s13 }
  0xaf   : > { %v721_v55 = vpop.permute.xlu1 %720  ;;  %v717_v56 = vpop.permute.xlu0 %716 }
  0xb0   : > { %748 = vst.msk [vmem:[#allocation3 + $0x10] sm:$0xff] %vm695_vm9, %v721_v55  ;;  %746 = vst.msk [vmem:[#allocation3] sm:$0xff] %vm695_vm9, %v717_v56 }
  0xb3   : > { %v723_v57 = vpop.permute.xlu1 %722  ;;  %v719_v58 = vpop.permute.xlu0 %718 }
  0xb4   : > { %749 = vst.msk [vmem:[#allocation3 + $0x18] sm:$0xff] %vm695_vm9, %v723_v57  ;;  %747 = vst.msk [vmem:[#allocation3 + $0x8] sm:$0xff] %vm695_vm9, %v719_v58 }
  0xb7   : > { %v727_v59 = vpop.permute.xlu1 %726  ;;  %v725_v60 = vpop.permute.xlu0 %724 }
  0xb8   : > { %751 = vst.msk [vmem:[#allocation3 + $0x28] sm:$0xff] %vm695_vm9, %v727_v59  ;;  %750 = vst.msk [vmem:[#allocation3 + $0x20] sm:$0xff] %vm695_vm9, %v725_v60 }
  0xbb   : > { %v731_v61 = vpop.permute.xlu1 %730  ;;  %v729_v62 = vpop.permute.xlu0 %728 }
  0xbc   : > { %753 = vst.msk [vmem:[#allocation3 + $0x38] sm:$0xff] %vm695_vm9, %v731_v61  ;;  %752 = vst.msk [vmem:[#allocation3 + $0x30] sm:$0xff] %vm695_vm9, %v729_v62 }
  0xbf   : > { %v735_v63 = vpop.permute.xlu1 %734  ;;  %v733_v0 = vpop.permute.xlu0 %732 }
  0xc0   : > { %755 = vst.msk [vmem:[#allocation3 + $0x48] sm:$0xff] %vm695_vm9, %v735_v63  ;;  %754 = vst.msk [vmem:[#allocation3 + $0x40] sm:$0xff] %vm695_vm9, %v733_v0 }
  0xc1 PF: > { %v775_v1 = vld [vmem:[#allocation3] sm:$0xff]  ;;  %v776_v2 = vld [vmem:[#allocation3 + $0x8] sm:$0xff]  ;;  %v777_v3 = vld [vmem:[#allocation3 + $0x10] sm:$0xff]  ;;  %vm815_vm4 = vcmask 1040384   ;;  %3193 = vmatprep.subr.bf16.mxu0 %v3470_v22  ;;  %3247 = vmatprep.subr.bf16.mxu1 %v3470_v22  ;;  %vm816_vm14 = vcmask 1044484   ;;  %vm858_vm15 = vcmask 60417   ;;  %s4769_s13 = scalar_lea.vmem %s4744_s2, %s3570_s12 }
  0xc2   : > { %v778_v4 = vld [vmem:[#allocation3 + $0x18] sm:$0xff]  ;;  %v779_v5 = vld [vmem:[#allocation3 + $0x20] sm:$0xff]  ;;  %v3156_v6 = vpack.c.bf16 %v775_v1, %v775_v1  ;;  %v3157_v7 = vpack.c.bf16 %v776_v2, %v776_v2  ;;  %v3158_v8 = vpack.c.bf16 %v777_v3, %v777_v3  ;;  %vm3810_vm3 = vmor %vm815_vm4, %vm816_vm14  ;;  %vm860_vm12 = vcmask 60416   ;;  %s3474_s20 = smov 24   ;;  %s3475_s23 = smov 16  }
  0xc3   : > { %v3159_v9 = vpack.c.bf16 %v778_v4, %v778_v4  ;;  %v3160_v10 = vpack.c.bf16 %v779_v5, %v779_v5  ;;  %v780_v17 = vld [vmem:[#allocation3 + $0x28] sm:$0xff]  ;;  %v781_v18 = vld [vmem:[#allocation3 + $0x30] sm:$0xff]  ;;  %v782_v47 = vld [vmem:[#allocation3 + $0x38] sm:$0xff]  ;;  %vm980_vm1 = vcmask 1046528   ;;  %vm1105_vm7 = vcmask 1045504   ;;  %s3476_s17 = smov 48  }
  0xc4   : > { %v818_v11 = vrot.slane %v3156_v6, 7  ;;  %v820_v12 = vrot.slane %v3157_v7, 7  ;;  %v823_v13 = vrot.slane %v3158_v8, 7  ;;  %v3161_v43 = vpack.c.bf16 %v780_v17, %v780_v17  ;;  %v883_v59 = vld [vmem:[#allocation4] sm:$0xe]  ;;  %s3477_s24 = smov 40  }
  0xc5   : > { %v826_v15 = vrot.slane %v3159_v9, 7  ;;  %v829_v16 = vrot.slane %v3160_v10, 7  ;;  %v3162_v45 = vpack.c.bf16 %v781_v18, %v781_v18  ;;  %v3163_v57 = vpack.c.bf16 %v782_v47, %v782_v47  ;;  %v872_v1 = vld [vmem:[#allocation4] sm:$0xf]  ;;  %s3478_s26 = smov 64   ;;  %s3479_s15 = smov 8  }
  0xc6   : > { %v819_v19 = vrot.slane %v818_v11, 4  ;;  %v822_v20 = vrot.slane %v820_v12, 4  ;;  %v825_v21 = vrot.slane %v823_v13, 4  ;;  %859 = vst.msk [vmem:[#allocation4 + $0x4] sm:$0xe] %vm858_vm15, %v818_v11  ;;  %v832_v52 = vrot.slane %v3161_v43, 7 }
  0xc7   : > { %v828_v44 = vrot.slane %v826_v15, 4  ;;  %v831_v46 = vrot.slane %v829_v16, 4  ;;  %v783_v48 = vld [vmem:[#allocation3 + $0x40] sm:$0xff]  ;;  %v835_v54 = vrot.slane %v3162_v45, 7  ;;  %v838_v62 = vrot.slane %v3163_v57, 7  ;;  %s3480_s21 = smov 32  }
  0xc8   : > { %v821_v49 = vsel %vm3810_vm3, %v819_v19, %v820_v12  ;;  %v824_v50 = vsel %vm3810_vm3, %v822_v20, %v823_v13  ;;  %v827_v51 = vsel %vm3810_vm3, %v825_v21, %v826_v15  ;;  %v834_v56 = vrot.slane %v832_v52, 4  ;;  %s3481_s22 = smov 56   ;;  %p3151_p8 = scmp.ne.s32.totalorder %s3452_s27, 1 }
  0xc9   : > { %v830_v53 = vsel %vm3810_vm3, %v828_v44, %v829_v16  ;;  %861 = vst.msk [vmem:[#allocation4 + $0x8] sm:$0xf] %vm860_vm12, %v821_v49  ;;  %862 = vst.msk [vmem:[#allocation4 + $0xc] sm:$0xf] %vm860_vm12, %v824_v50  ;;  %v833_v55 = vsel %vm3810_vm3, %v831_v46, %v832_v52  ;;  %v3164_v58 = vpack.c.bf16 %v783_v48, %v783_v48  ;;  %v837_v60 = vrot.slane %v835_v54, 4 }
  0xca   : > { %863 = vst.msk [vmem:[#allocation4 + $0x10] sm:$0xf] %vm860_vm12, %v827_v51  ;;  %864 = vst.msk [vmem:[#allocation4 + $0x14] sm:$0xf] %vm860_vm12, %v830_v53  ;;  %v836_v61 = vsel %vm3810_vm3, %v834_v56, %v835_v54  ;;  %v840_v5 = vrot.slane %v838_v62, 4  ;;  %vm1212_vm8 = vcmask 1044480  }
  0xcb   : > { %865 = vst.msk [vmem:[#allocation4 + $0x18] sm:$0xf] %vm860_vm12, %v833_v55  ;;  %v3831_v63 = vrot.slane %v3164_v58, 7  ;;  %866 = vst.msk [vmem:[#allocation4 + $0x1c] sm:$0xf] %vm860_vm12, %v836_v61  ;;  %v839_v4 = vsel %vm3810_vm3, %v837_v60, %v838_v62  ;;  %vm870_vm6 = vcmask 57344  }
  0xcc   : > { %867 = vst.msk [vmem:[#allocation4 + $0x20] sm:$0xf] %vm860_vm12, %v839_v4  ;;  %vm922_vm13 = vsmask.f32 7424  ;;  %vm1038_vm9 = vsmask.f32 6400 }
  0xcd   : > { %v884_v0 = vld [vmem:[#allocation4 + $0x4] sm:$0xe]  ;;  %v842_v10 = vsel %vm3810_vm3, %v840_v5, %v3831_v63  ;;  %vm1160_vm10 = vsmask.f32 5376  ;;  %vm1376_vm2 = vcmask 1043456   ;;  %vm3482_vm5 = vmmov 0  }
  0xce   : > { %v873_v2 = vld [vmem:[#allocation4 + $0x4] sm:$0xf]  ;;  %868 = vst.msk [vmem:[#allocation4 + $0x24] sm:$0xf] %vm860_vm12, %v842_v10  ;;  %3203 = vmatprep.mubr.msk.bf16.mxu0 %vm3482_vm5, %v3470_v22  ;;  %3235 = vmatprep.mubr.msk.bf16.mxu1 %vm3482_vm5, %v3470_v22  ;;  %vm1234_vm11 = vcmask 64512   ;;  %vm1245_vm0 = vcmask 130048  }
  0xcf   : > { %v3079_v3 = vcombine.low %v883_v59, %v873_v2  ;;  %v888_v6 = vld [vmem:[#allocation4 + $0x4] sm:$0xc]  ;;  %v3849_v19 = vcombine.low %v872_v1, %v873_v2  ;;  %vm1256_vm4 = vcmask 195584   ;;  %vm1267_vm14 = vcmask 261120  }
  0xd0   : > { %v874_v7 = vld [vmem:[#allocation4 + $0x8] sm:$0xf]  ;;  %v875_v8 = vld [vmem:[#allocation4 + $0xc] sm:$0xf]  ;;  %vm1278_vm15 = vcmask 326656  }
  0xd1   : > { %v876_v9 = vld [vmem:[#allocation4 + $0x10] sm:$0xf]  ;;  %v877_v11 = vld [vmem:[#allocation4 + $0x14] sm:$0xf]  ;;  %v3840_v12 = vcombine.low %v884_v0, %v874_v7  ;;  %v3844_v15 = vcombine.low %v874_v7, %v875_v8  ;;  %v981_v16 = vrot.slane %v3079_v3, 1  ;;  %v3087_v21 = vcombine.low %v888_v6, %v874_v7 }
  0xd2   : > { %v3842_v13 = vcombine.low %v875_v8, %v876_v9  ;;  %v889_v17 = vld [vmem:[#allocation4 + $0x8] sm:$0xc]  ;;  %v3847_v18 = vcombine.low %v876_v9, %v877_v11  ;;  %v878_v44 = vld [vmem:[#allocation4 + $0x18] sm:$0xf]  ;;  %v3859_v53 = vld [vmem:[#allocation4 + $0x1c] sm:$0xf] }
  0xd3   : > { %v3851_v20 = vcombine.low %v889_v17, %v875_v8  ;;  %v893_v43 = vld [vmem:[#allocation4 + $0x8] sm:$0x8]  ;;  %v1014_v45 = vrot.slane %v3840_v12, 1  ;;  %v982_v47 = vrot.slane %v3844_v15, 1  ;;  %v1106_v51 = vrot.slane %v3087_v21, 2 }
  0xd4   : > { %v1015_v46 = vrot.slane %v3842_v13, 1  ;;  %v1107_v48 = vrot.slane %v3842_v13, 2  ;;  %v1137_v50 = vrot.slane %v3847_v18, 2  ;;  %v3092_v52 = vcombine.low %v893_v43, %v875_v8 }
  0xd5   : > { %v1136_v49 = vrot.slane %v3851_v20, 2  ;;  %v983_v55 = vsel %vm980_vm1, %v981_v16, %v982_v47  ;;  %v1214_v57 = vrot.slane %v3847_v18, 3  ;;  %v3867_v58 = vcombine.low %v878_v44, %v3859_v53 }
  0xd6   : > { %v1016_v54 = vsel %vm980_vm1, %v1014_v45, %v1015_v46  ;;  %992 = vrot.lane.b32.xlu0 %v983_v55, %s3475_s23  ;;  %v1213_v56 = vrot.slane %v3092_v52, 3  ;;  %v3869_v59 = vcombine.low %v877_v11, %v878_v44  ;;  %v1108_v61 = vsel %vm1105_vm7, %v1106_v51, %v1107_v48  ;;  %v784_v55 = vld [vmem:[#allocation3 + $0x48] sm:$0xff] }
  0xd7   : > { %1025 = vrot.lane.b32.xlu1 %v1016_v54, %s3474_s20  ;;  %v1138_v60 = vsel %vm1105_vm7, %v1136_v49, %v1137_v50  ;;  %v926_v62 = vshll.u32 %v3849_v19, 16  ;;  %v984_v1 = vrot.slane %v3847_v18, 1  ;;  %v924_v2 = vshrl.u32 %v3849_v19, 16 }
  0xd8   : > { %v1017_v0 = vrot.slane %v3869_v59, 1  ;;  %v1109_v3 = vrot.slane %v3869_v59, 2  ;;  %v931_v5 = vshll.u32 %v3844_v15, 16  ;;  %v1040_v6 = vshrl.u32 %v3840_v12, 16 }
  0xd9   : > { %v928_v4 = vrot.slane %v926_v62, 1  ;;  %v1215_v7 = vsel %vm1212_vm8, %v1213_v56, %v1214_v57  ;;  %v1139_v8 = vrot.slane %v3867_v58, 2  ;;  %v1043_v9 = vshll.u32 %v3840_v12, 16 }
  0xda   : > { %1117 = vrot.lane.b32.xlu0 %v1108_v61, %s3477_s24  ;;  %v1018_v10 = vsel %vm980_vm1, %v1015_v46, %v1017_v0  ;;  %v1048_v11 = vshrl.u32 %v3842_v13, 16  ;;  %v1051_v16 = vshll.u32 %v3842_v13, 16  ;;  %v939_v17 = vshll.u32 %v3847_v18, 16 }
  0xdb   : > { %1147 = vrot.lane.b32.xlu1 %v1138_v60, %s3476_s17  ;;  %v985_v21 = vsel %vm980_vm1, %v982_v47, %v984_v1  ;;  %v943_v43 = vshrl.u32 %v3847_v18, 16  ;;  %v1162_v44 = vshrl.u32 %v3851_v20, 16  ;;  %v1165_v12 = vshll.u32 %v3851_v20, 16 }
  0xdc   : > { %v1110_v45 = vsel %vm1105_vm7, %v1107_v48, %v1109_v3  ;;  %v929_v46 = vor.u32 %v928_v4, %v924_v2  ;;  %v933_v49 = vrot.slane %v931_v5, 1  ;;  %v1042_v51 = vrot.slane %v1040_v6, 1 }
  0xdd   : > { %v1045_v13 = vrot.slane %v1043_v9, 2  ;;  %v1050_v47 = vrot.slane %v1048_v11, 1  ;;  %v1053_v52 = vrot.slane %v1051_v16, 2  ;;  %v1170_v54 = vrot.slane %v939_v17, 3 }
  0xde   : > { %1027 = vrot.lane.b32.xlu0 %v1018_v10, %s3474_s20  ;;  %v1164_v56 = vrot.slane %v1162_v44, 2  ;;  %v1167_v60 = vrot.slane %v1165_v12, 3  ;;  %v1169_v20 = vrot.slane %v943_v43, 2  ;;  %v1057_v48 = vshrl.u32 %v3869_v59, 16 }
  0xdf   : > { %1224 = vrot.lane.b32.xlu1 %v1215_v7, %s3478_s26  ;;  %v1060_v61 = vshll.u32 %v3869_v59, 16  ;;  %v1140_v62 = vsel %vm1105_vm7, %v1137_v50, %v1139_v8  ;;  %v934_v2 = vsel %vm922_vm13, %v929_v46, %v933_v49  ;;  %v935_v4 = vshrl.u32 %v3844_v15, 16  ;;  %v880_v50 = vld [vmem:[#allocation4 + $0x20] sm:$0xf] }
  0xe0   : > { %v3165_v5 = vpack.c.bf16 %v784_v55, %v784_v55  ;;  %v1059_v6 = vrot.slane %v1057_v48, 1  ;;  %v947_v9 = vshll.u32 %v3867_v58, 16  ;;  %v951_v10 = vshrl.u32 %v3867_v58, 16  ;;  %v881_v48 = vld [vmem:[#allocation4 + $0x24] sm:$0xf] }
  0xe1   : > { %v1062_v7 = vrot.slane %v1060_v61, 2  ;;  %v1046_v11 = vor.u32 %v1045_v13, %v1042_v51  ;;  %v1054_v16 = vor.u32 %v1053_v52, %v1050_v47  ;;  %v1168_v44 = vor.u32 %v1167_v60, %v1164_v56 }
  0xe2   : > { %1119 = vrot.lane.b32.xlu0 %v1110_v45, %s3477_s24  ;;  %v1171_v12 = vor.u32 %v1170_v54, %v1169_v20  ;;  %v941_v46 = vrot.slane %v939_v17, 1  ;;  %v843_v55 = vrot.slane %v3831_v63, 4  ;;  %v1173_v51 = vrot.slane %v951_v10, 2  ;;  %v3350_v20 = vld [vmem:[%s3596_s14 + $0x20] ss:$0 sps:$4 sm:$0xff]  }
  0xe3   : > { %994 = vrot.lane.b32.xlu1 %v985_v21, %s3475_s23  ;;  %v937_v21 = vor.u32 %v935_v4, %v933_v49  ;;  %v1063_v45 = vor.u32 %v1062_v7, %v1059_v6  ;;  %v1174_v13 = vrot.slane %v947_v9, 3  ;;  %v1055_v47 = vsel %vm1038_vm9, %v1046_v11, %v1054_v16 }
  0xe4   : > { %v1172_v52 = vsel %vm1160_vm10, %v1168_v44, %v1171_v12  ;;  %v3925_v17 = vcombine.low %v3859_v53, %v880_v50  ;;  %v844_v63 = vrot.slane %v3165_v5, 7  ;;  %v1216_v60 = vrot.slane %v3867_v58, 3 }
  0xe5   : > { %v942_v49 = vsel %vm922_vm13, %v937_v21, %v941_v46  ;;  %v1064_v54 = vsel %vm1038_vm9, %v1054_v16, %v1063_v45  ;;  %v3931_v56 = vor.u32 %v1174_v13, %v1173_v51  ;;  %v945_v4 = vor.u32 %v943_v43, %v941_v46  ;;  %v3351_v46 = vld [vmem:[%s3596_s14 + $0x18] sm:$0xff]   ;;  %v3352_v51 = vld [vmem:[%s3596_s14 + $0x10] sm:$0xff]  }
  0xe6   : > { %967 = vrot.lane.b32.xlu0 %v934_v2, %s3479_s15  ;;  %v1066_v53 = vshrl.u32 %v3925_v17, 16  ;;  %v1069_v61 = vshll.u32 %v3925_v17, 16  ;;  %v846_v2 = vrot.slane %v844_v63, 4  ;;  %v1217_v14 = vsel %vm1212_vm8, %v1214_v57, %v1216_v60 }
  0xe7   : > { %1149 = vrot.lane.b32.xlu1 %v1140_v62, %s3476_s17  ;;  %v845_v62 = vsel %vm3810_vm3, %v843_v55, %v844_v63  ;;  %v949_v5 = vrot.slane %v947_v9, 1  ;;  %v3950_v6 = vcombine.low %v880_v50, %v881_v48  ;;  %v1378_v7 = vsel %vm1376_vm2, %v3350_v20, 0 }
  0xe8   : > { %869 = vst.msk [vmem:[#allocation4 + $0x28] sm:$0xf] %vm860_vm12, %v845_v62  ;;  %v1176_v43 = vsel %vm1160_vm10, %v1171_v12, %v3931_v56  ;;  %v986_v11 = vrot.slane %v3867_v58, 1  ;;  %v1068_v16 = vrot.slane %v1066_v53, 1  ;;  %v1071_v44 = vrot.slane %v1069_v61, 2  ;;  %3194 = vmatpush3.bf16.msra.mxu0 %v1378_v7  ;;  %v3353_v53 = vld [vmem:[%s3596_s14 + $0x8] sm:$0xff]  }
  0xe9   : > { %871 = vst.msk [vmem:[#allocation4 + $0x2c] sm:$0x1] %vm870_vm6, %v846_v2  ;;  %3195 = vmatprep.subr.bf16.mxu0 %v3470_v22  ;;  %v950_v57 = vsel %vm922_vm13, %v945_v4, %v949_v5  ;;  %v955_v9 = vshll.u32 %v3950_v6, 16  ;;  %v1019_v50 = vrot.slane %v3925_v17, 1  ;;  %v959_v21 = vshrl.u32 %v3950_v6, 16  ;;  %v3354_v2 = vld [vmem:[%s3596_s14] sm:$0xff]  }
  0xea   : > { %1199 = vrot.lane.b32.xlu0 %v1172_v52, %s3481_s22  ;;  %v987_v12 = vsel %vm980_vm1, %v984_v1, %v986_v11  ;;  %v1072_v55 = vor.u32 %v1071_v44, %v1068_v16  ;;  %v1141_v52 = vrot.slane %v3950_v6, 2  ;;  %vm1289_vm3 = vcmask 392192   ;;  %s3486_s14 = smov 80  }
  0xeb   : > { %1092 = vrot.lane.b32.xlu1 %v1055_v47, %s3480_s21  ;;  %v1111_v47 = vrot.slane %v3925_v17, 2  ;;  %v1178_v1 = vrot.slane %v955_v9, 3  ;;  %v1020_v63 = vsel %vm980_vm1, %v1017_v0, %v1019_v50  ;;  %v1218_v17 = vrot.slane %v3950_v6, 3 }
  0xec   : > { %3196 = vmatpush3.bf16.msra.mxu0 %v3351_v46  ;;  %v1142_v0 = vsel %vm1105_vm7, %v1139_v8, %v1141_v52  ;;  %v957_v8 = vrot.slane %v955_v9, 1  ;;  %vm1300_vm12 = vcmask 457728  }
  0xed   : > { %3197 = vmatprep.subr.bf16.mxu0 %v3470_v22  ;;  %v1219_v59 = vsel %vm1212_vm8, %v1216_v60, %v1218_v17 }
  0xee   : > { %969 = vrot.lane.b32.xlu0 %v942_v49, %s3479_s15  ;;  %v1073_v49 = vsel %vm1038_vm9, %v1063_v45, %v1072_v55  ;;  %v1112_v45 = vsel %vm1105_vm7, %v1109_v3, %v1111_v47  ;;  %v953_v3 = vor.u32 %v951_v10, %v949_v5 }
  0xef   : > { %1094 = vrot.lane.b32.xlu1 %v1064_v54, %s3480_s21  ;;  %v885_v13 = vld [vmem:[#allocation4 + $0x28] sm:$0xf]  ;;  %v1177_v54 = vrot.slane %v959_v21, 2 }
  0xf0   : > { %v3983_v20 = vcombine.low %v881_v48, %v885_v13  ;;  %3198 = vmatpush3.bf16.msra.mxu0 %v3352_v51  ;;  %v890_v4 = vld [vmem:[#allocation4 + $0x2c] sm:$0xf]  ;;  %v958_v60 = vsel %vm922_vm13, %v953_v3, %v957_v8  ;;  %v3345_v51 = vld [vmem:[#allocation4 + $0x28] ss:$0 sps:$4 sm:$0x11]  }
  0xf1   : > { %3199 = vmatprep.subr.bf16.mxu0 %v3470_v22  ;;  %v1179_v48 = vor.u32 %v1178_v1, %v1177_v54  ;;  %v4010_v44 = vcombine.low %v885_v13, %v890_v4  ;;  %v3349_v4 = vld [vmem:[#allocation4 + $0x30] ss:$0 sps:$4 sm:$0x77]  }
  0xf2   : > { %1201 = vrot.lane.b32.xlu0 %v1176_v43, %s3481_s22  ;;  %v1075_v61 = vshrl.u32 %v3983_v20, 16  ;;  %v1078_v62 = vshll.u32 %v3983_v20, 16  ;;  %v1021_v5 = vrot.slane %v3983_v20, 1  ;;  %v1113_v9 = vrot.slane %v3983_v20, 2 }
  0xf3   : > { %1226 = vrot.lane.b32.xlu1 %v1217_v14, %s3478_s26  ;;  %v988_v14 = vrot.slane %v3950_v6, 1  ;;  %v1180_v7 = vsel %vm1160_vm10, %v3931_v56, %v1179_v48  ;;  %v1182_v56 = vshrl.u32 %v4010_v44, 16  ;;  %v1220_v20 = vrot.slane %v4010_v44, 3 }
  0xf4   : > { %3200 = vmatpush3.bf16.msra.mxu0 %v3353_v53  ;;  %v1077_v43 = vrot.slane %v1075_v61, 1  ;;  %v1080_v16 = vrot.slane %v1078_v62, 2  ;;  %v1022_v13 = vsel %vm980_vm1, %v1019_v50, %v1021_v5  ;;  %v1114_v54 = vsel %vm1105_vm7, %v1111_v47, %v1113_v9 }
  0xf5   : > { %3201 = vmatprep.subr.bf16.mxu0 %v3470_v22  ;;  %v989_v10 = vsel %vm980_vm1, %v986_v11, %v988_v14  ;;  %v1184_v1 = vrot.slane %v1182_v56, 2  ;;  %v1221_v50 = vsel %vm1212_vm8, %v1218_v17, %v1220_v20 }
  0xf6   : > { %971 = vrot.lane.b32.xlu0 %v950_v57, %s3479_s15  ;;  %v1081_v46 = vor.u32 %v1080_v16, %v1077_v43  ;;  %v1185_v57 = vshll.u32 %v4010_v44, 16  ;;  %v3348_v43 = vld [vmem:[#allocation4 + $0x30] ss:$0 sps:$4 sm:$0x33]   ;;  %v1191_v16 = vshrl.u32 %v3349_v4, 16 }
  0xf7   : > { %996 = vrot.lane.b32.xlu1 %v987_v12, %s3475_s23  ;;  %v1143_v12 = vrot.slane %v4010_v44, 2  ;;  %v1194_v44 = vshll.u32 %v3349_v4, 16 }
  0xf8   : > { %3202 = vmatpush3.bf16.msra.mxu0 %v3354_v2  ;;  %v1082_v11 = vsel %vm1038_vm9, %v1072_v55, %v1081_v46  ;;  %v961_v55 = vor.u32 %v959_v21, %v957_v8  ;;  %v990_v2 = vrot.slane %v3345_v51, 1 }
  0xf9   : > { %3223 = vmatprep.subr.bf16.mxu0 %v3470_v22  ;;  %v1144_v53 = vsel %vm1105_vm7, %v1141_v52, %v1143_v12 }
  0xfa   : > { %1029 = vrot.lane.b32.xlu0 %v1020_v63, %s3474_s20  ;;  %v1187_v63 = vrot.slane %v1185_v57, 3  ;;  %v991_v21 = vsel %vm980_vm1, %v988_v14, %v990_v2 }
  0xfb   : > { %1096 = vrot.lane.b32.xlu1 %v1073_v49, %s3480_s21  ;;  %v3347_v49 = vld [vmem:[#allocation4 + $0x2c] ss:$0 sps:$4 sm:$0x33]  }
  0xfc   : > { %v1084_v61 = vshrl.u32 %v3347_v49, 16  ;;  %v1087_v62 = vshll.u32 %v3347_v49, 16 }
  0xfe   : > { %1121 = vrot.lane.b32.xlu0 %v1112_v45, %s3477_s24  ;;  %v963_v45 = vshll.u32 %v3345_v51, 16  ;;  %v1086_v3 = vrot.slane %v1084_v61, 1  ;;  %v1115_v51 = vrot.slane %v3347_v49, 2 }
  0xff   : > { %1151 = vrot.lane.b32.xlu1 %v1142_v0, %s3476_s17  ;;  %v1188_v0 = vor.u32 %v1187_v63, %v1184_v1 }
 0x100   : > { %v965_v52 = vrot.slane %v963_v45, 1  ;;  %v1116_v14 = vsel %vm1105_vm7, %v1113_v9, %v1115_v51 }
 0x101   : > { %v1189_v47 = vsel %vm1160_vm10, %v1179_v48, %v1188_v0  ;;  %v1145_v48 = vrot.slane %v3348_v43, 2 }
 0x102   : > { %1203 = vrot.lane.b32.xlu0 %v1180_v7, %s3481_s22  ;;  %v1089_v7 = vrot.slane %v1087_v62, 2  ;;  %v966_v17 = vsel %vm922_vm13, %v961_v55, %v965_v52  ;;  %vm1311_vm13 = vcmask 523264  }
 0x103   : > { %1228 = vrot.lane.b32.xlu1 %v1219_v59, %s3478_s26  ;;  %v3346_v59 = vld [vmem:[#allocation4 + $0x2c] ss:$0 sps:$4 sm:$0x11]   ;;  %v1146_v1 = vsel %vm1105_vm7, %v1143_v12, %v1145_v48 }
 0x104   : > { %v1023_v8 = vrot.slane %v3346_v59, 1 }
 0x106   : > { %973 = vrot.lane.b32.xlu0 %v958_v60, %s3479_s15  ;;  %v1090_v60 = vor.u32 %v1089_v7, %v1086_v3  ;;  %v1024_v56 = vsel %vm980_vm1, %v1021_v5, %v1023_v8 }
 0x107   : > { %998 = vrot.lane.b32.xlu1 %v989_v10, %s3475_s23  ;;  %v1193_v10 = vrot.slane %v1191_v16, 2 }
 0x108   : > { %v1091_v57 = vsel %vm1038_vm9, %v1081_v46, %v1090_v60  ;;  %vm1365_vm9 = vcmask 588800  }
 0x10a   : > { %1031 = vrot.lane.b32.xlu0 %v1022_v13, %s3474_s20  ;;  %v1196_v13 = vrot.slane %v1194_v44, 3 }
 0x10b   : > { %1098 = vrot.lane.b32.xlu1 %v1082_v11, %s3480_s21  ;;  %v3355_v11 = vld [vmem:[%s3601_s19 + $0x8] sm:$0xff]  }
 0x10c   : > { %3249 = vmatpush3.bf16.msra.mxu1 %v3355_v11  ;;  %v1197_v63 = vor.u32 %v1196_v13, %v1193_v10 }
 0x10d   : > { %3248 = vmatprep.subr.bf16.mxu1 %v3470_v22 }
 0x10e   : > { %1123 = vrot.lane.b32.xlu0 %v1114_v54, %s3477_s24  ;;  %v1222_v54 = vrot.slane %v3349_v4, 3  ;;  %v1198_v5 = vsel %vm1160_vm10, %v1188_v0, %v1197_v63 }
 0x10f   : > { %1153 = vrot.lane.b32.xlu1 %v1144_v53, %s3476_s17  ;;  %v3356_v53 = vld [vmem:[%s3601_s19] sm:$0xff]  }
 0x110   : > { %3250 = vmatpush3.bf16.msra.mxu1 %v3356_v53  ;;  %v1223_v46 = vsel %vm1212_vm8, %v1220_v20, %v1222_v54 }
 0x112   : > { %1205 = vrot.lane.b32.xlu0 %v1189_v47, %s3481_s22 }
 0x113   : > { %1230 = vrot.lane.b32.xlu1 %v1221_v50, %s3478_s26 }
 0x116   : > { %975 = vrot.lane.b32.xlu0 %v966_v17, %s3479_s15  ;;  %s4770_s15 = scalar_lea.vmem %s4746_s4, %s3570_s12  ;;  %s3487_s12 = smov 120  }
 0x117   : > { %1000 = vrot.lane.b32.xlu1 %v991_v21, %s3475_s23 }
 0x11a   : > { %1033 = vrot.lane.b32.xlu0 %v1024_v56, %s3474_s20 }
 0x11b   : > { %1100 = vrot.lane.b32.xlu1 %v1091_v57, %s3480_s21 }
 0x11e   : > { %1125 = vrot.lane.b32.xlu0 %v1116_v14, %s3477_s24 }
 0x11f   : > { %1155 = vrot.lane.b32.xlu1 %v1146_v1, %s3476_s17 }
 0x122   : > { %1207 = vrot.lane.b32.xlu0 %v1198_v5, %s3481_s22  ;;  %s3485_s22 = smov 112  }
 0x123   : > { %1232 = vrot.lane.b32.xlu1 %v1223_v46, %s3478_s26 }
 0x148   : > { %v993_v12 = vpop.permute.xlu0 %992 }
 0x149   : > { %v1026_v9 = vpop.permute.xlu1 %1025 }
 0x14c   : > { %v1118_v45 = vpop.permute.xlu0 %1117 }
 0x14d   : > { %v1148_v49 = vpop.permute.xlu1 %1147 }
 0x150   : > { %v1028_v62 = vpop.permute.xlu0 %1027 }
 0x151   : > { %v1225_v61 = vpop.permute.xlu1 %1224 }
 0x154   : > { %v1120_v55 = vpop.permute.xlu0 %1119 }
 0x155   : > { %v995_v50 = vpop.permute.xlu1 %994 }
 0x158   : > { %v968_v4 = vpop.permute.xlu0 %967 }
 0x159   : > { %v1150_v2 = vpop.permute.xlu1 %1149  ;;  %v1236_v20 = vsel %vm1234_vm11, %v3849_v19, %v968_v4 }
 0x15a   : > { %v1247_v0 = vsel %vm1245_vm0, %v1236_v20, %v993_v12 }
 0x15b   : > { %v1258_v47 = vsel %vm1256_vm4, %v1247_v0, %v1026_v9 }
 0x15c   : > { %v1200_v59 = vpop.permute.xlu0 %1199 }
 0x15d   : > { %v1093_v52 = vpop.permute.xlu1 %1092 }
 0x15e   : > { %v1269_v3 = vsel %vm1267_vm14, %v1258_v47, %v1093_v52 }
 0x15f   : > { %v1280_v7 = vsel %vm1278_vm15, %v1269_v3, %v1118_v45 }
 0x160   : > { %v1291_v43 = vsel %vm1289_vm3, %v1280_v7, %v1148_v49  ;;  %v970_v16 = vpop.permute.xlu0 %969 }
 0x161   : > { %v1302_v19 = vsel %vm1300_vm12, %v1291_v43, %v1200_v59  ;;  %v1095_v44 = vpop.permute.xlu1 %1094  ;;  %v1238_v17 = vsel %vm1234_vm11, %v3844_v15, %v970_v16 }
 0x162   : > { %v1313_v21 = vsel %vm1311_vm13, %v1302_v19, %v1225_v61  ;;  %v1249_v8 = vsel %vm1245_vm0, %v1238_v17, %v995_v50 }
 0x163   : > { %3204 = vmatmul.mubr.msk.bf16.vlgmr.msra.gmra.mxu0 %vm1365_vm9, %v1313_v21  ;;  %v1260_v60 = vsel %vm1256_vm4, %v1249_v8, %v1028_v62 }
 0x164   : > { %3207 = vmatprep.mubr.msk.bf16.mxu0 %vm3482_vm5, %v3470_v22  ;;  %3224 = vmatpush3.bf16.msra.mxu0 %v3355_v11  ;;  %v1271_v48 = vsel %vm1267_vm14, %v1260_v60, %v1095_v44  ;;  %v1202_v10 = vpop.permute.xlu0 %1201 }
 0x165   : > { %v1227_v56 = vpop.permute.xlu1 %1226  ;;  %3225 = vmatprep.subr.bf16.mxu0 %v3470_v22  ;;  %v1282_v15 = vsel %vm1278_vm15, %v1271_v48, %v1120_v55 }
 0x166   : > { %v1293_v57 = vsel %vm1289_vm3, %v1282_v15, %v1150_v2 }
 0x167   : > { %v1304_v51 = vsel %vm1300_vm12, %v1293_v57, %v1202_v10 }
 0x168   : > { %3226 = vmatpush3.bf16.msra.mxu0 %v3356_v53  ;;  %v1315_v13 = vsel %vm1311_vm13, %v1304_v51, %v1227_v56  ;;  %v972_v14 = vpop.permute.xlu0 %971 }
 0x169   : > { %v997_v1 = vpop.permute.xlu1 %996  ;;  %v1240_v11 = vsel %vm1234_vm11, %v3847_v18, %v972_v14 }
 0x16a   : > { %v1251_v63 = vsel %vm1245_vm0, %v1240_v11, %v997_v1 }
 0x16b   : > { %3208 = vmatmul.mubr.msk.bf16.gmra.mxu0 %vm1365_vm9, %v1315_v13 }
 0x16c   : > { %3211 = vmatprep.mubr.msk.bf16.mxu0 %vm3482_vm5, %v3470_v22  ;;  %v1030_v54 = vpop.permute.xlu0 %1029 }
 0x16d   : > { %v1097_v5 = vpop.permute.xlu1 %1096  ;;  %v1262_v46 = vsel %vm1256_vm4, %v1251_v63, %v1030_v54 }
 0x16e   : > { %v1273_v53 = vsel %vm1267_vm14, %v1262_v46, %v1097_v5  ;;  %v3359_v5 = vld [vmem:[%s3623_s25 + $0x14] ss:$8 sps:$4 sm:$0xff]   ;;  %v4125_v46 = vld [vmem:[%s4769_s13] ss:$0 sm:$0xff]  ;;  %s4773_s13 = scalar_lea.vmem (!%p3151_p8), %s4750_s8, %s4785_s28 }
 0x16f   : > { %1829 = vmatprep.subr.bf16.mxu1 %v3359_v5 }
 0x170   : > { %v1122_v9 = vpop.permute.xlu0 %1121 }
 0x171   : > { %v1152_v12 = vpop.permute.xlu1 %1151  ;;  %v1284_v49 = vsel %vm1278_vm15, %v1273_v53, %v1122_v9 }
 0x172   : > { %v1295_v45 = vsel %vm1289_vm3, %v1284_v49, %v1152_v12 }
 0x174   : > { %v1204_v18 = vpop.permute.xlu0 %1203 }
 0x175   : > { %v1229_v61 = vpop.permute.xlu1 %1228  ;;  %v1306_v62 = vsel %vm1300_vm12, %v1295_v45, %v1204_v18 }
 0x176   : > { %v1317_v50 = vsel %vm1311_vm13, %v1306_v62, %v1229_v61 }
 0x177   : > { %3212 = vmatmul.mubr.msk.bf16.gmra.mxu0 %vm1365_vm9, %v1317_v50 }
 0x178   : > { %v974_v55 = vpop.permute.xlu0 %973  ;;  %3215 = vmatprep.mubr.msk.bf16.mxu0 %vm3482_vm5, %v3470_v22 }
 0x179   : > { %v999_v2 = vpop.permute.xlu1 %998  ;;  %v1242_v4 = vsel %vm1234_vm11, %v3867_v58, %v974_v55 }
 0x17a   : > { %v1253_v20 = vsel %vm1245_vm0, %v1242_v4, %v999_v2 }
 0x17c   : > { %v1032_v0 = vpop.permute.xlu0 %1031 }
 0x17d   : > { %v1099_v47 = vpop.permute.xlu1 %1098  ;;  %v1264_v52 = vsel %vm1256_vm4, %v1253_v20, %v1032_v0 }
 0x17e   : > { %v1275_v59 = vsel %vm1267_vm14, %v1264_v52, %v1099_v47 }
 0x180   : > { %v1124_v3 = vpop.permute.xlu0 %1123 }
 0x181   : > { %v1154_v7 = vpop.permute.xlu1 %1153  ;;  %v1286_v43 = vsel %vm1278_vm15, %v1275_v59, %v1124_v3 }
 0x182   : > { %v1297_v19 = vsel %vm1289_vm3, %v1286_v43, %v1154_v7 }
 0x184   : > { %v1206_v16 = vpop.permute.xlu0 %1205 }
 0x185   : > { %v1231_v44 = vpop.permute.xlu1 %1230  ;;  %v1308_v17 = vsel %vm1300_vm12, %v1297_v19, %v1206_v16 }
 0x186   : > { %v1319_v58 = vsel %vm1311_vm13, %v1308_v17, %v1231_v44 }
 0x187   : > { %3216 = vmatmul.mubr.msk.bf16.gmra.mxu0 %vm1365_vm9, %v1319_v58 }
 0x188   : > { %v976_v21 = vpop.permute.xlu0 %975  ;;  %3219 = vmatprep.mubr.msk.bf16.mxu0 %vm3482_vm5, %v3470_v22 }
 0x189   : > { %v1001_v8 = vpop.permute.xlu1 %1000  ;;  %v1244_v60 = vsel %vm1234_vm11, %v3950_v6, %v976_v21 }
 0x18a   : > { %v1255_v48 = vsel %vm1245_vm0, %v1244_v60, %v1001_v8 }
 0x18c   : > { %v1034_v10 = vpop.permute.xlu0 %1033 }
 0x18d   : > { %v1101_v56 = vpop.permute.xlu1 %1100  ;;  %v1266_v15 = vsel %vm1256_vm4, %v1255_v48, %v1034_v10 }
 0x18e   : > { %v1277_v57 = vsel %vm1267_vm14, %v1266_v15, %v1101_v56 }
 0x190   : > { %v1126_v51 = vpop.permute.xlu0 %1125 }
 0x191   : > { %v1156_v13 = vpop.permute.xlu1 %1155  ;;  %v1288_v14 = vsel %vm1278_vm15, %v1277_v57, %v1126_v51  ;;  %v3357_v57 = vld [vmem:[%s3623_s25 + $0x10] ss:$8 sps:$4 sm:$0xff]  }
 0x192   : > { %v1299_v1 = vsel %vm1289_vm3, %v1288_v14, %v1156_v13 }
 0x194   : > { %v1208_v11 = vpop.permute.xlu0 %1207 }
 0x195   : > { %v1233_v63 = vpop.permute.xlu1 %1232  ;;  %v1310_v6 = vsel %vm1300_vm12, %v1299_v1, %v1208_v11 }
 0x196   : > { %v1321_v54 = vsel %vm1311_vm13, %v1310_v6, %v1233_v63 }
 0x197   : > { %3220 = vmatmul.mubr.msk.bf16.gmra.mxu0 %vm1365_vm9, %v1321_v54 }
 0x198   : > { %3227 = vmatprep.mubr.msk.bf16.mxu0 %vm3482_vm5, %v3470_v22 }
 0x223   : > { %v1414_v53 = vpop.f32.mrf.mxu0 }
 0x224   : > { %v1415_v9 = vadd.f32 %v4125_v46, %v1414_v53 }
 0x225   : > { %v3205_v12 = vpop.f32.mrf.mxu0 }
 0x226   : > { %v1463_v45 = vmul.f32 0.01, %v1415_v9  ;;  %vm1453_vm10 = vcmp.ge.f32.partialorder %v1415_v9, 0.0 }
 0x227   : > { %v1417_v49 = vpop.f32.mrf.mxu0 }
 0x228   : > { %v1418_v18 = vadd.f32 %v4125_v46, %v1417_v49  ;;  %v1473_v55 = vsel %vm1453_vm10, %v1415_v9, %v1463_v45 }
 0x229   : > { %v3206_v61 = vpop.f32.mrf.mxu0 }
 0x22a   : > { %vm1454_vm6 = vcmp.ge.f32.partialorder %v1418_v18, 0.0  ;;  %v1464_v62 = vmul.f32 0.01, %v1418_v18 }
 0x22b   : > { %v1422_v50 = vpop.f32.mrf.mxu0 }
 0x22c   : > { %v1474_v2 = vsel %vm1454_vm6, %v1418_v18, %v1464_v62  ;;  %v1423_v4 = vadd.f32 %v4125_v46, %v1422_v50 }
 0x22d   : > { %v1483_v20 = vpack.c.bf16 %v1474_v2, %v1473_v55  ;;  %v3209_v0 = vpop.f32.mrf.mxu0 }
 0x22e   : > { %v1465_v52 = vmul.f32 0.01, %v1423_v4  ;;  %vm1455_vm4 = vcmp.ge.f32.partialorder %v1423_v4, 0.0 }
 0x22f   : > { %v1425_v47 = vpop.f32.mrf.mxu0  ;;  %3228 = vmatmul.mubr.msk.bf16.vlgmr.msra.gmra.mxu0 %vm1267_vm14, %v1483_v20 }
 0x230   : > { %v1426_v59 = vadd.f32 %v4125_v46, %v1425_v47  ;;  %3231 = vmatprep.mubr.msk.bf16.mxu0 %vm3482_vm5, %v3470_v22  ;;  %v1475_v43 = vsel %vm1455_vm4, %v1423_v4, %v1465_v52  ;;  %v3360_v47 = vld [vmem:[%s3623_s25] ss:$8 sps:$4 sm:$0xff]   ;;  %v3483_v52 = vmov 0  }
 0x231   : > { %v3210_v3 = vpop.f32.mrf.mxu0 }
 0x232   : > { %vm1456_vm15 = vcmp.ge.f32.partialorder %v1426_v59, 0.0  ;;  %v1466_v7 = vmul.f32 0.01, %v1426_v59 }
 0x234   : > { %v1476_v19 = vsel %vm1456_vm15, %v1426_v59, %v1466_v7  ;;  %vm1712_vm15 = vcmask 257026  }
 0x235   : > { %v1484_v16 = vpack.c.bf16 %v1476_v19, %v1475_v43 }
 0x237   : > { %3232 = vmatmul.mubr.msk.bf16.gmra.mxu0 %vm1267_vm14, %v1484_v16  ;;  %v1430_v44 = vpop.f32.mrf.mxu0 }
 0x238   : > { %v1431_v17 = vadd.f32 %v4125_v46, %v1430_v44 }
 0x239   : > { %v3213_v58 = vpop.f32.mrf.mxu0 }
 0x23a   : > { %v1467_v21 = vmul.f32 0.01, %v1431_v17  ;;  %vm1457_vm3 = vcmp.ge.f32.partialorder %v1431_v17, 0.0 }
 0x23b   : > { %v1433_v8 = vpop.f32.mrf.mxu0 }
 0x23c   : > { %v1434_v60 = vadd.f32 %v4125_v46, %v1433_v8  ;;  %v1477_v10 = vsel %vm1457_vm3, %v1431_v17, %v1467_v21  ;;  %vm1669_vm3 = vcmask 1041408  }
 0x23d   : > { %v3214_v48 = vpop.f32.mrf.mxu0 }
 0x23e   : > { %vm1458_vm12 = vcmp.ge.f32.partialorder %v1434_v60, 0.0  ;;  %v1468_v56 = vmul.f32 0.01, %v1434_v60 }
 0x240   : > { %v1478_v15 = vsel %vm1458_vm12, %v1434_v60, %v1468_v56  ;;  %vm1670_vm12 = vcmask 1045508  }
 0x241   : > { %v1485_v51 = vpack.c.bf16 %v1478_v15, %v1477_v10 }
 0x243   : > { %3236 = vmatmul.mubr.msk.bf16.vlgmr.msra.gmra.mxu1 %vm1267_vm14, %v1485_v51 }
 0x244   : > { %3239 = vmatprep.mubr.msk.bf16.mxu1 %vm3482_vm5, %v3470_v22  ;;  %1830 = vmatpush1.bf16.msra.mxu1 %v3357_v57 }
 0x247   : > { %v1438_v13 = vpop.f32.mrf.mxu0 }
 0x248   : > { %v1439_v14 = vadd.f32 %v4125_v46, %v1438_v13 }
 0x249   : > { %v3217_v1 = vpop.f32.mrf.mxu0 }
 0x24a   : > { %v1469_v11 = vmul.f32 0.01, %v1439_v14  ;;  %vm1459_vm13 = vcmp.ge.f32.partialorder %v1439_v14, 0.0 }
 0x24b   : > { %v1441_v63 = vpop.f32.mrf.mxu0 }
 0x24c   : > { %v1442_v6 = vadd.f32 %v4125_v46, %v1441_v63  ;;  %v1479_v5 = vsel %vm1459_vm13, %v1439_v14, %v1469_v11 }
 0x24d   : > { %v3218_v54 = vpop.f32.mrf.mxu0 }
 0x24e   : > { %vm1460_vm9 = vcmp.ge.f32.partialorder %v1442_v6, 0.0  ;;  %v1470_v53 = vmul.f32 0.01, %v1442_v6 }
 0x250   : > { %v1480_v9 = vsel %vm1460_vm9, %v1442_v6, %v1470_v53  ;;  %vm4165_vm9 = vmor %vm1669_vm3, %vm1670_vm12 }
 0x251   : > { %v1486_v12 = vpack.c.bf16 %v1480_v9, %v1479_v5 }
 0x253   : > { %3240 = vmatmul.mubr.msk.bf16.gmra.mxu1 %vm1267_vm14, %v1486_v12 }
 0x254   : > { %3243 = vmatprep.mubr.msk.bf16.mxu1 %vm3482_vm5, %v3470_v22  ;;  %v3362_v22 = vld [vmem:[%s3623_s25 + $0x4] ss:$8 sps:$4 sm:$0xff]   ;;  %s3484_s25 = smov 96  }
 0x255   : > { %1831 = vmatprep.subr.bf16.mxu1 %v3362_v22 }
 0x256   : > { %1832 = vmatpush1.bf16.msra.mxu1 %v3360_v47 }
 0x257   : > { %v1446_v49 = vpop.f32.mrf.mxu0 }
 0x258   : > { %v1447_v45 = vadd.f32 %v4125_v46, %v1446_v49 }
 0x259   : > { %v3221_v18 = vpop.f32.mrf.mxu0 }
 0x25a   : > { %v1471_v61 = vmul.f32 0.01, %v1447_v45  ;;  %vm1461_vm10 = vcmp.ge.f32.partialorder %v1447_v45, 0.0 }
 0x25b   : > { %v1449_v62 = vpop.f32.mrf.mxu0 }
 0x25c   : > { %v1450_v50 = vadd.f32 %v4125_v46, %v1449_v62  ;;  %v1481_v2 = vsel %vm1461_vm10, %v1447_v45, %v1471_v61  ;;  %v4157_v46 = vld [vmem:[%s4770_s15] ss:$0 sm:$0xff]  ;;  %vm1714_vm10 = vcmask 257024  }
 0x25d   : > { %v3222_v55 = vpop.f32.mrf.mxu0 }
 0x25e   : > { %vm1462_vm6 = vcmp.ge.f32.partialorder %v1450_v50, 0.0  ;;  %v1472_v4 = vmul.f32 0.01, %v1450_v50 }
 0x260   : > { %v1482_v20 = vsel %vm1462_vm6, %v1450_v50, %v1472_v4 }
 0x261   : > { %v1487_v0 = vpack.c.bf16 %v1482_v20, %v1481_v2 }
 0x263   : > { %3244 = vmatmul.mubr.msk.bf16.gmra.mxu1 %vm1267_vm14, %v1487_v0 }
 0x264   : > { %1849 = vmatprep.mubr.bf16.mxu1 %v3483_v52 }
 0x2ef   : > { %v1560_v59 = vpop.f32.mrf.mxu0 }
 0x2f0   : > { %v1561_v3 = vadd.f32 %v4157_v46, %v1560_v59 }
 0x2f1   : > { %v3229_v7 = vpop.f32.mrf.mxu0 }
 0x2f2   : > { %vm1599_vm5 = vcmp.ge.f32.partialorder %v1561_v3, 0.0  ;;  %v1609_v43 = vmul.f32 0.01, %v1561_v3 }
 0x2f3   : > { %v1563_v19 = vpop.f32.mrf.mxu0 }
 0x2f4   : > { %v1619_v16 = vsel %vm1599_vm5, %v1561_v3, %v1609_v43  ;;  %v1564_v44 = vadd.f32 %v4157_v46, %v1563_v19 }
 0x2f5   : > { %v1629_v17 = vmul.f32 %v3707_v23, %v1619_v16  ;;  %v3230_v58 = vpop.f32.mrf.mxu0 }
 0x2f6   : > { %vm1600_vm4 = vcmp.ge.f32.partialorder %v1564_v44, 0.0  ;;  %v1610_v21 = vmul.f32 0.01, %v1564_v44 }
 0x2f7   : > { %v3166_v8 = vpack.c.bf16 %v1629_v17, %v1629_v17  ;;  %v1568_v60 = vpop.f32.mrf.mxu0 }
 0x2f8   : > { %v1620_v48 = vsel %vm1600_vm4, %v1564_v44, %v1610_v21  ;;  %v1569_v10 = vadd.f32 %v4157_v46, %v1568_v60 }
 0x2f9   : > { %v1672_v56 = vrot.slane %v3166_v8, 6  ;;  %v1630_v15 = vmul.f32 %v3710_v24, %v1620_v48  ;;  %v3233_v57 = vpop.f32.mrf.mxu0 }
 0x2fa   : > { %vm1601_vm13 = vcmp.ge.f32.partialorder %v1569_v10, 0.0  ;;  %v1611_v51 = vmul.f32 0.01, %v1569_v10 }
 0x2fb   : > { %1713 = vst.msk [vmem:[#allocation5 + $0x4] sm:$0xc] %vm1712_vm15, %v1672_v56  ;;  %v3167_v13 = vpack.c.bf16 %v1630_v15, %v1630_v15  ;;  %v1571_v23 = vpop.f32.mrf.mxu0  ;;  %v1673_v63 = vrot.slane %v1672_v56, 4 }
 0x2fc   : > { %v1621_v1 = vsel %vm1601_vm13, %v1569_v10, %v1611_v51  ;;  %v1572_v11 = vadd.f32 %v4157_v46, %v1571_v23 }
 0x2fd   : > { %v1674_v6 = vrot.slane %v3167_v13, 6  ;;  %v1631_v24 = vmul.f32 %v3713_v25, %v1621_v1  ;;  %v3234_v54 = vpop.f32.mrf.mxu0 }
 0x2fe   : > { %vm1602_vm6 = vcmp.ge.f32.partialorder %v1572_v11, 0.0  ;;  %v1612_v5 = vmul.f32 0.01, %v1572_v11 }
 0x2ff   : > { %v1675_v53 = vsel %vm4165_vm9, %v1673_v63, %v1674_v6  ;;  %v3168_v9 = vpack.c.bf16 %v1631_v24, %v1631_v24  ;;  %v1676_v49 = vrot.slane %v1674_v6, 4 }
 0x300   : > { %1715 = vst.msk [vmem:[#allocation5 + $0x8] sm:$0xf] %vm1714_vm10, %v1675_v53  ;;  %v1622_v12 = vsel %vm1602_vm6, %v1572_v11, %v1612_v5 }
 0x301   : > { %v1677_v45 = vrot.slane %v3168_v9, 6  ;;  %v1632_v18 = vmul.f32 %v3716_v26, %v1622_v12 }
 0x302   : > { %v3363_v61 = vld [vmem:[#allocation5] sm:$0xff]  }
 0x303   : > { %v1678_v62 = vsel %vm4165_vm9, %v1676_v49, %v1677_v45  ;;  %v3169_v50 = vpack.c.bf16 %v1632_v18, %v1632_v18  ;;  %v1576_v25 = vpop.f32.mrf.mxu1  ;;  %3133 = vmatmul.mubr.msk.bf16.vlgmr.msra.gmra.mxu1 %vm1267_vm14, %v3363_v61  ;;  %v1679_v55 = vrot.slane %v1677_v45, 4 }
 0x304   : > { %1716 = vst.msk [vmem:[#allocation5 + $0xc] sm:$0xf] %vm1714_vm10, %v1678_v62  ;;  %v1577_v4 = vadd.f32 %v4157_v46, %v1576_v25  ;;  %1859 = vmatprep.mubr.bf16.mxu1 %v3483_v52 }
 0x305   : > { %v1680_v2 = vrot.slane %v3169_v50, 6  ;;  %v3237_v20 = vpop.f32.mrf.mxu1 }
 0x306   : > { %vm1603_vm5 = vcmp.ge.f32.partialorder %v1577_v4, 0.0  ;;  %v1613_v0 = vmul.f32 0.01, %v1577_v4 }
 0x307   : > { %v1681_v26 = vsel %vm4165_vm9, %v1679_v55, %v1680_v2  ;;  %v1579_v22 = vpop.f32.mrf.mxu1  ;;  %v1682_v17 = vrot.slane %v1680_v2, 4 }
 0x308   : > { %1717 = vst.msk [vmem:[#allocation5 + $0x10] sm:$0xf] %vm1714_vm10, %v1681_v26  ;;  %v1623_v47 = vsel %vm1603_vm5, %v1577_v4, %v1613_v0  ;;  %v1580_v59 = vadd.f32 %v4157_v46, %v1579_v22  ;;  %vm1724_vm5 = vcmask 254976  }
 0x309   : > { %v1633_v3 = vmul.f32 %v3719_v27, %v1623_v47  ;;  %v3238_v7 = vpop.f32.mrf.mxu1 }
 0x30a   : > { %vm1604_vm4 = vcmp.ge.f32.partialorder %v1580_v59, 0.0  ;;  %v1614_v43 = vmul.f32 0.01, %v1580_v59 }
 0x30b   : > { %v3364_v19 = vld [vmem:[#allocation5 + $0x8] sm:$0xff]   ;;  %v3170_v16 = vpack.c.bf16 %v1633_v3, %v1633_v3 }
 0x30c   : > { %v1624_v44 = vsel %vm1604_vm4, %v1580_v59, %v1614_v43  ;;  %3134 = vmatmul.mubr.msk.bf16.gmra.mxu1 %vm1267_vm14, %v3364_v19 }
 0x30d   : > { %v1683_v58 = vrot.slane %v3170_v16, 6  ;;  %v1634_v21 = vmul.f32 %v3722_v28, %v1624_v44  ;;  %1869 = vmatprep.mubr.bf16.mxu1 %v3483_v52 }
 0x30f   : > { %v1684_v8 = vsel %vm4165_vm9, %v1682_v17, %v1683_v58  ;;  %v3171_v60 = vpack.c.bf16 %v1634_v21, %v1634_v21  ;;  %v1685_v27 = vrot.slane %v1683_v58, 4  ;;  %v3369_v58 = vld [vmem:[#allocation5 + $0x30] ss:$0 sps:$4 sm:$0x77]  }
 0x310   : > { %1718 = vst.msk [vmem:[#allocation5 + $0x14] sm:$0xf] %vm1714_vm10, %v1684_v8 }
 0x311   : > { %v1686_v48 = vrot.slane %v3171_v60, 6 }
 0x313   : > { %v1687_v10 = vsel %vm4165_vm9, %v1685_v27, %v1686_v48  ;;  %v1584_v56 = vpop.f32.mrf.mxu1  ;;  %v1688_v5 = vrot.slane %v1686_v48, 4 }
 0x314   : > { %1719 = vst.msk [vmem:[#allocation5 + $0x18] sm:$0xf] %vm1714_vm10, %v1687_v10  ;;  %v1585_v15 = vadd.f32 %v4157_v46, %v1584_v56 }
 0x315   : > { %v3241_v57 = vpop.f32.mrf.mxu1 }
 0x316   : > { %vm1605_vm15 = vcmp.ge.f32.partialorder %v1585_v15, 0.0  ;;  %v1615_v28 = vmul.f32 0.01, %v1585_v15 }
 0x317   : > { %v1587_v51 = vpop.f32.mrf.mxu1  ;;  %v3365_v13 = vld [vmem:[#allocation5 + $0x10] sm:$0xff]  }
 0x318   : > { %v1625_v23 = vsel %vm1605_vm15, %v1585_v15, %v1615_v28  ;;  %v1588_v1 = vadd.f32 %v4157_v46, %v1587_v51  ;;  %3135 = vmatmul.mubr.msk.bf16.gmra.mxu1 %vm1267_vm14, %v3365_v13 }
 0x319   : > { %v1635_v11 = vmul.f32 %v3725_v29, %v1625_v23  ;;  %v3242_v63 = vpop.f32.mrf.mxu1  ;;  %1879 = vmatprep.mubr.bf16.mxu1 %v3483_v52 }
 0x31a   : > { %vm1606_vm12 = vcmp.ge.f32.partialorder %v1588_v1, 0.0  ;;  %v1616_v6 = vmul.f32 0.01, %v1588_v1 }
 0x31b   : > { %v3172_v24 = vpack.c.bf16 %v1635_v11, %v1635_v11 }
 0x31c   : > { %v1626_v54 = vsel %vm1606_vm12, %v1588_v1, %v1616_v6 }
 0x31d   : > { %v1689_v53 = vrot.slane %v3172_v24, 6  ;;  %v1636_v9 = vmul.f32 %v3728_v30, %v1626_v54 }
 0x31f   : > { %v1690_v12 = vsel %vm4165_vm9, %v1688_v5, %v1689_v53  ;;  %v1691_v49 = vrot.slane %v1689_v53, 4  ;;  %v3173_v45 = vpack.c.bf16 %v1636_v9, %v1636_v9 }
 0x320   : > { %1720 = vst.msk [vmem:[#allocation5 + $0x1c] sm:$0xf] %vm1714_vm10, %v1690_v12 }
 0x321   : > { %v1692_v29 = vrot.slane %v3173_v45, 6 }
 0x323   : > { %v1693_v18 = vsel %vm4165_vm9, %v1691_v49, %v1692_v29  ;;  %v1592_v61 = vpop.f32.mrf.mxu1  ;;  %v1694_v59 = vrot.slane %v1692_v29, 4 }
 0x324   : > { %1721 = vst.msk [vmem:[#allocation5 + $0x20] sm:$0xf] %vm1714_vm10, %v1693_v18  ;;  %v1593_v62 = vadd.f32 %v4157_v46, %v1592_v61 }
 0x325   : > { %v3245_v50 = vpop.f32.mrf.mxu1 }
 0x326   : > { %vm1607_vm13 = vcmp.ge.f32.partialorder %v1593_v62, 0.0  ;;  %v1617_v25 = vmul.f32 0.01, %v1593_v62 }
 0x327   : > { %v1595_v30 = vpop.f32.mrf.mxu1  ;;  %v3366_v55 = vld [vmem:[#allocation5 + $0x18] sm:$0xff]  }
 0x328   : > { %v1627_v2 = vsel %vm1607_vm13, %v1593_v62, %v1617_v25  ;;  %v1596_v4 = vadd.f32 %v4157_v46, %v1595_v30  ;;  %3136 = vmatmul.mubr.msk.bf16.gmra.mxu1 %vm1267_vm14, %v3366_v55 }
 0x329   : > { %v1637_v20 = vmul.f32 %v3731_v31, %v1627_v2  ;;  %v3246_v26 = vpop.f32.mrf.mxu1  ;;  %1889 = vmatprep.mubr.bf16.mxu1 %v3483_v52 }
 0x32a   : > { %vm1608_vm6 = vcmp.ge.f32.partialorder %v1596_v4, 0.0  ;;  %v1618_v0 = vmul.f32 0.01, %v1596_v4 }
 0x32b   : > { %v3174_v22 = vpack.c.bf16 %v1637_v20, %v1637_v20 }
 0x32c   : > { %v1628_v47 = vsel %vm1608_vm6, %v1596_v4, %v1618_v0 }
 0x32d   : > { %v1695_v3 = vrot.slane %v3174_v22, 6  ;;  %v1638_v7 = vmul.f32 %v3734_v32, %v1628_v47 }
 0x32f   : > { %v1696_v43 = vsel %vm4165_vm9, %v1694_v59, %v1695_v3  ;;  %v1697_v19 = vrot.slane %v1695_v3, 4  ;;  %v3175_v46 = vpack.c.bf16 %v1638_v7, %v1638_v7 }
 0x330   : > { %1722 = vst.msk [vmem:[#allocation5 + $0x24] sm:$0xf] %vm1714_vm10, %v1696_v43 }
 0x331   : > { %v1698_v31 = vrot.slane %v3175_v46, 6 }
 0x333   : > { %v1699_v16 = vsel %vm4165_vm9, %v1697_v19, %v1698_v31  ;;  %v1700_v44 = vrot.slane %v1698_v31, 4  ;;  %vm1943_vm9 = vcmask 128000  }
 0x334   : > { %1723 = vst.msk [vmem:[#allocation5 + $0x28] sm:$0xf] %vm1714_vm10, %v1699_v16 }
 0x335   : > { %1725 = vst.msk [vmem:[#allocation5 + $0x2c] sm:$0x3] %vm1724_vm5, %v1700_v44 }
 0x337   : > { %v3367_v17 = vld [vmem:[#allocation5 + $0x20] sm:$0xff]  }
 0x338   : > { %3137 = vmatmul.mubr.msk.bf16.gmra.mxu1 %vm1267_vm14, %v3367_v17 }
 0x339   : > { %1899 = vmatprep.mubr.bf16.mxu1 %v3483_v52 }
 0x33c   : > { %v3368_v32 = vld [vmem:[#allocation5 + $0x28] sm:$0xff]  }
 0x340   : > { %3138 = vmatmul.mubr.msk.bf16.gmra.mxu1 %vm1267_vm14, %v3368_v32 }
 0x341   : > { %1909 = vmatprep.mubr.bf16.mxu1 %v3483_v52 }
 0x348   : > { %3139 = vmatmul.mubr.msk.bf16.gmra.mxu1 %vm1267_vm14, %v3369_v58  ;;  %vm2345_vm14 = vcmask 1042432  }
 0x3c3   : > { %v4224_v21 = vpop.f32.mrf.mxu1 }
 0x3c4   : > { %1918 = vst [vmem:[#allocation6] sm:$0xff] %v4224_v21 }
 0x3c5   : > { %v1853_v14 = vpop.f32.mrf.mxu1 }
 0x3c7   : > { %v4227_v8 = vpop.f32.mrf.mxu1 }
 0x3c8   : > { %1920 = vst [vmem:[#allocation6 + $0x10] sm:$0xff] %v4227_v8  ;;  %v2046_v52 = vrot.slane %v4227_v8, 2  ;;  %v1980_v57 = vrot.slane %v4227_v8, 1 }
 0x3c9   : > { %v1857_v60 = vpop.f32.mrf.mxu1 }
 0x3cb   : > { %v2040_v27 = vld [vmem:[#allocation6] sm:$0xfc] }
 0x3cc   : > { %v1965_v48 = vld [vmem:[#allocation6] sm:$0xfe]  ;;  %v4230_v10 = vpop.f32.mrf.mxu1  ;;  %v2045_v56 = vrot.slane %v2040_v27, 2 }
 0x3cd   : > { %v1979_v15 = vrot.slane %v1965_v48, 1  ;;  %1922 = vst [vmem:[#allocation6 + $0x20] sm:$0xff] %v4230_v10  ;;  %v2048_v23 = vrot.slane %v4230_v10, 2  ;;  %v1982_v1 = vrot.slane %v4230_v10, 1  ;;  %v2164_v49 = vrot.slane %v4230_v10, 3 }
 0x3ce   : > { %v1863_v28 = vpop.f32.mrf.mxu1  ;;  %v2047_v51 = vsel %vm1105_vm7, %v2045_v56, %v2046_v52  ;;  %v2229_v62 = vrot.slane %v4230_v10, 4 }
 0x3cf   : > { %v1981_v13 = vsel %vm980_vm1, %v1979_v15, %v1980_v57  ;;  %1923 = vst.msk [vmem:[#allocation6 + $0x28] sm:$0xff] %vm1245_vm0, %v1863_v28  ;;  %2066 = vrot.lane.b32.xlu1 %v2047_v51, %s3484_s25  ;;  %v2158_v11 = vld [vmem:[#allocation6 + $0x10] sm:$0xf8]  ;;  %v2049_v54 = vsel %vm1105_vm7, %v2046_v52, %v2048_v23  ;;  %v1983_v5 = vsel %vm980_vm1, %v1980_v57, %v1982_v1 }
 0x3d0   : > { %2000 = vrot.lane.b32.xlu0 %v1981_v13, %s3485_s22  ;;  %v2106_v63 = vld [vmem:[#allocation6 + $0x10] sm:$0xfc]  ;;  %v4242_v6 = vpop.f32.mrf.mxu1  ;;  %v2163_v53 = vrot.slane %v2158_v11, 3 }
 0x3d1   : > { %v2112_v9 = vrot.slane %v2106_v63, 2  ;;  %v2224_v12 = vld [vmem:[#allocation6 + $0x10] sm:$0xf0]  ;;  %v2166_v61 = vrot.slane %v4242_v6, 3  ;;  %v2231_v55 = vrot.slane %v4242_v6, 4  ;;  %v1984_v2 = vrot.slane %v4242_v6, 1 }
 0x3d2   : > { %v1867_v24 = vpop.f32.mrf.mxu1  ;;  %v2165_v45 = vsel %vm1212_vm8, %v2163_v53, %v2164_v49  ;;  %v2228_v18 = vrot.slane %v2224_v12, 4  ;;  %v2050_v59 = vrot.slane %v4242_v6, 2  ;;  %v2347_v31 = vrot.slane %v4242_v6, 5 }
 0x3d3   : > { %1925 = vst.msk [vmem:[#allocation6 + $0x38] sm:$0xff] %vm1245_vm0, %v1867_v24  ;;  %2002 = vrot.lane.b32.xlu1 %v1983_v5, %s3485_s22  ;;  %v2113_v29 = vsel %vm1105_vm7, %v2112_v9, %v2048_v23  ;;  %v2167_v30 = vsel %vm1212_vm8, %v2164_v49, %v2166_v61  ;;  %v2232_v0 = vsel %vm1376_vm2, %v2229_v62, %v2231_v55 }
 0x3d4   : > { %2068 = vrot.lane.b32.xlu0 %v2049_v54, %s3484_s25  ;;  %v2230_v25 = vsel %vm1376_vm2, %v2228_v18, %v2229_v62  ;;  %v2289_v20 = vld [vmem:[#allocation6 + $0x20] sm:$0xf0]  ;;  %v1985_v22 = vsel %vm980_vm1, %v1982_v1, %v1984_v2  ;;  %v2051_v19 = vsel %vm1105_vm7, %v2048_v23, %v2050_v59 }
 0x3d5   : > { %v2295_v47 = vrot.slane %v2289_v20, 4  ;;  %v2341_v7 = vld [vmem:[#allocation6 + $0x20] sm:$0xe0] }
 0x3d6   : > { %v2346_v46 = vrot.slane %v2341_v7, 5 }
 0x3d7   : > { %2118 = vrot.lane.b32.xlu1 %v2113_v29, %s3486_s14  ;;  %v2296_v43 = vsel %vm1376_vm2, %v2295_v47, %v2231_v55 }
 0x3d8   : > { %2184 = vrot.lane.b32.xlu0 %v2165_v45, %s3478_s26  ;;  %v4256_v50 = vpop.f32.mrf.mxu1  ;;  %v2348_v16 = vsel %vm2345_vm14, %v2346_v46, %v2347_v31 }
 0x3d9   : > { %v2052_v44 = vrot.slane %v4256_v50, 2  ;;  %v1986_v17 = vrot.slane %v4256_v50, 1  ;;  %v2233_v60 = vrot.slane %v4256_v50, 4  ;;  %v2168_v52 = vrot.slane %v4256_v50, 3 }
 0x3da   : > { %v1873_v4 = vpop.f32.mrf.mxu1  ;;  %v2349_v28 = vrot.slane %v4256_v50, 5 }
 0x3db   : > { %2186 = vrot.lane.b32.xlu1 %v2167_v30, %s3478_s26  ;;  %1927 = vst.msk [vmem:[#allocation6 + $0x48] sm:$0xff] %vm1245_vm0, %v1873_v4  ;;  %v2053_v58 = vsel %vm1105_vm7, %v2050_v59, %v2052_v44  ;;  %v1987_v14 = vsel %vm980_vm1, %v1984_v2, %v1986_v17  ;;  %v2234_v56 = vsel %vm1376_vm2, %v2231_v55, %v2233_v60 }
 0x3dc   : > { %2249 = vrot.lane.b32.xlu0 %v2230_v25, %s3476_s17  ;;  %v4265_v26 = vpop.f32.mrf.mxu1  ;;  %v2169_v57 = vsel %vm1212_vm8, %v2166_v61, %v2168_v52  ;;  %v2350_v13 = vsel %vm2345_vm14, %v2347_v31, %v2349_v28 }
 0x3dd   : > { %v1988_v51 = vrot.slane %v4265_v26, 1  ;;  %v2054_v1 = vrot.slane %v4265_v26, 2  ;;  %v2235_v24 = vrot.slane %v4265_v26, 4  ;;  %v2170_v54 = vrot.slane %v4265_v26, 3 }
 0x3de   : > { %v1877_v3 = vpop.f32.mrf.mxu1  ;;  %v2351_v18 = vrot.slane %v4265_v26, 5 }
 0x3df   : > { %2251 = vrot.lane.b32.xlu1 %v2232_v0, %s3476_s17  ;;  %1929 = vst.msk [vmem:[#allocation6 + $0x58] sm:$0xff] %vm1245_vm0, %v1877_v3  ;;  %v1989_v23 = vsel %vm980_vm1, %v1986_v17, %v1988_v51  ;;  %v2055_v63 = vsel %vm1105_vm7, %v2052_v44, %v2054_v1  ;;  %v2236_v9 = vsel %vm1376_vm2, %v2233_v60, %v2235_v24 }
 0x3e0   : > { %2004 = vrot.lane.b32.xlu0 %v1985_v22, %s3485_s22  ;;  %v2171_v12 = vsel %vm1212_vm8, %v2168_v52, %v2170_v54  ;;  %v2352_v20 = vsel %vm2345_vm14, %v2349_v28, %v2351_v18 }
 0x3e3   : > { %2301 = vrot.lane.b32.xlu1 %v2296_v43, %s3480_s21 }
 0x3e4   : > { %2070 = vrot.lane.b32.xlu0 %v2051_v19, %s3484_s25 }
 0x3e7   : > { %2367 = vrot.lane.b32.xlu1 %v2348_v16, %s3475_s23 }
 0x3e8   : > { %2120 = vrot.lane.b32.xlu0 %v2051_v19, %s3486_s14  ;;  %v4283_v32 = vpop.f32.mrf.mxu1 }
 0x3e9   : > { %v1990_v49 = vrot.slane %v4283_v32, 1  ;;  %v2056_v62 = vrot.slane %v4283_v32, 2  ;;  %v2172_v0 = vrot.slane %v4283_v32, 3  ;;  %v2237_v16 = vrot.slane %v4283_v32, 4 }
 0x3ea   : > { %v1883_v27 = vpop.f32.mrf.mxu1  ;;  %v2353_v17 = vrot.slane %v4283_v32, 5 }
 0x3eb   : > { %2006 = vrot.lane.b32.xlu1 %v1987_v14, %s3485_s22  ;;  %1931 = vst.msk [vmem:[#allocation6 + $0x68] sm:$0xff] %vm1245_vm0, %v1883_v27  ;;  %v1991_v61 = vsel %vm980_vm1, %v1988_v51, %v1990_v49  ;;  %v2057_v22 = vsel %vm1105_vm7, %v2054_v1, %v2056_v62  ;;  %v2173_v31 = vsel %vm1212_vm8, %v2170_v54, %v2172_v0 }
 0x3ec   : > { %2072 = vrot.lane.b32.xlu0 %v2053_v58, %s3484_s25  ;;  %v4291_v48 = vpop.f32.mrf.mxu1  ;;  %v2238_v14 = vsel %vm1376_vm2, %v2235_v24, %v2237_v16 }
 0x3ed   : > { %v2058_v60 = vrot.slane %v4291_v48, 2  ;;  %v1992_v28 = vrot.slane %v4291_v48, 1  ;;  %v2174_v54 = vrot.slane %v4291_v48, 3 }
 0x3ee   : > { %v1887_v15 = vpop.f32.mrf.mxu1 }
 0x3ef   : > { %2122 = vrot.lane.b32.xlu1 %v2053_v58, %s3486_s14  ;;  %1933 = vst.msk [vmem:[#allocation6 + $0x78] sm:$0xff] %vm1245_vm0, %v1887_v15  ;;  %v2059_v15 = vsel %vm1105_vm7, %v2056_v62, %v2058_v60  ;;  %v1993_v1 = vsel %vm980_vm1, %v1990_v49, %v1992_v28 }
 0x3f0   : > { %2253 = vrot.lane.b32.xlu0 %v2234_v56, %s3476_s17 }
 0x3f3   : > { %2188 = vrot.lane.b32.xlu1 %v2169_v57, %s3478_s26  ;;  %v2239_v57 = vrot.slane %v4291_v48, 4 }
 0x3f4   : > { %2303 = vrot.lane.b32.xlu0 %v2234_v56, %s3480_s21  ;;  %v2354_v56 = vsel %vm2345_vm14, %v2351_v18, %v2353_v17  ;;  %v2355_v18 = vrot.slane %v4291_v48, 5 }
 0x3f6   : > { %v2356_v62 = vsel %vm2345_vm14, %v2353_v17, %v2355_v18 }
 0x3f7   : > { %2008 = vrot.lane.b32.xlu1 %v1989_v23, %s3485_s22  ;;  %v2240_v23 = vsel %vm1376_vm2, %v2237_v16, %v2239_v57 }
 0x3f8   : > { %2369 = vrot.lane.b32.xlu0 %v2350_v13, %s3475_s23  ;;  %v4308_v11 = vpop.f32.mrf.mxu1 }
 0x3f9   : > { %v2176_v49 = vrot.slane %v4308_v11, 3 }
 0x3fa   : > { %v1893_v5 = vpop.f32.mrf.mxu1 }
 0x3fb   : > { %2074 = vrot.lane.b32.xlu1 %v2055_v63, %s3484_s25  ;;  %1935 = vst.msk [vmem:[#allocation6 + $0x88] sm:$0xff] %vm1245_vm0, %v1893_v5  ;;  %v2060_v5 = vrot.slane %v4308_v11, 2 }
 0x3fc   : > { %2124 = vrot.lane.b32.xlu0 %v2055_v63, %s3486_s14  ;;  %v4316_v53 = vpop.f32.mrf.mxu1  ;;  %v1994_v63 = vrot.slane %v4308_v11, 1 }
 0x3fd   : > { %v2359_v25 = vrot.slane %v4316_v53, 5 }
 0x3fe   : > { %v1897_v45 = vpop.f32.mrf.mxu1  ;;  %v1995_v24 = vsel %vm980_vm1, %v1992_v28, %v1994_v63 }
 0x3ff   : > { %2190 = vrot.lane.b32.xlu1 %v2171_v12, %s3478_s26  ;;  %1937 = vst.msk [vmem:[#allocation6 + $0x98] sm:$0xff] %vm1245_vm0, %v1897_v45  ;;  %v2061_v12 = vsel %vm1105_vm7, %v2058_v60, %v2060_v5  ;;  %v2177_v45 = vsel %vm1212_vm8, %v2174_v54, %v2176_v49 }
 0x400   : > { %2305 = vrot.lane.b32.xlu0 %v2236_v9, %s3480_s21  ;;  %v4324_v29 = vpop.f32.mrf.mxu1 }
 0x401   : > { %1938 = vst [vmem:[#allocation6 + $0xa0] sm:$0xff] %v4324_v29  ;;  %v2361_v30 = vrot.slane %v4324_v29, 5  ;;  %v4347_v47 = vrot.slane %v4324_v29, 4  ;;  %v2114_v60 = vrot.slane %v4324_v29, 2 }
 0x402   : > { %v1903_v55 = vpop.f32.mrf.mxu1 }
 0x403   : > { %2255 = vrot.lane.b32.xlu1 %v2236_v9, %s3476_s17  ;;  %1939 = vst.msk [vmem:[#allocation6 + $0xa8] sm:$0xff] %vm1245_vm0, %v1903_v55  ;;  %v4338_v2 = vsel %vm2345_vm14, %v2359_v25, %v2361_v30  ;;  %v2175_v9 = vsel %vm1212_vm8, %v2172_v0, %v2174_v54  ;;  %v2357_v55 = vrot.slane %v4308_v11, 5  ;;  %v1996_v0 = vrot.slane %v4316_v53, 1 }
 0x404   : > { %2010 = vrot.lane.b32.xlu0 %v1991_v61, %s3485_s22  ;;  %v4340_v4 = vpop.f32.mrf.mxu1  ;;  %v2241_v61 = vrot.slane %v4308_v11, 4 }
 0x405   : > { %1940 = vst [vmem:[#allocation6 + $0xb0] sm:$0xff] %v4340_v4  ;;  %v2297_v59 = vrot.slane %v4340_v4, 4  ;;  %v2363_v3 = vrot.slane %v4340_v4, 5 }
 0x406   : > { %v1907_v7 = vpop.f32.mrf.mxu1 }
 0x407   : > { %2371 = vrot.lane.b32.xlu1 %v2352_v20, %s3475_s23  ;;  %1941 = vst.msk [vmem:[#allocation6 + $0xb8] sm:$0xff] %vm1245_vm0, %v1907_v7  ;;  %v4358_v43 = vsel %vm1376_vm2, %v4347_v47, %v2297_v59  ;;  %v4361_v19 = vsel %vm2345_vm14, %v2361_v30, %v2363_v3  ;;  %v2242_v30 = vsel %vm1376_vm2, %v2239_v57, %v2241_v61  ;;  %v2180_v57 = vrot.slane %v4324_v29, 3 }
 0x408   : > { %2126 = vrot.lane.b32.xlu0 %v2057_v22, %s3486_s14  ;;  %v1911_v46 = vpop.f32.mrf.mxu1  ;;  %v2358_v20 = vsel %vm2345_vm14, %v2355_v18, %v2357_v55  ;;  %v1966_v16 = vld [vmem:[#allocation6 + $0xa0] sm:$0x1] }
 0x409   : > { %1942 = vst [vmem:[#allocation6 + $0xc0] sm:$0x3f] %v1911_v46  ;;  %v2243_v46 = vrot.slane %v4316_v53, 4 }
 0x40a   : > { %v1913_v44 = vpop.f32.mrf.mxu1 }
 0x40b   : > { %2076 = vrot.lane.b32.xlu1 %v2057_v22, %s3484_s25  ;;  %1944 = vst.msk [vmem:[#allocation6 + $0xc8] sm:$0x3f] %vm1943_vm9, %v1913_v44  ;;  %v1997_v22 = vsel %vm980_vm1, %v1994_v63, %v1996_v0  ;;  %v2244_v44 = vsel %vm1376_vm2, %v2241_v61, %v2243_v46  ;;  %v2246_v29 = vsel %vm1376_vm2, %v2243_v46, %v4347_v47 }
 0x40c   : > { %2192 = vrot.lane.b32.xlu0 %v2173_v31, %s3478_s26  ;;  %v1915_v58 = vpop.f32.mrf.mxu1  ;;  %v2178_v31 = vrot.slane %v4316_v53, 3  ;;  %v2225_v61 = vld [vmem:[#allocation6 + $0xb0] sm:$0xf] }
 0x40d   : > { %v1998_v58 = vrot.slane %v1966_v16, 1 }
 0x40e   : > { %v1916_v27 = vpop.f32.mrf.mxu1  ;;  %v2179_v17 = vsel %vm1212_vm8, %v2176_v49, %v2178_v31 }
 0x40f   : > { %2257 = vrot.lane.b32.xlu1 %v2238_v14, %s3476_s17  ;;  %v2041_v27 = vld [vmem:[#allocation6 + $0xa0] sm:$0x3] }
 0x410   : > { %2307 = vrot.lane.b32.xlu0 %v2238_v14, %s3480_s21  ;;  %v2342_v52 = vld [vmem:[#allocation6 + $0xc0] sm:$0x1f]  ;;  %v1999_v14 = vsel %vm980_vm1, %v1996_v0, %v1998_v58 }
 0x411   : > { %v2365_v51 = vrot.slane %v2342_v52, 5 }
 0x413   : > { %2128 = vrot.lane.b32.xlu1 %v2059_v15, %s3486_s14  ;;  %v4379_v13 = vsel %vm2345_vm14, %v2363_v3, %v2365_v51  ;;  %v2062_v3 = vrot.slane %v4316_v53, 2 }
 0x414   : > { %2373 = vrot.lane.b32.xlu0 %v2354_v56, %s3475_s23  ;;  %v2360_v56 = vsel %vm2345_vm14, %v2357_v55, %v2359_v25  ;;  %v2108_v25 = vld [vmem:[#allocation6 + $0xb0] sm:$0x3] }
 0x415   : > { %v2063_v7 = vsel %vm1105_vm7, %v2060_v5, %v2062_v3  ;;  %v2115_v52 = vsel %vm1105_vm7, %v2062_v3, %v2114_v60  ;;  %v2116_v54 = vrot.slane %v2108_v25, 2  ;;  %v2159_v5 = vld [vmem:[#allocation6 + $0xb0] sm:$0x7] }
 0x416   : > { %v2182_v18 = vrot.slane %v2159_v5, 3  ;;  %v2409_v5 = vld [vmem:[#allocation6 + $0x48] sm:$0xff] }
 0x417   : > { %2309 = vrot.lane.b32.xlu1 %v2240_v23, %s3480_s21 }
 0x418   : > { %2012 = vrot.lane.b32.xlu0 %v1993_v1, %s3485_s22  ;;  %v2181_v1 = vsel %vm1212_vm8, %v2178_v31, %v2180_v57 }
 0x41b   : > { %2014 = vrot.lane.b32.xlu1 %v1995_v24, %s3485_s22 }
 0x41c   : > { %2078 = vrot.lane.b32.xlu0 %v2059_v15, %s3484_s25  ;;  %v2064_v15 = vrot.slane %v2041_v27, 2 }
 0x41f   : > { %2130 = vrot.lane.b32.xlu1 %v2061_v12, %s3486_s14 }
 0x420   : > { %2194 = vrot.lane.b32.xlu0 %v2175_v9, %s3478_s26 }
 0x423   : > { %2196 = vrot.lane.b32.xlu1 %v2177_v45, %s3478_s26  ;;  %v2117_v45 = vsel %vm1105_vm7, %v2114_v60, %v2116_v54 }
 0x424   : > { %2259 = vrot.lane.b32.xlu0 %v2240_v23, %s3476_s17  ;;  %v2065_v23 = vsel %vm1105_vm7, %v2062_v3, %v2064_v15  ;;  %v2247_v3 = vrot.slane %v2225_v61, 4  ;;  %v4468_v15 = vld [vmem:[%s420_s18] ss:$0 sm:$0xff] }
 0x426   : > { %v2248_v31 = vsel %vm1376_vm2, %v4347_v47, %v2247_v3 }
 0x427   : > { %2311 = vrot.lane.b32.xlu1 %v2242_v30, %s3480_s21 }
 0x428   : > { %2375 = vrot.lane.b32.xlu0 %v2356_v62, %s3475_s23  ;;  %v2291_v62 = vld [vmem:[#allocation6 + $0xc0] sm:$0xf] }
 0x42b   : > { %2377 = vrot.lane.b32.xlu1 %v2358_v20, %s3475_s23 }
 0x42c   : > { %2080 = vrot.lane.b32.xlu0 %v2061_v12, %s3484_s25 }
 0x42f   : > { %2016 = vrot.lane.b32.xlu1 %v1997_v22, %s3485_s22  ;;  %v2183_v22 = vsel %vm1212_vm8, %v2180_v57, %v2182_v18 }
 0x430   : > { %2261 = vrot.lane.b32.xlu0 %v2242_v30, %s3476_s17 }
 0x433   : > { %2082 = vrot.lane.b32.xlu1 %v2063_v7, %s3484_s25 }
 0x434   : > { %2132 = vrot.lane.b32.xlu0 %v2063_v7, %s3486_s14 }
 0x437   : > { %2198 = vrot.lane.b32.xlu1 %v2179_v17, %s3478_s26 }
 0x438   : > { %2313 = vrot.lane.b32.xlu0 %v2244_v44, %s3480_s21 }
 0x43b   : > { %2263 = vrot.lane.b32.xlu1 %v2244_v44, %s3476_s17  ;;  %v2408_v44 = vld [vmem:[#allocation6 + $0x38] sm:$0xff] }
 0x43c   : > { %2018 = vrot.lane.b32.xlu0 %v1999_v14, %s3485_s22  ;;  %v2431_v47 = vrot.slane %v2408_v44, 6 }
 0x43f   : > { %2379 = vrot.lane.b32.xlu1 %v2360_v56, %s3475_s23 }
 0x440   : > { %2134 = vrot.lane.b32.xlu0 %v2115_v52, %s3486_s14 }
 0x441   : > { %v2067_v28 = vpop.permute.xlu1 %2066 }
 0x442   : > { %v2001_v51 = vpop.permute.xlu0 %2000 }
 0x443   : > { %2084 = vrot.lane.b32.xlu1 %v2065_v23, %s3484_s25  ;;  %v2030_v9 = vadd.f32 %v2001_v51, %v4224_v21  ;;  %v2299_v21 = vrot.slane %v2291_v62, 4 }
 0x444   : > { %2200 = vrot.lane.b32.xlu0 %v2181_v1, %s3478_s26 }
 0x445   : > { %v2003_v24 = vpop.permute.xlu1 %2002  ;;  %v2096_v30 = vadd.f32 %v2067_v28, %v2030_v9  ;;  %v2300_v16 = vsel %vm1376_vm2, %v2297_v59, %v2299_v21 }
 0x446   : > { %v2069_v63 = vpop.permute.xlu0 %2068  ;;  %v2031_v4 = vadd.f32 %v2003_v24, %v4227_v8 }
 0x447   : > { %2265 = vrot.lane.b32.xlu1 %v2246_v29, %s3476_s17 }
 0x448   : > { %2315 = vrot.lane.b32.xlu0 %v2246_v29, %s3480_s21  ;;  %v2097_v28 = vadd.f32 %v2069_v63, %v2031_v4 }
 0x449   : > { %v2119_v49 = vpop.permute.xlu1 %2118 }
 0x44a   : > { %v2185_v12 = vpop.permute.xlu0 %2184  ;;  %v2148_v0 = vadd.f32 %v2119_v49, %v2096_v30 }
 0x44b   : > { %2136 = vrot.lane.b32.xlu1 %v2117_v45, %s3486_s14  ;;  %v2433_v45 = vrot.slane %v2409_v5, 6  ;;  %v4489_v5 = vld [vmem:[#allocation6 + $0x68] sm:$0xff] }
 0x44c   : > { %2381 = vrot.lane.b32.xlu0 %v4338_v2, %s3475_s23  ;;  %v2214_v2 = vadd.f32 %v2185_v12, %v2148_v0 }
 0x44d   : > { %v2187_v20 = vpop.permute.xlu1 %2186  ;;  %v2434_v30 = vsel %vm1669_vm3, %v2431_v47, %v2433_v45 }
 0x44e   : > { %v2250_v55 = vpop.permute.xlu0 %2249 }
 0x44f   : > { %2317 = vrot.lane.b32.xlu1 %v4358_v43, %s3480_s21  ;;  %v2279_v14 = vadd.f32 %v2250_v55, %v2214_v2  ;;  %v2407_v43 = vld [vmem:[#allocation6 + $0x28] sm:$0xc0] }
 0x450   : > { %2202 = vrot.lane.b32.xlu0 %v2183_v22, %s3478_s26  ;;  %v2430_v60 = vrot.slane %v2407_v43, 6 }
 0x451   : > { %v2252_v7 = vpop.permute.xlu1 %2251 }
 0x452   : > { %v2005_v46 = vpop.permute.xlu0 %2004  ;;  %v2432_v57 = vsel %vm1669_vm3, %v2430_v60, %v2431_v47  ;;  %v2410_v47 = vld [vmem:[#allocation6 + $0x58] sm:$0xff] }
 0x453   : > { %2319 = vrot.lane.b32.xlu1 %v2300_v16, %s3480_s21  ;;  %v2032_v55 = vadd.f32 %v2005_v46, %v4230_v10 }
 0x454   : > { %2267 = vrot.lane.b32.xlu0 %v2248_v31, %s3476_s17 }
 0x455   : > { %v2302_v17 = vpop.permute.xlu1 %2301 }
 0x456   : > { %v2071_v58 = vpop.permute.xlu0 %2070  ;;  %v2331_v59 = vadd.f32 %v2302_v17, %v2279_v14 }
 0x457   : > { %2385 = vrot.lane.b32.xlu1 %v4379_v13, %s3475_s23  ;;  %v2098_v21 = vadd.f32 %v2071_v58, %v2032_v55 }
 0x458   : > { %2383 = vrot.lane.b32.xlu0 %v4361_v19, %s3475_s23  ;;  %s3488_s23 = smov (!%p3151_p8), 8  }
 0x459   : > { %v2368_v27 = vpop.permute.xlu1 %2367 }
 0x45a   : > { %v2121_v56 = vpop.permute.xlu0 %2120  ;;  %v2397_v52 = vadd.f32 %v2368_v27, %v2331_v59  ;;  %v2435_v59 = vrot.slane %v2410_v47, 6 }
 0x45b   : > { %v2149_v8 = vadd.f32 %v2121_v56, %v2097_v28 }
 0x45c   : > { %v2461_v19 = vadd.f32 %v2432_v57, %v2397_v52  ;;  %v2436_v57 = vsel %vm1669_vm3, %v2433_v45, %v2435_v59 }
 0x45d   : > { %v2007_v13 = vpop.permute.xlu1 %2006  ;;  %v2215_v54 = vadd.f32 %v2187_v20, %v2149_v8 }
 0x45e   : > { %v2073_v51 = vpop.permute.xlu0 %2072  ;;  %v4472_v23 = vadd.f32 %v4468_v15, %v2461_v19  ;;  %v2033_v58 = vadd.f32 %v2007_v13, %v4242_v6 }
 0x45f   : > { %v2280_v49 = vadd.f32 %v2252_v7, %v2215_v54 }
 0x460   : > { %v2488_v1 = vadd.f32 -0.0010005003, %v4472_v23  ;;  %v2099_v19 = vadd.f32 %v2073_v51, %v2033_v58 }
 0x461   : > { %v2123_v24 = vpop.permute.xlu1 %2122 }
 0x462   : > { %v2254_v25 = vpop.permute.xlu0 %2253  ;;  %v3141_v29 = vmul.f32 -1.442695, %v2488_v1  ;;  %v2150_v2 = vadd.f32 %v2123_v24, %v2098_v21 }
 0x464   : > { %3370 = vpow2.f32 %v3141_v29 }
 0x465   : > { %v2189_v12 = vpop.permute.xlu1 %2188 }
 0x466   : > { %v2304_v9 = vpop.permute.xlu0 %2303  ;;  %v2216_v14 = vadd.f32 %v2189_v12, %v2150_v2 }
 0x467   : > { %v2332_v18 = vadd.f32 %v2304_v9, %v2280_v49 }
 0x468   : > { %v2281_v4 = vadd.f32 %v2254_v25, %v2216_v14 }
 0x469   : > { %v4475_v61 = vpop.permute.xlu1 %2008 }
 0x46a   : > { %v2370_v63 = vpop.permute.xlu0 %2369 }
 0x46b   : > { %v2398_v62 = vadd.f32 %v2370_v63, %v2332_v18  ;;  %v2437_v63 = vrot.slane %v4489_v5, 6  ;;  %v2412_v5 = vld [vmem:[#allocation6 + $0x78] sm:$0xff] }
 0x46d   : > { %v2462_v0 = vadd.f32 %v2434_v30, %v2398_v62  ;;  %v2075_v3 = vpop.permute.xlu1 %2074  ;;  %v2438_v21 = vsel %vm1669_vm3, %v2435_v59, %v2437_v63 }
 0x46e   : > { %v2125_v22 = vpop.permute.xlu0 %2124 }
 0x46f   : > { %v4480_v20 = vadd.f32 %v4468_v15, %v2462_v0  ;;  %v2151_v24 = vadd.f32 %v2125_v22, %v2099_v19 }
 0x471   : > { %v2489_v7 = vadd.f32 -0.0010005003, %v4480_v20  ;;  %v3371_v31 = vpop.eup %3370  ;;  %v2191_v44 = vpop.permute.xlu1 %2190 }
 0x472   : > { %v2306_v16 = vpop.permute.xlu0 %2305  ;;  %v2528_v17 = vadd.f32 1.0, %v3371_v31  ;;  %v2217_v54 = vadd.f32 %v2191_v44, %v2151_v24 }
 0x473   : > { %v3142_v43 = vmul.f32 -1.442695, %v2489_v7  ;;  %v2333_v60 = vadd.f32 %v2306_v16, %v2281_v4 }
 0x474   : > { %3372 = vrcp.f32 %v2528_v17 }
 0x475   : > { %3374 = vpow2.f32 %v3142_v43  ;;  %v2256_v10 = vpop.permute.xlu1 %2255  ;;  %v2034_v43 = vadd.f32 %v4475_v61, %v4256_v50 }
 0x476   : > { %v2011_v46 = vpop.permute.xlu0 %2010  ;;  %v2282_v49 = vadd.f32 %v2256_v10, %v2217_v54 }
 0x477   : > { %v2100_v10 = vadd.f32 %v2075_v3, %v2034_v43 }
 0x479   : > { %v2372_v27 = vpop.permute.xlu1 %2371 }
 0x47a   : > { %v2127_v56 = vpop.permute.xlu0 %2126  ;;  %v2399_v52 = vadd.f32 %v2372_v27, %v2333_v60  ;;  %v2035_v27 = vadd.f32 %v2011_v46, %v4265_v26 }
 0x47c   : > { %v2463_v28 = vadd.f32 %v2436_v57, %v2399_v52  ;;  %v2152_v57 = vadd.f32 %v2127_v56, %v2100_v10  ;;  %v2413_v56 = vld [vmem:[#allocation6 + $0x88] sm:$0xff] }
 0x47d   : > { %v2077_v8 = vpop.permute.xlu1 %2076 }
 0x47e   : > { %v2193_v1 = vpop.permute.xlu0 %2192  ;;  %v4486_v29 = vadd.f32 %v4468_v15, %v2463_v28  ;;  %v2101_v24 = vadd.f32 %v2077_v8, %v2035_v27 }
 0x47f   : > { %v2218_v54 = vadd.f32 %v2193_v1, %v2152_v57 }
 0x480   : > { %v2490_v25 = vadd.f32 -0.0010005003, %v4486_v29 }
 0x481   : > { %v3373_v6 = vpop.eup %3372  ;;  %v2258_v13 = vpop.permute.xlu1 %2257 }
 0x482   : > { %v2308_v9 = vpop.permute.xlu0 %2307  ;;  %v3375_v12 = vpop.eup %3374  ;;  %v3143_v18 = vmul.f32 -1.442695, %v2490_v25  ;;  %v2558_v45 = vmul.f32 1.999, %v3373_v6  ;;  %v2283_v6 = vadd.f32 %v2258_v13, %v2218_v54 }
 0x483   : > { %v2529_v51 = vadd.f32 1.0, %v3375_v12  ;;  %v2334_v62 = vadd.f32 %v2308_v9, %v2282_v49  ;;  %v2439_v49 = vrot.slane %v2412_v5, 6 }
 0x484   : > { %3376 = vpow2.f32 %v3143_v18  ;;  %v4492_v30 = vadd.f32 0.001, %v2558_v45 }
 0x485   : > { %3378 = vrcp.f32 %v2529_v51  ;;  %v2129_v0 = vpop.permute.xlu1 %2128  ;;  %v2440_v51 = vsel %vm1669_vm3, %v2437_v63, %v2439_v49 }
 0x486   : > { %v2374_v55 = vpop.permute.xlu0 %2373  ;;  %3380 = vlog2.f32 %v4492_v30  ;;  %v2153_v9 = vadd.f32 %v2129_v0, %v2101_v24 }
 0x487   : > { %v2400_v22 = vadd.f32 %v2374_v55, %v2334_v62  ;;  %v2441_v62 = vrot.slane %v2413_v56, 6  ;;  %v2414_v56 = vld [vmem:[#allocation6 + $0x98] sm:$0xff] }
 0x489   : > { %v2464_v2 = vadd.f32 %v2438_v21, %v2400_v22  ;;  %v2310_v7 = vpop.permute.xlu1 %2309  ;;  %v2442_v43 = vsel %vm1669_vm3, %v2439_v49, %v2441_v62 }
 0x48a   : > { %v4496_v31 = vpop.permute.xlu0 %2012  ;;  %v2335_v26 = vadd.f32 %v2310_v7, %v2283_v6 }
 0x48b   : > { %v4499_v16 = vadd.f32 %v4468_v15, %v2464_v2  ;;  %v2036_v5 = vadd.f32 %v4496_v31, %v4283_v32 }
 0x48d   : > { %v2491_v44 = vadd.f32 -0.0010005003, %v4499_v16  ;;  %v4504_v14 = vpop.permute.xlu1 %2014 }
 0x48e   : > { %v4502_v17 = vpop.permute.xlu0 %2078 }
 0x48f   : > { %v3144_v47 = vmul.f32 -1.442695, %v2491_v44 }
 0x491   : > { %3382 = vpow2.f32 %v3144_v47  ;;  %v3377_v4 = vpop.eup %3376  ;;  %v4508_v58 = vpop.permute.xlu1 %2130 }
 0x492   : > { %v2195_v59 = vpop.permute.xlu0 %2194  ;;  %v3379_v60 = vpop.eup %3378  ;;  %v2530_v52 = vadd.f32 1.0, %v3377_v4 }
 0x493   : > { %v3381_v19 = vpop.eup %3380  ;;  %v2559_v28 = vmul.f32 1.999, %v3379_v60  ;;  %v2219_v46 = vadd.f32 %v2195_v59, %v2153_v9  ;;  %v2102_v9 = vadd.f32 %v4502_v17, %v2036_v5 }
 0x494   : > { %3384 = vrcp.f32 %v2530_v52  ;;  %v2580_v25 = vmul.f32 0.6931472, %v3381_v19 }
 0x495   : > { %v2197_v61 = vpop.permute.xlu1 %2196  ;;  %v4511_v3 = vadd.f32 0.001, %v2559_v28 }
 0x496   : > { %v2260_v50 = vpop.permute.xlu0 %2259  ;;  %v2599_v12 = vmul.f32 %v3737_v33, %v2580_v25 }
 0x497   : > { %3386 = vlog2.f32 %v4511_v3  ;;  %v2284_v18 = vadd.f32 %v2260_v50, %v2219_v46 }
 0x498   : > { %2619 = vrot.lane.b32.xlu0 %v2599_v12, %s3487_s12 }
 0x499   : > { %v2312_v1 = vpop.permute.xlu1 %2311 }
 0x49a   : > { %v2376_v8 = vpop.permute.xlu0 %2375  ;;  %v2336_v55 = vadd.f32 %v2312_v1, %v2284_v18 }
 0x49b   : > { %v2401_v45 = vadd.f32 %v2376_v8, %v2335_v26  ;;  %v2154_v26 = vadd.f32 %v4508_v58, %v2102_v9 }
 0x49d   : > { %v2465_v13 = vadd.f32 %v2440_v51, %v2401_v45  ;;  %v2378_v21 = vpop.permute.xlu1 %2377  ;;  %v2220_v46 = vadd.f32 %v2197_v61, %v2154_v26  ;;  %v2443_v45 = vrot.slane %v2414_v56, 6 }
 0x49e   : > { %v3383_v0 = vpop.eup %3382  ;;  %v2081_v22 = vpop.permute.xlu0 %2080  ;;  %v2402_v44 = vadd.f32 %v2378_v21, %v2336_v55  ;;  %v2037_v21 = vadd.f32 %v4504_v14, %v4291_v48 }
 0x49f   : > { %v2531_v2 = vadd.f32 1.0, %v3383_v0  ;;  %v4518_v7 = vadd.f32 %v4468_v15, %v2465_v13  ;;  %v2444_v58 = vsel %vm1669_vm3, %v2441_v62, %v2443_v45  ;;  %v2415_v62 = vld [vmem:[#allocation6 + $0xa8] sm:$0xff] }
 0x4a0   : > { %v2466_v10 = vadd.f32 %v2442_v43, %v2402_v44  ;;  %v2103_v43 = vadd.f32 %v2081_v22, %v2037_v21  ;;  %v2445_v9 = vrot.slane %v2415_v62, 6 }
 0x4a1   : > { %3388 = vrcp.f32 %v2531_v2  ;;  %v2492_v47 = vadd.f32 -0.0010005003, %v4518_v7  ;;  %v3385_v4 = vpop.eup %3384  ;;  %v4522_v63 = vpop.permute.xlu1 %2016 }
 0x4a2   : > { %v2262_v59 = vpop.permute.xlu0 %2261  ;;  %v4525_v27 = vadd.f32 %v4468_v15, %v2466_v10  ;;  %v2560_v52 = vmul.f32 1.999, %v3385_v4 }
 0x4a3   : > { %v3145_v60 = vmul.f32 -1.442695, %v2492_v47  ;;  %v2285_v32 = vadd.f32 %v2262_v59, %v2220_v46  ;;  %v2038_v46 = vadd.f32 %v4522_v63, %v4308_v11 }
 0x4a4   : > { %v3387_v57 = vpop.eup %3386  ;;  %v2493_v19 = vadd.f32 -0.0010005003, %v4525_v27  ;;  %v4530_v25 = vadd.f32 0.001, %v2560_v52 }
 0x4a5   : > { %3390 = vpow2.f32 %v3145_v60  ;;  %v4528_v24 = vpop.permute.xlu1 %2082  ;;  %v2582_v54 = vmul.f32 0.6931472, %v3387_v57 }
 0x4a6   : > { %v2133_v28 = vpop.permute.xlu0 %2132  ;;  %v3146_v50 = vmul.f32 -1.442695, %v2493_v19  ;;  %3392 = vlog2.f32 %v4530_v25 }
 0x4a7   : > { %v2600_v6 = vmul.f32 %v3740_v34, %v2582_v54  ;;  %v2155_v57 = vadd.f32 %v2133_v28, %v2103_v43  ;;  %v2417_v43 = vld [vmem:[#allocation6 + $0xc8] sm:$0x3f] }
 0x4a8   : > { %3394 = vpow2.f32 %v3146_v50 }
 0x4a9   : > { %2621 = vrot.lane.b32.xlu1 %v2600_v6, %s3487_s12  ;;  %v2199_v49 = vpop.permute.xlu1 %2198 }
 0x4aa   : > { %v2314_v12 = vpop.permute.xlu0 %2313  ;;  %v2221_v14 = vadd.f32 %v2199_v49, %v2155_v57 }
 0x4ab   : > { %v2337_v51 = vadd.f32 %v2314_v12, %v2285_v32  ;;  %v2446_v32 = vsel %vm1669_vm3, %v2443_v45, %v2445_v9 }
 0x4ad   : > { %v2264_v1 = vpop.permute.xlu1 %2263 }
 0x4ae   : > { %v3389_v8 = vpop.eup %3388  ;;  %v2019_v18 = vpop.permute.xlu0 %2018  ;;  %v2286_v50 = vadd.f32 %v2264_v1, %v2221_v14 }
 0x4af   : > { %v2561_v31 = vmul.f32 1.999, %v3389_v8  ;;  %v2039_v56 = vadd.f32 %v2019_v18, %v4316_v53 }
 0x4b1   : > { %v4539_v13 = vadd.f32 0.001, %v2561_v31  ;;  %v2380_v17 = vpop.permute.xlu1 %2379  ;;  %v2104_v31 = vadd.f32 %v4528_v24, %v2038_v46  ;;  %v2416_v24 = vld [vmem:[#allocation6 + $0xb8] sm:$0xff] }
 0x4b2   : > { %v3391_v55 = vpop.eup %3390  ;;  %v2135_v0 = vpop.permute.xlu0 %2134  ;;  %v2403_v44 = vadd.f32 %v2380_v17, %v2337_v51  ;;  %v2447_v14 = vrot.slane %v2416_v24, 6 }
 0x4b3   : > { %v2532_v2 = vadd.f32 1.0, %v3391_v55  ;;  %3396 = vlog2.f32 %v4539_v13  ;;  %v3393_v61 = vpop.eup %3392 }
 0x4b4   : > { %v2467_v47 = vadd.f32 %v2444_v58, %v2403_v44  ;;  %v2584_v60 = vmul.f32 0.6931472, %v3393_v61  ;;  %v2156_v44 = vadd.f32 %v2135_v0, %v2104_v31 }
 0x4b5   : > { %3398 = vrcp.f32 %v2532_v2  ;;  %v3395_v10 = vpop.eup %3394  ;;  %v2085_v4 = vpop.permute.xlu1 %2084 }
 0x4b6   : > { %v2201_v59 = vpop.permute.xlu0 %2200  ;;  %v2533_v52 = vadd.f32 1.0, %v3395_v10  ;;  %v4546_v19 = vadd.f32 %v4468_v15, %v2467_v47  ;;  %v2601_v48 = vmul.f32 %v3743_v35, %v2584_v60  ;;  %v2105_v51 = vadd.f32 %v2085_v4, %v2039_v56 }
 0x4b7   : > { %v2222_v63 = vadd.f32 %v2201_v59, %v2156_v44 }
 0x4b8   : > { %3400 = vrcp.f32 %v2533_v52  ;;  %v2494_v54 = vadd.f32 -0.0010005003, %v4546_v19  ;;  %2623 = vrot.lane.b32.xlu0 %v2601_v48, %s3487_s12 }
 0x4b9   : > { %v2266_v22 = vpop.permute.xlu1 %2265 }
 0x4ba   : > { %v2316_v5 = vpop.permute.xlu0 %2315  ;;  %v3147_v6 = vmul.f32 -1.442695, %v2494_v54  ;;  %v2287_v0 = vadd.f32 %v2266_v22, %v2222_v63  ;;  %v2449_v54 = vrot.slane %v2417_v43, 6  ;;  %v2448_v22 = vsel %vm1669_vm3, %v2445_v9, %v2447_v14 }
 0x4bb   : > { %v2338_v12 = vadd.f32 %v2316_v5, %v2286_v50 }
 0x4bc   : > { %3402 = vpow2.f32 %v3147_v6  ;;  %v2450_v56 = vsel %vm1669_vm3, %v2447_v14, %v2449_v54 }
 0x4bd   : > { %v2137_v26 = vpop.permute.xlu1 %2136 }
 0x4be   : > { %v2382_v28 = vpop.permute.xlu0 %2381  ;;  %v2157_v61 = vadd.f32 %v2137_v26, %v2105_v51 }
 0x4bf   : > { %v2404_v49 = vadd.f32 %v2382_v28, %v2338_v12 }
 0x4c0   : > { %v3397_v8 = vpop.eup %3396 }
 0x4c1   : > { %v2468_v55 = vadd.f32 %v2446_v32, %v2404_v49  ;;  %v2586_v1 = vmul.f32 0.6931472, %v3397_v8  ;;  %v2318_v2 = vpop.permute.xlu1 %2317 }
 0x4c2   : > { %v3399_v17 = vpop.eup %3398  ;;  %v2203_v21 = vpop.permute.xlu0 %2202  ;;  %v2339_v59 = vadd.f32 %v2318_v2, %v2287_v0 }
 0x4c3   : > { %v4557_v58 = vadd.f32 %v4468_v15, %v2468_v55  ;;  %v2602_v11 = vmul.f32 %v3746_v36, %v2586_v1  ;;  %v2562_v53 = vmul.f32 1.999, %v3399_v17  ;;  %v2223_v45 = vadd.f32 %v2203_v21, %v2157_v61 }
 0x4c5   : > { %v2495_v18 = vadd.f32 -0.0010005003, %v4557_v58  ;;  %2625 = vrot.lane.b32.xlu1 %v2602_v11, %s3487_s12  ;;  %v3401_v47 = vpop.eup %3400  ;;  %v2320_v4 = vpop.permute.xlu1 %2319  ;;  %v4562_v60 = vadd.f32 0.001, %v2562_v53 }
 0x4c6   : > { %v2268_v10 = vpop.permute.xlu0 %2267  ;;  %v2563_v48 = vmul.f32 1.999, %v3401_v47 }
 0x4c7   : > { %v3148_v52 = vmul.f32 -1.442695, %v2495_v18  ;;  %v2288_v57 = vadd.f32 %v2268_v10, %v2223_v45  ;;  %3404 = vlog2.f32 %v4562_v60 }
 0x4c8   : > { %v4565_v5 = vadd.f32 0.001, %v2563_v48 }
 0x4c9   : > { %3406 = vpow2.f32 %v3148_v52  ;;  %v2340_v62 = vadd.f32 %v2320_v4, %v2288_v57  ;;  %v3403_v50 = vpop.eup %3402  ;;  %v2386_v12 = vpop.permute.xlu1 %2385 }
 0x4ca   : > { %v2384_v6 = vpop.permute.xlu0 %2383  ;;  %v2534_v28 = vadd.f32 1.0, %v3403_v50  ;;  %3408 = vlog2.f32 %v4565_v5 }
 0x4cb   : > { %v2405_v26 = vadd.f32 %v2384_v6, %v2339_v59  ;;  %v2406_v46 = vadd.f32 %v2386_v12, %v2340_v62 }
 0x4cc   : > { %3410 = vrcp.f32 %v2534_v28 }
 0x4cd   : > { %v2469_v49 = vadd.f32 %v2448_v22, %v2405_v26  ;;  %v2470_v8 = vadd.f32 %v2450_v56, %v2406_v46  ;;  %v4592_v22 = vld [vmem:[#allocation2] sm:$0xff]  ;;  %v2760_v56 = vld [vmem:[#allocation3] sm:$0xff] }
 0x4ce   : > { %2770 = vst.msk [vmem:[#allocation2] sm:$0xff] %vm1234_vm11, %v2760_v56 }
 0x4cf   : > { %v4571_v32 = vadd.f32 %v4468_v15, %v2469_v49  ;;  %v4574_v31 = vadd.f32 %v4468_v15, %v2470_v8 }
 0x4d1   : > { %v2496_v51 = vadd.f32 -0.0010005003, %v4571_v32  ;;  %v2497_v55 = vadd.f32 -0.0010005003, %v4574_v31 }
 0x4d3   : > { %v3149_v1 = vmul.f32 -1.442695, %v2496_v51  ;;  %v3150_v17 = vmul.f32 -1.442695, %v2497_v55  ;;  %v4595_v55 = vld [vmem:[#allocation2 + $0x8] sm:$0xff] }
 0x4d4   : > { %v3405_v21 = vpop.eup %3404 }
 0x4d5   : > { %3412 = vpow2.f32 %v3149_v1  ;;  %v2588_v2 = vmul.f32 0.6931472, %v3405_v21  ;;  %v2761_v1 = vld [vmem:[#allocation3 + $0x8] sm:$0xff] }
 0x4d6   : > { %v3407_v9 = vpop.eup %3406  ;;  %3414 = vpow2.f32 %v3150_v17  ;;  %2771 = vst.msk [vmem:[#allocation2 + $0x8] sm:$0xff] %vm1234_vm11, %v2761_v1 }
 0x4d7   : > { %v2535_v44 = vadd.f32 1.0, %v3407_v9  ;;  %v3409_v61 = vpop.eup %3408  ;;  %v2603_v11 = vmul.f32 %v3749_v37, %v2588_v2  ;;  %v4601_v2 = vld [vmem:[#allocation2 + $0x10] sm:$0xff] }
 0x4d8   : > { %v2590_v53 = vmul.f32 0.6931472, %v3409_v61  ;;  %v4605_v61 = vld [vmem:[#allocation2 + $0x18] sm:$0xff] }
 0x4d9   : > { %3416 = vrcp.f32 %v2535_v44  ;;  %v3411_v63 = vpop.eup %3410  ;;  %2627 = vrot.lane.b32.xlu0 %v2603_v11, %s3487_s12  ;;  %v2762_v44 = vld [vmem:[#allocation3 + $0x10] sm:$0xff]  ;;  %v2763_v11 = vld [vmem:[#allocation3 + $0x18] sm:$0xff] }
 0x4da   : > { %v2604_v15 = vmul.f32 %v3752_v38, %v2590_v53  ;;  %v2564_v18 = vmul.f32 1.999, %v3411_v63  ;;  %2772 = vst.msk [vmem:[#allocation2 + $0x10] sm:$0xff] %vm1234_vm11, %v2762_v44  ;;  %2773 = vst.msk [vmem:[#allocation2 + $0x18] sm:$0xff] %vm1234_vm11, %v2763_v11  ;;  %v4610_v53 = vld [vmem:[#allocation2 + $0x20] sm:$0xff]  ;;  %v2764_v63 = vld [vmem:[#allocation3 + $0x20] sm:$0xff] }
 0x4db   : > { %2774 = vst.msk [vmem:[#allocation2 + $0x20] sm:$0xff] %vm1234_vm11, %v2764_v63  ;;  %v2690_v63 = vadd.f32 %v4592_v22, %v4472_v23 }
 0x4dc   : > { %2629 = vrot.lane.b32.xlu1 %v2604_v15, %s3487_s12  ;;  %v4582_v45 = vadd.f32 0.001, %v2564_v18  ;;  %v4615_v15 = vld [vmem:[#allocation2 + $0x28] sm:$0xff]  ;;  %v2765_v18 = vld [vmem:[#allocation3 + $0x28] sm:$0xff] }
 0x4dd   : > { %2775 = vst.msk [vmem:[#allocation2 + $0x28] sm:$0xff] %vm1234_vm11, %v2765_v18 }
 0x4de   : > { %3418 = vlog2.f32 %v4582_v45 }
 0x4e2   : > { %v3413_v24 = vpop.eup %3412 }
 0x4e3   : > { %v3415_v43 = vpop.eup %3414  ;;  %v2536_v47 = vadd.f32 1.0, %v3413_v24  ;;  %v4620_v24 = vld [vmem:[#allocation2 + $0x30] sm:$0xff] }
 0x4e4   : > { %v2537_v10 = vadd.f32 1.0, %v3415_v43  ;;  %v4625_v43 = vld [vmem:[#allocation2 + $0x38] sm:$0xff] }
 0x4e5   : > { %3420 = vrcp.f32 %v2536_v47  ;;  %v4630_v47 = vld [vmem:[#allocation2 + $0x48] sm:$0xff] }
 0x4e6   : > { %v3417_v4 = vpop.eup %3416  ;;  %3422 = vrcp.f32 %v2537_v10 }
 0x4e7   : > { %v2565_v0 = vmul.f32 1.999, %v3417_v4 }
 0x4e9   : > { %v2575_v52 = vadd.f32 0.001, %v2565_v0 }
 0x4eb   : > { %3424 = vlog2.f32 %v2575_v52  ;;  %v3419_v57 = vpop.eup %3418 }
 0x4ec   : > { %v2592_v48 = vmul.f32 0.6931472, %v3419_v57 }
 0x4ee   : > { %v2605_v14 = vmul.f32 %v3755_v39, %v2592_v48 }
 0x4f0   : > { %2631 = vrot.lane.b32.xlu0 %v2605_v14, %s3487_s12 }
 0x4f2   : > { %v3421_v54 = vpop.eup %3420 }
 0x4f3   : > { %v3423_v59 = vpop.eup %3422  ;;  %v2566_v62 = vmul.f32 1.999, %v3421_v54 }
 0x4f4   : > { %v2567_v50 = vmul.f32 1.999, %v3423_v59 }
 0x4f5   : > { %v4587_v6 = vadd.f32 0.001, %v2566_v62 }
 0x4f6   : > { %v2577_v12 = vadd.f32 0.001, %v2567_v50 }
 0x4f7   : > { %3426 = vlog2.f32 %v4587_v6 }
 0x4f8   : > { %v3425_v28 = vpop.eup %3424  ;;  %3428 = vlog2.f32 %v2577_v12 }
 0x4f9   : > { %v2594_v26 = vmul.f32 0.6931472, %v3425_v28 }
 0x4fb   : > { %v2606_v46 = vmul.f32 %v3758_v40, %v2594_v26 }
 0x4fd   : > { %2633 = vrot.lane.b32.xlu1 %v2606_v46, %s3487_s12 }
 0x504   : > { %v3427_v49 = vpop.eup %3426 }
 0x505   : > { %v3429_v8 = vpop.eup %3428  ;;  %v2596_v51 = vmul.f32 0.6931472, %v3427_v49 }
 0x506   : > { %v2598_v17 = vmul.f32 0.6931472, %v3429_v8 }
 0x507   : > { %v2607_v21 = vmul.f32 %v3761_v41, %v2596_v51 }
 0x508   : > { %v2608_v9 = vmul.f32 %v3764_v42, %v2598_v17 }
 0x509   : > { %2635 = vrot.lane.b32.xlu0 %v2607_v21, %s3487_s12 }
 0x50a   : > { %2637 = vrot.lane.b32.xlu1 %v2608_v9, %s3487_s12 }
 0x50e   : > { %2710 = vrot.lane.b32.xlu1 %v4492_v30, %s3487_s12  ;;  %v2766_v30 = vld [vmem:[#allocation3 + $0x30] sm:$0xff] }
 0x50f   : > { %2776 = vst.msk [vmem:[#allocation2 + $0x30] sm:$0xff] %vm1234_vm11, %v2766_v30 }
 0x512   : > { %2712 = vrot.lane.b32.xlu1 %v4511_v3, %s3487_s12  ;;  %v2767_v3 = vld [vmem:[#allocation3 + $0x38] sm:$0xff] }
 0x513   : > { %2777 = vst.msk [vmem:[#allocation2 + $0x38] sm:$0xff] %vm1234_vm11, %v2767_v3 }
 0x516   : > { %2714 = vrot.lane.b32.xlu1 %v4530_v25, %s3487_s12  ;;  %v2769_v25 = vld [vmem:[#allocation3 + $0x48] sm:$0xff] }
 0x517   : > { %2779 = vst.msk [vmem:[#allocation2 + $0x48] sm:$0xff] %vm1234_vm11, %v2769_v25  ;;  %v2691_v25 = vadd.f32 %v4595_v55, %v4480_v20 }
 0x51a   : > { %2716 = vrot.lane.b32.xlu1 %v4539_v13, %s3487_s12  ;;  %v2620_v13 = vpop.permute.xlu0 %2619 }
 0x51b   : > { %v2622_v10 = vpop.permute.xlu1 %2621  ;;  %v2649_v57 = vsel %vm1234_vm11, %v2620_v13, 0.0 }
 0x51c   : > { %v2650_v4 = vsel %vm1234_vm11, %v2622_v10, 0.0 }
 0x51e   : > { %2718 = vrot.lane.b32.xlu1 %v4562_v60, %s3487_s12 }
 0x522   : > { %2720 = vrot.lane.b32.xlu1 %v4565_v5, %s3487_s12  ;;  %v2651_v5 = vadd.f32 %v2650_v4, %v2649_v57  ;;  %v2692_v4 = vadd.f32 %v4601_v2, %v4486_v29  ;;  %v2768_v29 = vld [vmem:[#allocation3 + $0x40] sm:$0xff] }
 0x526   : > { %2722 = vrot.lane.b32.xlu1 %v4582_v45, %s3487_s12 }
 0x52a   : > { %2724 = vrot.lane.b32.xlu1 %v2575_v52, %s3487_s12  ;;  %v2624_v60 = vpop.permute.xlu0 %2623 }
 0x52b   : > { %v2652_v48 = vsel %vm1234_vm11, %v2624_v60, 0.0 }
 0x52c   : > { %v2653_v59 = vadd.f32 %v2652_v48, %v2651_v5  ;;  %v2688_v48 = vld [vmem:[#allocation2 + $0x40] sm:$0xff] }
 0x52d   : > { %2778 = vst.msk [vmem:[#allocation2 + $0x40] sm:$0xff] %vm1234_vm11, %v2768_v29 }
 0x52e   : > { %2728 = vrot.lane.b32.xlu1 %v2577_v12, %s3487_s12 }
 0x537   : > { %v2626_v0 = vpop.permute.xlu1 %2625 }
 0x538   : > { %v2654_v54 = vsel %vm1234_vm11, %v2626_v0, 0.0 }
 0x539   : > { %v2655_v62 = vadd.f32 %v2654_v54, %v2653_v59 }
 0x54b   : > { %v2628_v14 = vpop.permute.xlu0 %2627 }
 0x54c   : > { %v2656_v52 = vsel %vm1234_vm11, %v2628_v14, 0.0 }
 0x54d   : > { %v2657_v28 = vadd.f32 %v2656_v52, %v2655_v62 }
 0x54e   : > { %v2630_v45 = vpop.permute.xlu1 %2629 }
 0x54f   : > { %v2658_v12 = vsel %vm1234_vm11, %v2630_v45, 0.0 }
 0x550   : > { %v2659_v56 = vadd.f32 %v2658_v12, %v2657_v28 }
 0x562   : > { %v2632_v50 = vpop.permute.xlu0 %2631 }
 0x563   : > { %v2660_v46 = vsel %vm1234_vm11, %v2632_v50, 0.0 }
 0x564   : > { %v2661_v8 = vadd.f32 %v2660_v46, %v2659_v56 }
 0x56f   : > { %v2634_v26 = vpop.permute.xlu1 %2633 }
 0x570   : > { %v2662_v49 = vsel %vm1234_vm11, %v2634_v26, 0.0  ;;  %v2578_v26 = vld [vmem:[#allocation7] sm:$0x1] }
 0x571   : > { %v2663_v51 = vadd.f32 %v2662_v49, %v2661_v8 }
 0x57b   : > { %v2636_v1 = vpop.permute.xlu0 %2635 }
 0x57c   : > { %v2664_v17 = vsel %vm1234_vm11, %v2636_v1, 0.0  ;;  %v2638_v21 = vpop.permute.xlu1 %2637 }
 0x57d   : > { %v2665_v9 = vadd.f32 %v2664_v17, %v2663_v51  ;;  %v2666_v44 = vsel %vm1234_vm11, %v2638_v21, 0.0 }
 0x57f   : > { %v2667_v11 = vadd.f32 %v2666_v44, %v2665_v9 }
 0x580   : > { %v2711_v18 = vpop.permute.xlu1 %2710 }
 0x581   : > { %v2740_v30 = vmul.f32 %v2711_v18, %v2690_v63  ;;  %2668 = vadd.xlane.f32.xlu0 %v2667_v11 }
 0x583   : > { %v2750_v3 = vmul.f32 %v3737_v33, %v2740_v30  ;;  %v2693_v33 = vadd.f32 %v4605_v61, %v4499_v16  ;;  %v2695_v16 = vadd.f32 %v4615_v15, %v4525_v27  ;;  %v2697_v27 = vadd.f32 %v4625_v43, %v4557_v58 }
 0x584   : > { %v2713_v13 = vpop.permute.xlu1 %2712  ;;  %v2698_v43 = vadd.f32 %v2688_v48, %v4571_v32 }
 0x585   : > { %2780 = vst.msk [vmem:[#allocation3] sm:$0xff] %vm1234_vm11, %v2750_v3  ;;  %v2741_v10 = vmul.f32 %v2713_v13, %v2691_v25 }
 0x587   : > { %v2751_v60 = vmul.f32 %v3740_v34, %v2741_v10  ;;  %v2694_v34 = vadd.f32 %v4610_v53, %v4518_v7  ;;  %v2696_v7 = vadd.f32 %v4620_v24, %v4546_v19 }
 0x588   : > { %v2715_v0 = vpop.permute.xlu1 %2714 }
 0x589   : > { %2781 = vst.msk [vmem:[#allocation3 + $0x8] sm:$0xff] %vm1234_vm11, %v2751_v60  ;;  %v2742_v23 = vmul.f32 %v2715_v0, %v2692_v4 }
 0x58b   : > { %v2752_v22 = vmul.f32 %v3743_v35, %v2742_v23 }
 0x58c   : > { %v2717_v57 = vpop.permute.xlu1 %2716 }
 0x58d   : > { %2782 = vst.msk [vmem:[#allocation3 + $0x10] sm:$0xff] %vm1234_vm11, %v2752_v22  ;;  %v2743_v20 = vmul.f32 %v2717_v57, %v2693_v33 }
 0x58f   : > { %v2753_v55 = vmul.f32 %v3746_v36, %v2743_v20 }
 0x590   : > { %v2719_v2 = vpop.permute.xlu1 %2718 }
 0x591   : > { %2783 = vst.msk [vmem:[#allocation3 + $0x18] sm:$0xff] %vm1234_vm11, %v2753_v55  ;;  %v2744_v35 = vmul.f32 %v2719_v2, %v2694_v34 }
 0x593   : > { %v2754_v5 = vmul.f32 %v3749_v37, %v2744_v35 }
 0x594   : > { %v2721_v61 = vpop.permute.xlu1 %2720 }
 0x595   : > { %2784 = vst.msk [vmem:[#allocation3 + $0x20] sm:$0xff] %vm1234_vm11, %v2754_v5  ;;  %v2745_v36 = vmul.f32 %v2721_v61, %v2695_v16 }
 0x597   : > { %v2755_v14 = vmul.f32 %v3752_v38, %v2745_v36  ;;  %2726 = vrot.lane.b32.xlu0 %v4587_v6, %s3487_s12  ;;  %v2699_v6 = vadd.f32 %v4630_v47, %v4574_v31 }
 0x598   : > { %v2723_v53 = vpop.permute.xlu1 %2722 }
 0x599   : > { %2785 = vst.msk [vmem:[#allocation3 + $0x28] sm:$0xff] %vm1234_vm11, %v2755_v14  ;;  %v2746_v54 = vmul.f32 %v2723_v53, %v2696_v7 }
 0x59b   : > { %v2756_v37 = vmul.f32 %v3755_v39, %v2746_v54 }
 0x59c   : > { %v2725_v15 = vpop.permute.xlu1 %2724 }
 0x59d   : > { %2786 = vst.msk [vmem:[#allocation3 + $0x30] sm:$0xff] %vm1234_vm11, %v2756_v37  ;;  %v2747_v59 = vmul.f32 %v2725_v15, %v2697_v27 }
 0x59f   : > { %v2757_v38 = vmul.f32 %v3758_v40, %v2747_v59 }
 0x5a0   : > { %v2729_v45 = vpop.permute.xlu1 %2728 }
 0x5a1   : > { %2787 = vst.msk [vmem:[#allocation3 + $0x38] sm:$0xff] %vm1234_vm11, %v2757_v38  ;;  %v2749_v19 = vmul.f32 %v2729_v45, %v2699_v6 }
 0x5a3   : > { %v2759_v24 = vmul.f32 %v3764_v42, %v2749_v19 }
 0x5a5   : > { %2789 = vst.msk [vmem:[#allocation3 + $0x48] sm:$0xff] %vm1234_vm11, %v2759_v24 }
 0x60a   : > { %v2669_v39 = vpop.xlane.xlu0 %2668 }
 0x60b   : > { %v2670_v52 = vrot.slane %v2669_v39, 4 }
 0x60d   : > { %v2671_v58 = vadd.f32 %v2670_v52, %v2669_v39 }
 0x60e   : > { %v2727_v62 = vpop.permute.xlu0 %2726 }
 0x60f   : > { %v2672_v50 = vrot.slane %v2671_v58, 2  ;;  %v2748_v12 = vmul.f32 %v2727_v62, %v2698_v43 }
 0x611   : > { %v2758_v40 = vmul.f32 %v3761_v41, %v2748_v12  ;;  %v2673_v28 = vadd.f32 %v2672_v50, %v2671_v58 }
 0x613   : > { %2788 = vst.msk [vmem:[#allocation3 + $0x40] sm:$0xff] %vm1234_vm11, %v2758_v40  ;;  %v2674_v31 = vrot.slane %v2673_v28, 1 }
 0x615   : > { %v2675_v47 = vadd.f32 %v2674_v31, %v2673_v28 }
 0x617   : > { %3273 = vpush %v2675_v47 }
 0x648   : > { %s3274_s18 = spop %3273  ;;  %2793 = sbr.rel (%p3151_p8) target bundleno = 1747 (0x6d3), region = 56 }
 0x649   : > { %v2677_v42 = vstv %s3274_s18 }
 0x64a   : > { %v2678_v46 = vadd.f32 %v2677_v42, %v2578_v26 }
 0x64c   : > { %2679 = vst [vmem:[#allocation7] sm:$0x1] %v2678_v46 }
 0x64d   : > { %v2806_v32 = vld [vmem:[#allocation3 + $0x10] sm:$0xff]  ;;  %v2804_v56 = vld [vmem:[#allocation3] sm:$0xff]  ;;  %v2807_v41 = vld [vmem:[#allocation3 + $0x18] sm:$0xff] }
 0x64e   : > { %2828 = vrot.lane.b32.xlu1 %v2806_v32, %s3488_s23  ;;  %2824 = vrot.lane.b32.xlu0 %v2804_v56, %s3488_s23  ;;  %v2805_v49 = vld [vmem:[#allocation3 + $0x8] sm:$0xff]  ;;  %v2808_v51 = vld [vmem:[#allocation3 + $0x20] sm:$0xff]  ;;  %v2811_v17 = vld [vmem:[#allocation3 + $0x38] sm:$0xff] }
 0x64f   : > { %v2809_v8 = vld [vmem:[#allocation3 + $0x28] sm:$0xff]  ;;  %v2810_v21 = vld [vmem:[#allocation3 + $0x30] sm:$0xff]  ;;  %v2812_v44 = vld [vmem:[#allocation3 + $0x40] sm:$0xff] }
 0x650   : > { %v2813_v9 = vld [vmem:[#allocation3 + $0x48] sm:$0xff]  ;;  %v2796_v11 = vld [vmem:[#allocation2 + $0x10] sm:$0xff]  ;;  %v2794_v63 = vld [vmem:[#allocation2] sm:$0xff] }
 0x651   : > { %v2797_v13 = vld [vmem:[#allocation2 + $0x18] sm:$0xff]  ;;  %v2795_v10 = vld [vmem:[#allocation2 + $0x8] sm:$0xff]  ;;  %v2798_v33 = vld [vmem:[#allocation2 + $0x20] sm:$0xff] }
 0x652   : > { %2830 = vrot.lane.b32.xlu1 %v2807_v41, %s3488_s23  ;;  %2826 = vrot.lane.b32.xlu0 %v2805_v49, %s3488_s23  ;;  %v2799_v22 = vld [vmem:[#allocation2 + $0x28] sm:$0xff]  ;;  %v2801_v48 = vld [vmem:[#allocation2 + $0x38] sm:$0xff]  ;;  %v2800_v29 = vld [vmem:[#allocation2 + $0x30] sm:$0xff] }
 0x653   : > { %v2874_v1 = vld [vmem:[#allocation7] sm:$0x1]  ;;  %v2803_v61 = vld [vmem:[#allocation2 + $0x48] sm:$0xff] }
 0x654   : > { %2875 = vst [vmem:[%s4773_s13] sm:$0x1] %v2874_v1  ;;  %v2802_v36 = vld [vmem:[#allocation2 + $0x40] sm:$0xff] }
 0x656   : > { %2834 = vrot.lane.b32.xlu1 %v2809_v8, %s3488_s23  ;;  %2832 = vrot.lane.b32.xlu0 %v2808_v51, %s3488_s23 }
 0x65a   : > { %2838 = vrot.lane.b32.xlu1 %v2811_v17, %s3488_s23  ;;  %2836 = vrot.lane.b32.xlu0 %v2810_v21, %s3488_s23 }
 0x65e   : > { %2842 = vrot.lane.b32.xlu1 %v2813_v9, %s3488_s23  ;;  %2840 = vrot.lane.b32.xlu0 %v2812_v44, %s3488_s23 }
 0x6c0   : > { %v2829_v18 = vpop.permute.xlu1 %2828  ;;  %v2825_v30 = vpop.permute.xlu0 %2824 }
 0x6c1   : > { %v2856_v3 = vsel %vm1234_vm11, %v2796_v11, %v2829_v18  ;;  %v2854_v25 = vsel %vm1234_vm11, %v2794_v63, %v2825_v30 }
 0x6c2   : > { %2866 = vst.msk [vmem:[%s3640_s16 + $0x10] sm:$0xff] %vm1245_vm0, %v2856_v3  ;;  %2864 = vst.msk [vmem:[%s3640_s16] sm:$0xff] %vm1245_vm0, %v2854_v25 }
 0x6c4   : > { %v2831_v60 = vpop.permute.xlu1 %2830  ;;  %v2827_v4 = vpop.permute.xlu0 %2826 }
 0x6c5   : > { %v2857_v0 = vsel %vm1234_vm11, %v2797_v13, %v2831_v60  ;;  %v2855_v23 = vsel %vm1234_vm11, %v2795_v10, %v2827_v4 }
 0x6c6   : > { %2867 = vst.msk [vmem:[%s3640_s16 + $0x18] sm:$0xff] %vm1245_vm0, %v2857_v0  ;;  %2865 = vst.msk [vmem:[%s3640_s16 + $0x8] sm:$0xff] %vm1245_vm0, %v2855_v23 }
 0x6c8   : > { %v2835_v57 = vpop.permute.xlu1 %2834  ;;  %v2833_v20 = vpop.permute.xlu0 %2832 }
 0x6c9   : > { %v2859_v55 = vsel %vm1234_vm11, %v2799_v22, %v2835_v57  ;;  %v2858_v34 = vsel %vm1234_vm11, %v2798_v33, %v2833_v20 }
 0x6ca   : > { %2869 = vst.msk [vmem:[%s3640_s16 + $0x28] sm:$0xff] %vm1245_vm0, %v2859_v55  ;;  %2868 = vst.msk [vmem:[%s3640_s16 + $0x20] sm:$0xff] %vm1245_vm0, %v2858_v34 }
 0x6cc   : > { %v2839_v2 = vpop.permute.xlu1 %2838  ;;  %v2837_v35 = vpop.permute.xlu0 %2836 }
 0x6cd   : > { %v2861_v5 = vsel %vm1234_vm11, %v2801_v48, %v2839_v2  ;;  %v2860_v16 = vsel %vm1234_vm11, %v2800_v29, %v2837_v35 }
 0x6ce   : > { %2871 = vst.msk [vmem:[%s3640_s16 + $0x38] sm:$0xff] %vm1245_vm0, %v2861_v5  ;;  %2870 = vst.msk [vmem:[%s3640_s16 + $0x30] sm:$0xff] %vm1245_vm0, %v2860_v16 }
 0x6d0   : > { %v2843_v14 = vpop.permute.xlu1 %2842  ;;  %v2841_v7 = vpop.permute.xlu0 %2840 }
 0x6d1   : > { %v2863_v53 = vsel %vm1234_vm11, %v2803_v61, %v2843_v14  ;;  %v2862_v54 = vsel %vm1234_vm11, %v2802_v36, %v2841_v7 }
 0x6d2   : > { %2873 = vst.msk [vmem:[%s3640_s16 + $0x48] sm:$0xff] %vm1245_vm0, %v2863_v53  ;;  %2872 = vst.msk [vmem:[%s3640_s16 + $0x40] sm:$0xff] %vm1245_vm0, %v2862_v54 }
 0x6d3 PF: > { %s19_s9 = sadd.s32 1, %s3468_s9   ;;  %s4774_s27 = smov %s3460_s29 }
 0x6d4   : > { %p16_p9 = scmp.ge.s32.totalorder %s19_s9, 6   ;;  %s4775_s28 = smov %s3464_s30 }
 0x6d5   : > { %s4776_s29 = smov %s4779_s10  ;;  %s4777_s30 = smov %s4783_s11 }
 0x6d6   :  { %18 = sbr.rel (!%p16_p9) target bundleno = 3 (0x3), region = 116 }

</bundles_post_ra>
